<compile_context>
chip_gen: v6e
topology: v6e:2x2x1
jax: 0.10.0
libtpu: 0.0.40
codegen_flags: <defaults>
</compile_context>

<pallas_src>
import jax
import jax.numpy as jnp
from jax import lax
from jax.experimental import pallas as pl
from jax.experimental.pallas import tpu as pltpu


# --------------------------------------------------------------------------- #
# Kernel
# --------------------------------------------------------------------------- #
def _residual_conv2d_kernel(x_ref, w_ref, b_ref, out_ref, slab_ref):
    """One (batch, row-tile) step.

    x_ref    : (1, H+2, W+2, C)  spatially halo-padded NHWC image, resident
               across the row-tile grid axis (index_map depends on b only).
    w_ref    : (9*C, C)          im2col weight, rows ordered (ky, kx, c_in).
    b_ref    : (1, C)            bias.
    out_ref  : (1, TR, W, C)     conv(x) + bias + x for TR output rows.
    slab_ref : (TR*W, 9*C) f32   im2col scratch (VMEM).
    """
    r = pl.program_id(1)
    _, _, wpad, c = x_ref.shape
    _, tr, wd, _ = out_ref.shape
    assert wpad == wd + 2

    # First padded input row of this tile (output row r*tr needs padded rows
    # r*tr .. r*tr+2).  Hint alignment for the dynamic slice starts below.
    row0 = pl.multiple_of(r * tr, tr)

    # ---- im2col: pack the 9 taps onto the matmul K axis (K = 9*C). ---------
    # Each tap is a (tr, wd, C) shifted window read directly from the resident
    # VMEM input block and written into its C-lane slot of the slab.  The store
    # ends the tap's live range, so no 9-way chain of big temporaries stays
    # live (review: bounded liveness / no per-tap (M, Cp) f32 slabs).
    for t in range(9):
        ky, kx = divmod(t, 3)
        tile = x_ref[0, pl.ds(row0 + ky, tr), pl.ds(kx, wd), :]
        slab_ref[:, t * c:(t + 1) * c] = tile.reshape(tr * wd, c)

    # ---- single MXU matmul per tile: (TR*W, 9C) @ (9C, C) -> f32. ----------
    # K = 9*C fills the MXU depth far better than nine K=C passes; the whole
    # tap reduction is accumulated inside the MXU (single accumulator chain).
    # NOTE: Mosaic lowers the f32 matmul at full precision; raise precision
    # explicitly here only if bit-tight parity with torch is ever required.
    y = jnp.dot(slab_ref[...], w_ref[...], preferred_element_type=jnp.float32)

    # ---- fused bias + residual (residual == the centre tap, already packed).
    res = slab_ref[:, 4 * c:5 * c]
    y = y + b_ref[...] + res

    out_ref[0] = y.reshape(tr, wd, c).astype(out_ref.dtype)


# --------------------------------------------------------------------------- #
# Tiling / VMEM budgeting
# --------------------------------------------------------------------------- #
def _working_set_bytes(tr, C, H, W):
    """Honest per-step VMEM working set (counts double-buffering)."""
    f32 = 4
    in_blk = 2 * (H + 2) * (W + 2) * C * f32      # resident padded image, 2x buffered
    out_blk = 2 * tr * W * C * f32                # output row tile, 2x buffered
    wgt = 2 * (9 * C * C + 8 * 128) * f32         # weights + bias (worst case 2x)
    slab = tr * W * 9 * C * f32                   # im2col scratch
    temps = slab + 4 * tr * W * C * f32           # slab load + result/residual temps
    return in_blk + out_blk + wgt + slab + temps


def _pick_row_tiling(B, C, H, W, vmem_budget_bytes=12 << 20):
    """Rows-per-tile TR (dividing H) such that the double-buffered working set
    fits the budget (v7x: 64 MiB physical VMEM) while still giving the
    pipeline / both v7x TensorCores at least ~4 grid steps when possible."""
    n_tiles = 1
    # Shrink the tile until the working set fits the VMEM budget.
    while (_working_set_bytes(H // n_tiles, C, H, W) > vmem_budget_bytes
           and H % (2 * n_tiles) == 0 and H // (2 * n_tiles) >= 1):
        n_tiles *= 2
    # Ensure enough grid steps for DMA overlap / megacore when B is small.
    while B * n_tiles < 4 and H % (2 * n_tiles) == 0 and H // (2 * n_tiles) >= 4:
        n_tiles *= 2
    return H // n_tiles, n_tiles


# --------------------------------------------------------------------------- #
# pallas_call construction
# --------------------------------------------------------------------------- #
def _make_conv_call(B, C, H, W, dtype, TR, n_row_tiles, vmem_limit,
                    single_buffer_consts):
    # Resident operands (constant index_map) don't need double-buffering.
    const_kw = dict(pipeline_mode=pl.Buffered(1)) if single_buffer_consts else {}
    return pl.pallas_call(
        _residual_conv2d_kernel,
        out_shape=jax.ShapeDtypeStruct((B, H, W, C), dtype),
        grid=(B, n_row_tiles),
        in_specs=[
            # Full padded image per batch element, resident across the row axis
            # (block index depends only on b -> fetched once per b).
            pl.BlockSpec((1, H + 2, W + 2, C), lambda b, r: (b, 0, 0, 0)),
            pl.BlockSpec((9 * C, C), lambda b, r: (0, 0), **const_kw),
            pl.BlockSpec((1, C), lambda b, r: (0, 0), **const_kw),
        ],
        out_specs=pl.BlockSpec((1, TR, W, C), lambda b, r: (b, r, 0, 0)),
        scratch_shapes=[pltpu.VMEM((TR * W, 9 * C), jnp.float32)],
        compiler_params=pltpu.CompilerParams(
            dimension_semantics=("parallel", "parallel"),
            vmem_limit_bytes=vmem_limit),
    )


def residual_conv2d(x, weight, bias):
    """x: (B, C, H, W) f32, weight: (C, C, 3, 3) PyTorch OIHW, bias: (C,).

    Returns conv2d(x, weight, bias, stride=1, padding=1) + x, shape (B, C, H, W).
    """
    B, C, H, W = x.shape
    assert weight.shape == (C, C, 3, 3)
    assert bias.shape == (C,)

    # Channels-last + spatial halo pad only (NO channel padding: one fused,
    # cheap XLA layout op instead of a 4x-padded HBM copy of x).
    x_nhwc_pad = jnp.pad(jnp.transpose(x, (0, 2, 3, 1)),
                         ((0, 0), (1, 1), (1, 1), (0, 0)))        # (B, H+2, W+2, C)

    # im2col weight: OIHW -> (ky, kx, c_in, c_out) -> (9*C_in, C_out).
    w_mat = jnp.transpose(weight, (2, 3, 1, 0)).reshape(9 * C, C)
    b_row = bias.reshape(1, C)

    TR, n_row_tiles = _pick_row_tiling(B, C, H, W)
    assert H % n_row_tiles == 0
    ws = _working_set_bytes(TR, C, H, W)
    vmem_limit = int(min(40 << 20, max(ws + (8 << 20), 24 << 20)))

    args = (x_nhwc_pad, w_mat, b_row)
    try:
        out_nhwc = _make_conv_call(B, C, H, W, x.dtype, TR, n_row_tiles,
                                   vmem_limit, True)(*args)
    except Exception:
        # pipeline_mode=pl.Buffered(1) on top-level in_specs may not be
        # supported on every jax version; retry with default double-buffering.
        out_nhwc = _make_conv_call(B, C, H, W, x.dtype, TR, n_row_tiles,
                                   vmem_limit, False)(*args)

    # Back to the PyTorch-facing NCHW layout (no channel slice needed anymore).
    return jnp.transpose(out_nhwc, (0, 3, 1, 2))


# --------------------------------------------------------------------------- #
# Reference + self-test
# --------------------------------------------------------------------------- #
def residual_conv2d_reference(x, weight, bias):
    """Plain-JAX reference (mirrors torch.nn.Conv2d(C, C, 3, 1, 1) + residual)."""
    y = lax.conv_general_dilated(
        x, weight, window_strides=(1, 1), padding=((1, 1), (1, 1)),
        dimension_numbers=("NCHW", "OIHW", "NCHW"),
        precision=lax.Precision.HIGHEST)
    return y + bias[None, :, None, None] + x


if __name__ == "__main__":
    # Small shapes consistent with the module: x is (batch, channels, H, W).
    B, C, H, W = 2, 32, 16, 16
    key = jax.random.PRNGKey(0)
    kx, kw, kb = jax.random.split(key, 3)

    fan_in = C * 3 * 3
    scale = 1.0 / jnp.sqrt(jnp.float32(fan_in))        # PyTorch-style init scale
    x = jax.random.normal(kx, (B, C, H, W), jnp.float32)
    weight = jax.random.uniform(kw, (C, C, 3, 3), jnp.float32, -scale, scale)
    bias = jax.random.uniform(kb, (C,), jnp.float32, -scale, scale)

    out = residual_conv2d(x, weight, bias)
    out = jax.block_until_ready(out)

    ref = residual_conv2d_reference(x, weight, bias)
    assert out.shape == (B, C, H, W)
    assert jnp.allclose(out, ref, atol=1e-4, rtol=1e-4), "mismatch vs reference"

    print("KERNEL_OK")
</pallas_src>

<mosaic_0001>
module attributes {stable_mosaic.version = 11 : i64} {
  func.func @_residual_conv2d_kernel(%arg0: i32, %arg1: i32, %arg2: memref<1x18x18x32xf32, #tpu.memory_space<vmem>>, %arg3: memref<288x32xf32, #tpu.memory_space<vmem>>, %arg4: memref<1x32xf32, #tpu.memory_space<vmem>>, %arg5: memref<1x8x16x32xf32, #tpu.memory_space<vmem>>, %arg6: memref<128x288xf32, #tpu.memory_space<vmem>>) attributes {dimension_semantics = [#tpu.dimension_semantics<parallel>, #tpu.dimension_semantics<parallel>], iteration_bounds = array<i64: 2, 2>, scalar_prefetch = 0 : i64, scratch_operands = 1 : i64, tpu.core_type = #tpu.core_type<tc>, window_params = [{transform_indices = @transform_0, window_bounds = array<i64: 1, 18, 18, 32>}, {pipeline_mode = #tpu.pipeline_mode<synchronous>, transform_indices = @transform_1, window_bounds = array<i64: 288, 32>}, {pipeline_mode = #tpu.pipeline_mode<synchronous>, transform_indices = @transform_2, window_bounds = array<i64: 1, 32>}, {transform_indices = @transform_3, window_bounds = array<i64: 1, 8, 16, 32>}]} {
    %c8_i32 = arith.constant 8 : i32
    %0 = arith.muli %arg1, %c8_i32 : i32
    %1 = tpu.assume_multiple %0, 8 : i32
    %c0_i32 = arith.constant 0 : i32
    %2 = arith.addi %1, %c0_i32 : i32
    %c0 = arith.constant 0 : index
    %3 = arith.index_cast %2 : i32 to index
    %c0_0 = arith.constant 0 : index
    %c0_1 = arith.constant 0 : index
    %4 = vector.load %arg2[%c0, %3, %c0_0, %c0_1] : memref<1x18x18x32xf32, #tpu.memory_space<vmem>>, vector<1x8x16x32xf32>
    %5 = vector.shape_cast %4 : vector<1x8x16x32xf32> to vector<8x16x32xf32>
    %6 = vector.shape_cast %5 : vector<8x16x32xf32> to vector<128x32xf32>
    %c0_2 = arith.constant 0 : index
    %c0_3 = arith.constant 0 : index
    %7 = vector.load %arg6[%c0_2, %c0_3] : memref<128x288xf32, #tpu.memory_space<vmem>>, vector<128x32xf32>
    tpu.vector_store %arg6[%c0_2, %c0_3], %6 {strides = array<i32>} : memref<128x288xf32, #tpu.memory_space<vmem>>, vector<128x32xf32>,
    %c0_i32_4 = arith.constant 0 : i32
    %8 = arith.addi %1, %c0_i32_4 : i32
    %c0_5 = arith.constant 0 : index
    %9 = arith.index_cast %8 : i32 to index
    %c1 = arith.constant 1 : index
    %c0_6 = arith.constant 0 : index
    %10 = vector.load %arg2[%c0_5, %9, %c1, %c0_6] : memref<1x18x18x32xf32, #tpu.memory_space<vmem>>, vector<1x8x16x32xf32>
    %11 = vector.shape_cast %10 : vector<1x8x16x32xf32> to vector<8x16x32xf32>
    %12 = vector.shape_cast %11 : vector<8x16x32xf32> to vector<128x32xf32>
    %c0_7 = arith.constant 0 : index
    %c32 = arith.constant 32 : index
    %13 = vector.load %arg6[%c0_7, %c32] : memref<128x288xf32, #tpu.memory_space<vmem>>, vector<128x32xf32>
    tpu.vector_store %arg6[%c0_7, %c32], %12 {strides = array<i32>} : memref<128x288xf32, #tpu.memory_space<vmem>>, vector<128x32xf32>,
    %c0_i32_8 = arith.constant 0 : i32
    %14 = arith.addi %1, %c0_i32_8 : i32
    %c0_9 = arith.constant 0 : index
    %15 = arith.index_cast %14 : i32 to index
    %c2 = arith.constant 2 : index
    %c0_10 = arith.constant 0 : index
    %16 = vector.load %arg2[%c0_9, %15, %c2, %c0_10] : memref<1x18x18x32xf32, #tpu.memory_space<vmem>>, vector<1x8x16x32xf32>
    %17 = vector.shape_cast %16 : vector<1x8x16x32xf32> to vector<8x16x32xf32>
    %18 = vector.shape_cast %17 : vector<8x16x32xf32> to vector<128x32xf32>
    %c0_11 = arith.constant 0 : index
    %c64 = arith.constant 64 : index
    %19 = vector.load %arg6[%c0_11, %c64] : memref<128x288xf32, #tpu.memory_space<vmem>>, vector<128x32xf32>
    tpu.vector_store %arg6[%c0_11, %c64], %18 {strides = array<i32>} : memref<128x288xf32, #tpu.memory_space<vmem>>, vector<128x32xf32>,
    %c1_i32 = arith.constant 1 : i32
    %20 = arith.addi %1, %c1_i32 : i32
    %c0_12 = arith.constant 0 : index
    %21 = arith.index_cast %20 : i32 to index
    %c0_13 = arith.constant 0 : index
    %c0_14 = arith.constant 0 : index
    %22 = vector.load %arg2[%c0_12, %21, %c0_13, %c0_14] : memref<1x18x18x32xf32, #tpu.memory_space<vmem>>, vector<1x8x16x32xf32>
    %23 = vector.shape_cast %22 : vector<1x8x16x32xf32> to vector<8x16x32xf32>
    %24 = vector.shape_cast %23 : vector<8x16x32xf32> to vector<128x32xf32>
    %c0_15 = arith.constant 0 : index
    %c96 = arith.constant 96 : index
    %25 = vector.load %arg6[%c0_15, %c96] : memref<128x288xf32, #tpu.memory_space<vmem>>, vector<128x32xf32>
    tpu.vector_store %arg6[%c0_15, %c96], %24 {strides = array<i32>} : memref<128x288xf32, #tpu.memory_space<vmem>>, vector<128x32xf32>,
    %c1_i32_16 = arith.constant 1 : i32
    %26 = arith.addi %1, %c1_i32_16 : i32
    %c0_17 = arith.constant 0 : index
    %27 = arith.index_cast %26 : i32 to index
    %c1_18 = arith.constant 1 : index
    %c0_19 = arith.constant 0 : index
    %28 = vector.load %arg2[%c0_17, %27, %c1_18, %c0_19] : memref<1x18x18x32xf32, #tpu.memory_space<vmem>>, vector<1x8x16x32xf32>
    %29 = vector.shape_cast %28 : vector<1x8x16x32xf32> to vector<8x16x32xf32>
    %30 = vector.shape_cast %29 : vector<8x16x32xf32> to vector<128x32xf32>
    %c0_20 = arith.constant 0 : index
    %c128 = arith.constant 128 : index
    %31 = vector.load %arg6[%c0_20, %c128] : memref<128x288xf32, #tpu.memory_space<vmem>>, vector<128x32xf32>
    tpu.vector_store %arg6[%c0_20, %c128], %30 {strides = array<i32>} : memref<128x288xf32, #tpu.memory_space<vmem>>, vector<128x32xf32>,
    %c1_i32_21 = arith.constant 1 : i32
    %32 = arith.addi %1, %c1_i32_21 : i32
    %c0_22 = arith.constant 0 : index
    %33 = arith.index_cast %32 : i32 to index
    %c2_23 = arith.constant 2 : index
    %c0_24 = arith.constant 0 : index
    %34 = vector.load %arg2[%c0_22, %33, %c2_23, %c0_24] : memref<1x18x18x32xf32, #tpu.memory_space<vmem>>, vector<1x8x16x32xf32>
    %35 = vector.shape_cast %34 : vector<1x8x16x32xf32> to vector<8x16x32xf32>
    %36 = vector.shape_cast %35 : vector<8x16x32xf32> to vector<128x32xf32>
    %c0_25 = arith.constant 0 : index
    %c160 = arith.constant 160 : index
    %37 = vector.load %arg6[%c0_25, %c160] : memref<128x288xf32, #tpu.memory_space<vmem>>, vector<128x32xf32>
    tpu.vector_store %arg6[%c0_25, %c160], %36 {strides = array<i32>} : memref<128x288xf32, #tpu.memory_space<vmem>>, vector<128x32xf32>,
    %c2_i32 = arith.constant 2 : i32
    %38 = arith.addi %1, %c2_i32 : i32
    %c0_26 = arith.constant 0 : index
    %39 = arith.index_cast %38 : i32 to index
    %c0_27 = arith.constant 0 : index
    %c0_28 = arith.constant 0 : index
    %40 = vector.load %arg2[%c0_26, %39, %c0_27, %c0_28] : memref<1x18x18x32xf32, #tpu.memory_space<vmem>>, vector<1x8x16x32xf32>
    %41 = vector.shape_cast %40 : vector<1x8x16x32xf32> to vector<8x16x32xf32>
    %42 = vector.shape_cast %41 : vector<8x16x32xf32> to vector<128x32xf32>
    %c0_29 = arith.constant 0 : index
    %c192 = arith.constant 192 : index
    %43 = vector.load %arg6[%c0_29, %c192] : memref<128x288xf32, #tpu.memory_space<vmem>>, vector<128x32xf32>
    tpu.vector_store %arg6[%c0_29, %c192], %42 {strides = array<i32>} : memref<128x288xf32, #tpu.memory_space<vmem>>, vector<128x32xf32>,
    %c2_i32_30 = arith.constant 2 : i32
    %44 = arith.addi %1, %c2_i32_30 : i32
    %c0_31 = arith.constant 0 : index
    %45 = arith.index_cast %44 : i32 to index
    %c1_32 = arith.constant 1 : index
    %c0_33 = arith.constant 0 : index
    %46 = vector.load %arg2[%c0_31, %45, %c1_32, %c0_33] : memref<1x18x18x32xf32, #tpu.memory_space<vmem>>, vector<1x8x16x32xf32>
    %47 = vector.shape_cast %46 : vector<1x8x16x32xf32> to vector<8x16x32xf32>
    %48 = vector.shape_cast %47 : vector<8x16x32xf32> to vector<128x32xf32>
    %c0_34 = arith.constant 0 : index
    %c224 = arith.constant 224 : index
    %49 = vector.load %arg6[%c0_34, %c224] : memref<128x288xf32, #tpu.memory_space<vmem>>, vector<128x32xf32>
    tpu.vector_store %arg6[%c0_34, %c224], %48 {strides = array<i32>} : memref<128x288xf32, #tpu.memory_space<vmem>>, vector<128x32xf32>,
    %c2_i32_35 = arith.constant 2 : i32
    %50 = arith.addi %1, %c2_i32_35 : i32
    %c0_36 = arith.constant 0 : index
    %51 = arith.index_cast %50 : i32 to index
    %c2_37 = arith.constant 2 : index
    %c0_38 = arith.constant 0 : index
    %52 = vector.load %arg2[%c0_36, %51, %c2_37, %c0_38] : memref<1x18x18x32xf32, #tpu.memory_space<vmem>>, vector<1x8x16x32xf32>
    %53 = vector.shape_cast %52 : vector<1x8x16x32xf32> to vector<8x16x32xf32>
    %54 = vector.shape_cast %53 : vector<8x16x32xf32> to vector<128x32xf32>
    %c0_39 = arith.constant 0 : index
    %c256 = arith.constant 256 : index
    %55 = vector.load %arg6[%c0_39, %c256] : memref<128x288xf32, #tpu.memory_space<vmem>>, vector<128x32xf32>
    tpu.vector_store %arg6[%c0_39, %c256], %54 {strides = array<i32>} : memref<128x288xf32, #tpu.memory_space<vmem>>, vector<128x32xf32>,
    %c0_40 = arith.constant 0 : index
    %c0_41 = arith.constant 0 : index
    %56 = vector.load %arg6[%c0_40, %c0_41] : memref<128x288xf32, #tpu.memory_space<vmem>>, vector<128x288xf32>
    %c0_42 = arith.constant 0 : index
    %c0_43 = arith.constant 0 : index
    %57 = vector.load %arg3[%c0_42, %c0_43] : memref<288x32xf32, #tpu.memory_space<vmem>>, vector<288x32xf32>
    %cst = arith.constant dense<0.000000e+00> : vector<128x32xf32>
    %58 = tpu.matmul %56, %57, %cst {dimension_numbers = #tpu.dot_dimension_numbers<[1], [0], [0], [1], [0, 0, 1, 1], [], []>} : vector<128x288xf32>, vector<288x32xf32>, vector<128x32xf32> -> vector<128x32xf32>
    %c0_44 = arith.constant 0 : index
    %c128_45 = arith.constant 128 : index
    %59 = vector.load %arg6[%c0_44, %c128_45] : memref<128x288xf32, #tpu.memory_space<vmem>>, vector<128x32xf32>
    %c0_46 = arith.constant 0 : index
    %c0_47 = arith.constant 0 : index
    %60 = vector.load %arg4[%c0_46, %c0_47] : memref<1x32xf32, #tpu.memory_space<vmem>>, vector<1x32xf32>
    %61 = vector.broadcast %60 : vector<1x32xf32> to vector<128x32xf32>
    %62 = arith.addf %58, %61 : vector<128x32xf32>
    %63 = arith.addf %62, %59 : vector<128x32xf32>
    %64 = vector.shape_cast %63 : vector<128x32xf32> to vector<8x16x32xf32>
    %c0_48 = arith.constant 0 : index
    %c0_49 = arith.constant 0 : index
    %c0_50 = arith.constant 0 : index
    %c0_51 = arith.constant 0 : index
    %65 = vector.load %arg5[%c0_48, %c0_49, %c0_50, %c0_51] : memref<1x8x16x32xf32, #tpu.memory_space<vmem>>, vector<1x8x16x32xf32>
    %66 = vector.shape_cast %65 : vector<1x8x16x32xf32> to vector<8x16x32xf32>
    %67 = vector.shape_cast %64 : vector<8x16x32xf32> to vector<1x8x16x32xf32>
    tpu.vector_store %arg5[%c0_48, %c0_49, %c0_50, %c0_51], %67 {strides = array<i32>} : memref<1x8x16x32xf32, #tpu.memory_space<vmem>>, vector<1x8x16x32xf32>,
    return
  }
  func.func @transform_0(%arg0: i32, %arg1: i32) -> (i32, i32, i32, i32) {
    %c0_i32 = arith.constant 0 : i32
    %c0_i32_0 = arith.constant 0 : i32
    %c0_i32_1 = arith.constant 0 : i32
    %c0_i32_2 = arith.constant 0 : i32
    return %arg0, %c0_i32, %c0_i32_0, %c0_i32_1 : i32, i32, i32, i32
  }
  func.func @transform_1(%arg0: i32, %arg1: i32) -> (i32, i32) {
    %c0_i32 = arith.constant 0 : i32
    %c0_i32_0 = arith.constant 0 : i32
    %c0_i32_1 = arith.constant 0 : i32
    return %c0_i32, %c0_i32_0 : i32, i32
  }
  func.func @transform_2(%arg0: i32, %arg1: i32) -> (i32, i32) {
    %c0_i32 = arith.constant 0 : i32
    %c0_i32_0 = arith.constant 0 : i32
    %c0_i32_1 = arith.constant 0 : i32
    return %c0_i32, %c0_i32_0 : i32, i32
  }
  func.func @transform_3(%arg0: i32, %arg1: i32) -> (i32, i32, i32, i32) {
    %c0_i32 = arith.constant 0 : i32
    %c0_i32_0 = arith.constant 0 : i32
    %c0_i32_1 = arith.constant 0 : i32
    return %arg0, %arg1, %c0_i32, %c0_i32_0 : i32, i32, i32, i32
  }
}

module attributes {stable_mosaic.version = 11 : i64} {
  func.func @_residual_conv2d_kernel(%arg0: i32, %arg1: i32, %arg2: memref<1x18x18x32xf32, #tpu.memory_space<vmem>>, %arg3: memref<288x32xf32, #tpu.memory_space<vmem>>, %arg4: memref<1x32xf32, #tpu.memory_space<vmem>>, %arg5: memref<1x8x16x32xf32, #tpu.memory_space<vmem>>, %arg6: memref<128x288xf32, #tpu.memory_space<vmem>>) attributes {dimension_semantics = [#tpu.dimension_semantics<parallel>, #tpu.dimension_semantics<parallel>], iteration_bounds = array<i64: 2, 2>, scalar_prefetch = 0 : i64, scratch_operands = 1 : i64, tpu.core_type = #tpu.core_type<tc>, window_params = [{transform_indices = @transform_0, window_bounds = array<i64: 1, 18, 18, 32>}, {pipeline_mode = #tpu.pipeline_mode<synchronous>, transform_indices = @transform_1, window_bounds = array<i64: 288, 32>}, {pipeline_mode = #tpu.pipeline_mode<synchronous>, transform_indices = @transform_2, window_bounds = array<i64: 1, 32>}, {transform_indices = @transform_3, window_bounds = array<i64: 1, 8, 16, 32>}]} {
    %c8_i32 = arith.constant 8 : i32
    %0 = arith.muli %arg1, %c8_i32 : i32
    %1 = tpu.assume_multiple %0, 8 : i32
    %c0_i32 = arith.constant 0 : i32
    %2 = arith.addi %1, %c0_i32 : i32
    %c0 = arith.constant 0 : index
    %3 = arith.index_cast %2 : i32 to index
    %c0_0 = arith.constant 0 : index
    %c0_1 = arith.constant 0 : index
    %4 = vector.load %arg2[%c0, %3, %c0_0, %c0_1] : memref<1x18x18x32xf32, #tpu.memory_space<vmem>>, vector<1x8x16x32xf32>
    %5 = vector.shape_cast %4 : vector<1x8x16x32xf32> to vector<8x16x32xf32>
    %6 = vector.shape_cast %5 : vector<8x16x32xf32> to vector<128x32xf32>
    %c0_2 = arith.constant 0 : index
    %c0_3 = arith.constant 0 : index
    %7 = vector.load %arg6[%c0_2, %c0_3] : memref<128x288xf32, #tpu.memory_space<vmem>>, vector<128x32xf32>
    tpu.vector_store %arg6[%c0_2, %c0_3], %6 {strides = array<i32>} : memref<128x288xf32, #tpu.memory_space<vmem>>, vector<128x32xf32>,
    %c0_i32_4 = arith.constant 0 : i32
    %8 = arith.addi %1, %c0_i32_4 : i32
    %c0_5 = arith.constant 0 : index
    %9 = arith.index_cast %8 : i32 to index
    %c1 = arith.constant 1 : index
    %c0_6 = arith.constant 0 : index
    %10 = vector.load %arg2[%c0_5, %9, %c1, %c0_6] : memref<1x18x18x32xf32, #tpu.memory_space<vmem>>, vector<1x8x16x32xf32>
    %11 = vector.shape_cast %10 : vector<1x8x16x32xf32> to vector<8x16x32xf32>
    %12 = vector.shape_cast %11 : vector<8x16x32xf32> to vector<128x32xf32>
    %c0_7 = arith.constant 0 : index
    %c32 = arith.constant 32 : index
    %13 = vector.load %arg6[%c0_7, %c32] : memref<128x288xf32, #tpu.memory_space<vmem>>, vector<128x32xf32>
    tpu.vector_store %arg6[%c0_7, %c32], %12 {strides = array<i32>} : memref<128x288xf32, #tpu.memory_space<vmem>>, vector<128x32xf32>,
    %c0_i32_8 = arith.constant 0 : i32
    %14 = arith.addi %1, %c0_i32_8 : i32
    %c0_9 = arith.constant 0 : index
    %15 = arith.index_cast %14 : i32 to index
    %c2 = arith.constant 2 : index
    %c0_10 = arith.constant 0 : index
    %16 = vector.load %arg2[%c0_9, %15, %c2, %c0_10] : memref<1x18x18x32xf32, #tpu.memory_space<vmem>>, vector<1x8x16x32xf32>
    %17 = vector.shape_cast %16 : vector<1x8x16x32xf32> to vector<8x16x32xf32>
    %18 = vector.shape_cast %17 : vector<8x16x32xf32> to vector<128x32xf32>
    %c0_11 = arith.constant 0 : index
    %c64 = arith.constant 64 : index
    %19 = vector.load %arg6[%c0_11, %c64] : memref<128x288xf32, #tpu.memory_space<vmem>>, vector<128x32xf32>
    tpu.vector_store %arg6[%c0_11, %c64], %18 {strides = array<i32>} : memref<128x288xf32, #tpu.memory_space<vmem>>, vector<128x32xf32>,
    %c1_i32 = arith.constant 1 : i32
    %20 = arith.addi %1, %c1_i32 : i32
    %c0_12 = arith.constant 0 : index
    %21 = arith.index_cast %20 : i32 to index
    %c0_13 = arith.constant 0 : index
    %c0_14 = arith.constant 0 : index
    %22 = vector.load %arg2[%c0_12, %21, %c0_13, %c0_14] : memref<1x18x18x32xf32, #tpu.memory_space<vmem>>, vector<1x8x16x32xf32>
    %23 = vector.shape_cast %22 : vector<1x8x16x32xf32> to vector<8x16x32xf32>
    %24 = vector.shape_cast %23 : vector<8x16x32xf32> to vector<128x32xf32>
    %c0_15 = arith.constant 0 : index
    %c96 = arith.constant 96 : index
    %25 = vector.load %arg6[%c0_15, %c96] : memref<128x288xf32, #tpu.memory_space<vmem>>, vector<128x32xf32>
    tpu.vector_store %arg6[%c0_15, %c96], %24 {strides = array<i32>} : memref<128x288xf32, #tpu.memory_space<vmem>>, vector<128x32xf32>,
    %c1_i32_16 = arith.constant 1 : i32
    %26 = arith.addi %1, %c1_i32_16 : i32
    %c0_17 = arith.constant 0 : index
    %27 = arith.index_cast %26 : i32 to index
    %c1_18 = arith.constant 1 : index
    %c0_19 = arith.constant 0 : index
    %28 = vector.load %arg2[%c0_17, %27, %c1_18, %c0_19] : memref<1x18x18x32xf32, #tpu.memory_space<vmem>>, vector<1x8x16x32xf32>
    %29 = vector.shape_cast %28 : vector<1x8x16x32xf32> to vector<8x16x32xf32>
    %30 = vector.shape_cast %29 : vector<8x16x32xf32> to vector<128x32xf32>
    %c0_20 = arith.constant 0 : index
    %c128 = arith.constant 128 : index
    %31 = vector.load %arg6[%c0_20, %c128] : memref<128x288xf32, #tpu.memory_space<vmem>>, vector<128x32xf32>
    tpu.vector_store %arg6[%c0_20, %c128], %30 {strides = array<i32>} : memref<128x288xf32, #tpu.memory_space<vmem>>, vector<128x32xf32>,
    %c1_i32_21 = arith.constant 1 : i32
    %32 = arith.addi %1, %c1_i32_21 : i32
    %c0_22 = arith.constant 0 : index
    %33 = arith.index_cast %32 : i32 to index
    %c2_23 = arith.constant 2 : index
    %c0_24 = arith.constant 0 : index
    %34 = vector.load %arg2[%c0_22, %33, %c2_23, %c0_24] : memref<1x18x18x32xf32, #tpu.memory_space<vmem>>, vector<1x8x16x32xf32>
    %35 = vector.shape_cast %34 : vector<1x8x16x32xf32> to vector<8x16x32xf32>
    %36 = vector.shape_cast %35 : vector<8x16x32xf32> to vector<128x32xf32>
    %c0_25 = arith.constant 0 : index
    %c160 = arith.constant 160 : index
    %37 = vector.load %arg6[%c0_25, %c160] : memref<128x288xf32, #tpu.memory_space<vmem>>, vector<128x32xf32>
    tpu.vector_store %arg6[%c0_25, %c160], %36 {strides = array<i32>} : memref<128x288xf32, #tpu.memory_space<vmem>>, vector<128x32xf32>,
    %c2_i32 = arith.constant 2 : i32
    %38 = arith.addi %1, %c2_i32 : i32
    %c0_26 = arith.constant 0 : index
    %39 = arith.index_cast %38 : i32 to index
    %c0_27 = arith.constant 0 : index
    %c0_28 = arith.constant 0 : index
    %40 = vector.load %arg2[%c0_26, %39, %c0_27, %c0_28] : memref<1x18x18x32xf32, #tpu.memory_space<vmem>>, vector<1x8x16x32xf32>
    %41 = vector.shape_cast %40 : vector<1x8x16x32xf32> to vector<8x16x32xf32>
    %42 = vector.shape_cast %41 : vector<8x16x32xf32> to vector<128x32xf32>
    %c0_29 = arith.constant 0 : index
    %c192 = arith.constant 192 : index
    %43 = vector.load %arg6[%c0_29, %c192] : memref<128x288xf32, #tpu.memory_space<vmem>>, vector<128x32xf32>
    tpu.vector_store %arg6[%c0_29, %c192], %42 {strides = array<i32>} : memref<128x288xf32, #tpu.memory_space<vmem>>, vector<128x32xf32>,
    %c2_i32_30 = arith.constant 2 : i32
    %44 = arith.addi %1, %c2_i32_30 : i32
    %c0_31 = arith.constant 0 : index
    %45 = arith.index_cast %44 : i32 to index
    %c1_32 = arith.constant 1 : index
    %c0_33 = arith.constant 0 : index
    %46 = vector.load %arg2[%c0_31, %45, %c1_32, %c0_33] : memref<1x18x18x32xf32, #tpu.memory_space<vmem>>, vector<1x8x16x32xf32>
    %47 = vector.shape_cast %46 : vector<1x8x16x32xf32> to vector<8x16x32xf32>
    %48 = vector.shape_cast %47 : vector<8x16x32xf32> to vector<128x32xf32>
    %c0_34 = arith.constant 0 : index
    %c224 = arith.constant 224 : index
    %49 = vector.load %arg6[%c0_34, %c224] : memref<128x288xf32, #tpu.memory_space<vmem>>, vector<128x32xf32>
    tpu.vector_store %arg6[%c0_34, %c224], %48 {strides = array<i32>} : memref<128x288xf32, #tpu.memory_space<vmem>>, vector<128x32xf32>,
    %c2_i32_35 = arith.constant 2 : i32
    %50 = arith.addi %1, %c2_i32_35 : i32
    %c0_36 = arith.constant 0 : index
    %51 = arith.index_cast %50 : i32 to index
    %c2_37 = arith.constant 2 : index
    %c0_38 = arith.constant 0 : index
    %52 = vector.load %arg2[%c0_36, %51, %c2_37, %c0_38] : memref<1x18x18x32xf32, #tpu.memory_space<vmem>>, vector<1x8x16x32xf32>
    %53 = vector.shape_cast %52 : vector<1x8x16x32xf32> to vector<8x16x32xf32>
    %54 = vector.shape_cast %53 : vector<8x16x32xf32> to vector<128x32xf32>
    %c0_39 = arith.constant 0 : index
    %c256 = arith.constant 256 : index
    %55 = vector.load %arg6[%c0_39, %c256] : memref<128x288xf32, #tpu.memory_space<vmem>>, vector<128x32xf32>
    tpu.vector_store %arg6[%c0_39, %c256], %54 {strides = array<i32>} : memref<128x288xf32, #tpu.memory_space<vmem>>, vector<128x32xf32>,
    %c0_40 = arith.constant 0 : index
    %c0_41 = arith.constant 0 : index
    %56 = vector.load %arg6[%c0_40, %c0_41] : memref<128x288xf32, #tpu.memory_space<vmem>>, vector<128x288xf32>
    %c0_42 = arith.constant 0 : index
    %c0_43 = arith.constant 0 : index
    %57 = vector.load %arg3[%c0_42, %c0_43] : memref<288x32xf32, #tpu.memory_space<vmem>>, vector<288x32xf32>
    %cst = arith.constant dense<0.000000e+00> : vector<128x32xf32>
    %58 = tpu.matmul %56, %57, %cst {dimension_numbers = #tpu.dot_dimension_numbers<[1], [0], [0], [1], [0, 0, 1, 1], [], []>} : vector<128x288xf32>, vector<288x32xf32>, vector<128x32xf32> -> vector<128x32xf32>
    %c0_44 = arith.constant 0 : index
    %c128_45 = arith.constant 128 : index
    %59 = vector.load %arg6[%c0_44, %c128_45] : memref<128x288xf32, #tpu.memory_space<vmem>>, vector<128x32xf32>
    %c0_46 = arith.constant 0 : index
    %c0_47 = arith.constant 0 : index
    %60 = vector.load %arg4[%c0_46, %c0_47] : memref<1x32xf32, #tpu.memory_space<vmem>>, vector<1x32xf32>
    %61 = vector.broadcast %60 : vector<1x32xf32> to vector<128x32xf32>
    %62 = arith.addf %58, %61 : vector<128x32xf32>
    %63 = arith.addf %62, %59 : vector<128x32xf32>
    %64 = vector.shape_cast %63 : vector<128x32xf32> to vector<8x16x32xf32>
    %c0_48 = arith.constant 0 : index
    %c0_49 = arith.constant 0 : index
    %c0_50 = arith.constant 0 : index
    %c0_51 = arith.constant 0 : index
    %65 = vector.load %arg5[%c0_48, %c0_49, %c0_50, %c0_51] : memref<1x8x16x32xf32, #tpu.memory_space<vmem>>, vector<1x8x16x32xf32>
    %66 = vector.shape_cast %65 : vector<1x8x16x32xf32> to vector<8x16x32xf32>
    %67 = vector.shape_cast %64 : vector<8x16x32xf32> to vector<1x8x16x32xf32>
    tpu.vector_store %arg5[%c0_48, %c0_49, %c0_50, %c0_51], %67 {strides = array<i32>} : memref<1x8x16x32xf32, #tpu.memory_space<vmem>>, vector<1x8x16x32xf32>,
    return
  }
  func.func @transform_0(%arg0: i32, %arg1: i32) -> (i32, i32, i32, i32) {
    %c0_i32 = arith.constant 0 : i32
    %c0_i32_0 = arith.constant 0 : i32
    %c0_i32_1 = arith.constant 0 : i32
    %c0_i32_2 = arith.constant 0 : i32
    return %arg0, %c0_i32, %c0_i32_0, %c0_i32_1 : i32, i32, i32, i32
  }
  func.func @transform_1(%arg0: i32, %arg1: i32) -> (i32, i32) {
    %c0_i32 = arith.constant 0 : i32
    %c0_i32_0 = arith.constant 0 : i32
    %c0_i32_1 = arith.constant 0 : i32
    return %c0_i32, %c0_i32_0 : i32, i32
  }
  func.func @transform_2(%arg0: i32, %arg1: i32) -> (i32, i32) {
    %c0_i32 = arith.constant 0 : i32
    %c0_i32_0 = arith.constant 0 : i32
    %c0_i32_1 = arith.constant 0 : i32
    return %c0_i32, %c0_i32_0 : i32, i32
  }
  func.func @transform_3(%arg0: i32, %arg1: i32) -> (i32, i32, i32, i32) {
    %c0_i32 = arith.constant 0 : i32
    %c0_i32_0 = arith.constant 0 : i32
    %c0_i32_1 = arith.constant 0 : i32
    return %arg0, %arg1, %c0_i32, %c0_i32_0 : i32, i32, i32, i32
  }
}

</mosaic_0001>

<bundles_post_ra>
// kernel: tpu_custom_call.1
= control target key start
LH: loop header
LB: loop body
LE: loop exit
PB: predicated region body
PF: predicated region fallthrough
CT: control target
= control target key end

     0   :  { %8 = vsyncpa [#allocation4], 0  ;;  %s2842_s0 = inlined_call_operand.vmem [shape: f32[2,18,18,32], index: 0, kind: input, shape index: {}]   ;;  %s2843_s1 = inlined_call_operand.vmem [shape: f32[288,32], index: 1, kind: input, shape index: {}]   ;;  %s2844_s2 = inlined_call_operand.vmem [shape: f32[1,32], index: 2, kind: input, shape index: {}]   ;;  %s2845_s3 = inlined_call_operand.hbm [shape: f32[2,16,16,32], index: 3, kind: output, shape index: {}]  }
   0x1   :  { %10 = vsyncpa [#allocation4 + $0x1], 0  ;;  %s1928_s12 = smov 0   ;;  %s1930_s13 = smov 0  }
   0x2   :  { %s1932_s14 = smov 0   ;;  %s1934_s15 = smov 0  }
   0x3   :  { %s1936_s16 = smov 0   ;;  %s1938_s17 = smov 0  }
   0x4   :  { %s1940_s18 = smov 0   ;;  %s1942_s19 = smov 0  }
   0x5 LB: > { %s1433_s20 = sadd.s32 4294967295, %s1900_s19   ;;  %s1434_s21 = sadd.s32 4294967294, %s1900_s19   ;;  %s1900_s19 = sphi %s1942_s19, %s16_s19   ;;  %s1896_s18 = sphi %s1940_s18, %s2854_s18   ;;  %s1892_s17 = sphi %s1938_s17, %s2853_s17   ;;  %s1888_s16 = sphi %s1936_s16, %s2852_s16   ;;  %s1884_s15 = sphi %s1934_s15, %s2851_s15   ;;  %s1880_s14 = sphi %s1932_s14, %s2850_s14   ;;  %s1876_s13 = sphi %s1930_s13, %s2849_s13   ;;  %s1872_s12 = sphi %s1928_s12, %s2848_s12  }
   0x6   : > { %s25_s22 = sadd.s32 1, %s1892_s17  ;;  %s28_s23 = sadd.s32 1, %s1896_s18 }
   0x7   : > { %p26_p0 = scmp.ge.s32.totalorder %s25_s22, 2  ;;  %p115_p1 = scmp.ne.s32.totalorder %s1880_s14, %s1876_s13 }
   0x8   : > { %p116_p2 = scmp.eq.s32.totalorder %s1433_s20, 3  ;;  %p121_p5 = scmp.ne.s32.totalorder %s1876_s13, %s1872_s12 }
   0x9   : > { %s2856_s22 = smov (%p26_p0, %s25_s22), 0  ;;  %s2858_s23 = smov (!%p26_p0, %s28_s23), %s1896_s18 }
   0xa   : > { %s101_s24 = ssub.s32 %s1892_s17, %s2856_s22  ;;  %p1979_p3 = por %p116_p2, %p115_p1 }
   0xb   : > { %p30_p4 = scmp.ge.s32.totalorder %s2858_s23, 2  ;;  %p122_p6 = scmp.eq.s32.totalorder %s1434_s21, 3 }
   0xc   : > { %p1437_p7 = scmp.ge.s32.totalorder %s1900_s19, 1  ;;  %p154_p9 = scmp.lt.s32.totalorder %s1900_s19, 5 }
   0xd   : > { %s2860_s23 = smov (%p30_p4, %s2858_s23), 0  ;;  %p1988_p8 = por %p122_p6, %p121_p5 }
   0xe   : > { %s100_s27 = ssub.s32 %s1896_s18, %s2860_s23  ;;  %s105_s28 = sadd.s32 1, %s1880_s14 }
   0xf   : > { %s102_s29 = sor.u32 %s101_s24, %s100_s27  ;;  %p155_p10 = pnand %p1437_p7, %p154_p9 }
  0x10   : > { %p103_p11 = scmp.eq.s32.totalorder %s102_s29, 0  ;;  %p178_p12 = scmp.lt.s32.totalorder (!%p155_p10), %s1888_s16, 1 }
  0x11   : > { %158 = sbr.rel (%p155_p10) target bundleno = 560 (0x230), region = 32  ;;  %s1902_s29 = smov (!%p155_p10), 64  }
  0x12   : > { %s1997_s30 = scalar_select %p103_p11, %s1880_s14, %s105_s28  }
  0x13   : > { %s1441_s27 = smul.u32 (!%p155_p10), 192, %s1884_s15  ;;  %s1904_s8 = smov (!%p155_p10), 96  }
  0x14   : > { %s1566_s7 = sshll.u32 (!%p155_p10), %s1884_s15, 4  ;;  %s1562_s9 = sshll.u32 (!%p155_p10), %s1888_s16, 5 }
  0x15   : > { %s1344_s10 = sadd.s32 (!%p155_p10), %s1566_s7, %s1562_s9  ;;  %s1905_s5 = smov (!%p155_p10), [#allocation3]  }
  0x16   : > { %v948_v0 = vld [vmem:[%s2843_s1 + $0xf8] sm:$0xff]  ;;  %v947_v2 = vld [vmem:[%s2843_s1 + $0xf0] sm:$0xff]  ;;  %s179_s20 = scalar_select %p178_p12, %s1888_s16, 1  ;;  %v946_v4 = vld [vmem:[%s2843_s1 + $0xe8] sm:$0xff]  ;;  %vm203_vm0 = vcmask 261120   ;;  %vm300_vm1 = vcmask 523520  }
  0x17   : > { %v932_v1 = vld [vmem:[%s2843_s1 + $0x78] sm:$0xff]  ;;  %1567 = vmatprep.subr.mxu0 %v948_v0  ;;  %v931_v3 = vld [vmem:[%s2843_s1 + $0x70] sm:$0xff]  ;;  %1699 = vmatprep.subr.mxu1 %v948_v0  ;;  %v930_v5 = vld [vmem:[%s2843_s1 + $0x68] sm:$0xff]  ;;  %vm397_vm2 = vcmask 785920   ;;  %vm497_vm3 = vcmask 1048320  }
  0x18   : > { %1568 = vmatpush3.msra.mxu0 %v932_v1  ;;  %1715 = vmatpush3.msra.mxu1 %v932_v1  ;;  %s1731_s4 = smul.u32 432, %s179_s20  ;;  %v945_v6 = vld [vmem:[%s2843_s1 + $0xe0] sm:$0xff]  ;;  %v944_v8 = vld [vmem:[%s2843_s1 + $0xd8] sm:$0xff]  ;;  %v943_v13 = vld [vmem:[%s2843_s1 + $0xd0] sm:$0xff] }
  0x19   : > { %1569 = vmatprep.subr.mxu0 %v947_v2  ;;  %1700 = vmatprep.subr.mxu1 %v947_v2  ;;  %v929_v7 = vld [vmem:[%s2843_s1 + $0x60] sm:$0xff]  ;;  %v928_v11 = vld [vmem:[%s2843_s1 + $0x58] sm:$0xff]  ;;  %v927_v17 = vld [vmem:[%s2843_s1 + $0x50] sm:$0xff] }
  0x1a   : > { %1570 = vmatpush3.msra.mxu0 %v931_v3  ;;  %1716 = vmatpush3.msra.mxu1 %v931_v3  ;;  %s182_s11 = scalar_lea.vmem %s2842_s0, %s1731_s4  ;;  %s1903_s4 = smov 32   ;;  %v942_v19 = vld [vmem:[%s2843_s1 + $0xc8] sm:$0xff]  ;;  %v941_v25 = vld [vmem:[%s2843_s1 + $0xc0] sm:$0xff]  ;;  %v940_v31 = vld [vmem:[%s2843_s1 + $0xb8] sm:$0xff] }
  0x1b   : > { %1571 = vmatprep.subr.mxu0 %v946_v4  ;;  %1701 = vmatprep.subr.mxu1 %v946_v4  ;;  %s2029_s21 = scalar_lea.vmem %s182_s11, %s1441_s27  ;;  %v926_v20 = vld [vmem:[%s2843_s1 + $0x48] sm:$0xff]  ;;  %v925_v28 = vld [vmem:[%s2843_s1 + $0x40] sm:$0xff]  ;;  %v924_v34 = vld [vmem:[%s2843_s1 + $0x38] sm:$0xff]  ;;  %s1563_s11 = sshll.u32 %s1344_s10, 7 }
  0x1c   : > { %1572 = vmatpush3.msra.mxu0 %v930_v5  ;;  %1717 = vmatpush3.msra.mxu1 %v930_v5  ;;  %v2035_v9 = vld [vmem:[%s2029_s21 + $0x30] sm:$0xff]  ;;  %v2038_v10 = vld [vmem:[%s2029_s21 + $0x1a] sm:$0xff]  ;;  %v317_v14 = vld [vmem:[%s2029_s21 + $0x2] sm:$0xff]  ;;  %s2782_s27 = scalar_lea.hbm %s2845_s3, %s1563_s11 }
  0x1d   : > { %1573 = vmatprep.subr.mxu0 %v945_v6  ;;  %1702 = vmatprep.subr.mxu1 %v945_v6  ;;  %v1444_v12 = vld [vmem:[%s2029_s21 + $0x18] sm:$0xff]  ;;  %208 = vst.msk [vmem:[#allocation2 + $0x60] sm:$0xff] %vm203_vm0, %v2035_v9  ;;  %v220_v15 = vld [vmem:[%s2029_s21 + $0x1] sm:$0xff]  ;;  %v2110_v29 = vld [vmem:[%s2029_s21 + $0xaa] sm:$0xff] }
  0x1e   : > { %1574 = vmatpush3.msra.mxu0 %v929_v7  ;;  %1718 = vmatpush3.msra.mxu1 %v929_v7  ;;  %v2056_v16 = vld [vmem:[%s2029_s21 + $0x31] sm:$0xff]  ;;  %206 = vst.msk [vmem:[#allocation2 + $0x30] sm:$0xff] %vm203_vm0, %v1444_v12  ;;  %v2076_v21 = vld [vmem:[%s2029_s21 + $0xc1] sm:$0xff]  ;;  %v2079_v22 = vld [vmem:[%s2029_s21 + $0x39] sm:$0xff] }
  0x1f   : > { %677 = vrot.lane.b32.xlu1 %v2035_v9, %s1902_s29  ;;  %578 = vrot.lane.b32.xlu0 %v2038_v10, %s1903_s4  ;;  %532 = vst.msk [vmem:[#allocation2 + $0x38] sm:$0xff] %vm203_vm0, %v2056_v16  ;;  %v2065_v18 = vld [vmem:[%s2029_s21 + $0x38] sm:$0xff]  ;;  %v2084_v23 = vld [vmem:[%s2029_s21 + $0xa8] sm:$0xff]  ;;  %544 = vst.msk [vmem:[#allocation2 + $0x158] sm:$0xff] %vm203_vm0, %v2076_v21 }
  0x20   : > { %1575 = vmatprep.subr.mxu0 %v944_v8  ;;  %1703 = vmatprep.subr.mxu1 %v944_v8  ;;  %209 = vst.msk [vmem:[#allocation2 + $0x78] sm:$0xff] %vm203_vm0, %v2065_v18  ;;  %v2087_v24 = vld [vmem:[%s2029_s21 + $0x20] sm:$0xff]  ;;  %533 = vst.msk [vmem:[#allocation2 + $0x50] sm:$0xff] %vm203_vm0, %v2079_v22  ;;  %v2097_v26 = vld [vmem:[%s2029_s21 + $0x32] sm:$0xff] }
  0x21   : > { %1576 = vmatpush3.msra.mxu0 %v928_v11  ;;  %1719 = vmatpush3.msra.mxu1 %v928_v11  ;;  %v2100_v27 = vld [vmem:[%s2029_s21 + $0x19] sm:$0xff]  ;;  %218 = vst.msk [vmem:[#allocation2 + $0x150] sm:$0xff] %vm203_vm0, %v2084_v23  ;;  %207 = vst.msk [vmem:[#allocation2 + $0x48] sm:$0xff] %vm203_vm0, %v2087_v24  ;;  %v2113_v30 = vld [vmem:[%s2029_s21 + $0x48] sm:$0xff] }
  0x22   : > { %1577 = vmatprep.subr.mxu0 %v943_v13  ;;  %1704 = vmatprep.subr.mxu1 %v943_v13  ;;  %530 = vst.msk [vmem:[#allocation2 + $0x8] sm:$0xff] %vm203_vm0, %v2100_v27  ;;  %853 = vst.msk [vmem:[#allocation2 + $0x10] sm:$0xff] %vm203_vm0, %v2097_v26  ;;  %v2126_v32 = vld [vmem:[%s2029_s21 + $0xc9] sm:$0xff]  ;;  %v2143_v37 = vld [vmem:[%s2029_s21 + $0x3a] sm:$0xff] }
  0x23   : > { %349 = vrot.lane.b32.xlu1 %v317_v14, %s1902_s29  ;;  %252 = vrot.lane.b32.xlu0 %v220_v15, %s1903_s4  ;;  %v2129_v33 = vld [vmem:[%s2029_s21 + $0x49] sm:$0xff]  ;;  %210 = vst.msk [vmem:[#allocation2 + $0x90] sm:$0xff] %vm203_vm0, %v2113_v30  ;;  %545 = vst.msk [vmem:[#allocation2 + $0x170] sm:$0xff] %vm203_vm0, %v2126_v32  ;;  %v2156_v40 = vld [vmem:[%s2029_s21 + $0x21] sm:$0xff] }
  0x24   : > { %1578 = vmatpush3.msra.mxu0 %v927_v17  ;;  %1720 = vmatpush3.msra.mxu1 %v927_v17  ;;  %v2137_v35 = vld [vmem:[%s2029_s21 + $0x22] sm:$0xff]  ;;  %v2140_v36 = vld [vmem:[%s2029_s21 + $0xb0] sm:$0xff]  ;;  %534 = vst.msk [vmem:[#allocation2 + $0x68] sm:$0xff] %vm203_vm0, %v2129_v33  ;;  %854 = vst.msk [vmem:[#allocation2 + $0x28] sm:$0xff] %vm203_vm0, %v2143_v37 }
  0x25   : > { %1579 = vmatprep.subr.mxu0 %v942_v19  ;;  %1705 = vmatprep.subr.mxu1 %v942_v19  ;;  %v939_v38 = vld [vmem:[%s2843_s1 + $0xb0] sm:$0xff]  ;;  %219 = vst.msk [vmem:[#allocation2 + $0x168] sm:$0xff] %vm203_vm0, %v2140_v36  ;;  %531 = vst.msk [vmem:[#allocation2 + $0x20] sm:$0xff] %vm203_vm0, %v2156_v40  ;;  %v938_v47 = vld [vmem:[%s2843_s1 + $0xa8] sm:$0xff] }
  0x26   : > { %1580 = vmatpush3.msra.mxu0 %v926_v20  ;;  %1721 = vmatpush3.msra.mxu1 %v926_v20  ;;  %v2153_v39 = vld [vmem:[%s2029_s21 + $0xa9] sm:$0xff]  ;;  %v2166_v42 = vld [vmem:[%s2029_s21 + $0x91] sm:$0xff]  ;;  %v2200_v50 = vld [vmem:[%s2029_s21 + $0x60] sm:$0xff] }
  0x27   : > { %449 = vrot.lane.b32.xlu1 %v1444_v12, %s1904_s8  ;;  %773 = vrot.lane.b32.xlu0 %v2056_v16, %s1904_s8  ;;  %v923_v41 = vld [vmem:[%s2843_s1 + $0x30] sm:$0xff]  ;;  %542 = vst.msk [vmem:[#allocation2 + $0x128] sm:$0xff] %vm203_vm0, %v2153_v39  ;;  %v2207_v51 = vld [vmem:[%s2029_s21 + $0x61] sm:$0xff]  ;;  %212 = vst.msk [vmem:[#allocation2 + $0xc0] sm:$0xff] %vm203_vm0, %v2200_v50 }
  0x28   : > { %1581 = vmatprep.subr.mxu0 %v941_v25  ;;  %1706 = vmatprep.subr.mxu1 %v941_v25  ;;  %v2169_v43 = vld [vmem:[%s2029_s21 + $0x50] sm:$0xff]  ;;  %v922_v53 = vld [vmem:[%s2843_s1 + $0x28] sm:$0xff]  ;;  %v187_v56 = vld [vmem:[%s2029_s21] sm:$0xff]  ;;  %536 = vst.msk [vmem:[#allocation2 + $0x98] sm:$0xff] %vm203_vm0, %v2207_v51 }
  0x29   : > { %1582 = vmatpush3.msra.mxu0 %v925_v28  ;;  %1722 = vmatpush3.msra.mxu1 %v925_v28  ;;  %v2172_v44 = vld [vmem:[%s2029_s21 + $0x51] sm:$0xff]  ;;  %211 = vst.msk [vmem:[#allocation2 + $0xa8] sm:$0xff] %vm203_vm0, %v2169_v43  ;;  %v221_v48 = vld [vmem:[%s2029_s21 + $0x9] sm:$0xff]  ;;  %204 = vst.msk [vmem:[#allocation2] sm:$0xff] %vm203_vm0, %v187_v56 }
  0x2a   : > { %1583 = vmatprep.subr.mxu0 %v940_v31  ;;  %1707 = vmatprep.subr.mxu1 %v940_v31  ;;  %v2183_v45 = vld [vmem:[%s2029_s21 + $0xca] sm:$0xff]  ;;  %535 = vst.msk [vmem:[#allocation2 + $0x80] sm:$0xff] %vm203_vm0, %v2172_v44  ;;  %v2210_v52 = vld [vmem:[%s2029_s21 + $0x52] sm:$0xff]  ;;  %v2235_v57 = vld [vmem:[%s2029_s21 + $0x62] sm:$0xff] }
  0x2b   : > { %602 = vrot.lane.b32.xlu1 %v2110_v29, %s1903_s4  ;;  %580 = vrot.lane.b32.xlu0 %v2137_v35, %s1903_s4  ;;  %v2186_v46 = vld [vmem:[%s2029_s21 + $0x4a] sm:$0xff]  ;;  %866 = vst.msk [vmem:[#allocation2 + $0x148] sm:$0xff] %vm203_vm0, %v2183_v45  ;;  %856 = vst.msk [vmem:[#allocation2 + $0x58] sm:$0xff] %vm203_vm0, %v2210_v52  ;;  %v937_v58 = vld [vmem:[%s2843_s1 + $0xa0] sm:$0xff] }
  0x2c   : > { %v2197_v49 = vld [vmem:[%s2029_s21 + $0xb1] sm:$0xff]  ;;  %1584 = vmatpush3.msra.mxu0 %v924_v34  ;;  %1723 = vmatpush3.msra.mxu1 %v924_v34  ;;  %855 = vst.msk [vmem:[#allocation2 + $0x40] sm:$0xff] %vm203_vm0, %v2186_v46  ;;  %v2220_v54 = vld [vmem:[%s2029_s21 + $0x68] sm:$0xff]  ;;  %v2245_v59 = vld [vmem:[%s2029_s21 + $0xc0] sm:$0xff] }
  0x2d   : > { %1585 = vmatprep.subr.mxu0 %v939_v38  ;;  %1708 = vmatprep.subr.mxu1 %v939_v38  ;;  %543 = vst.msk [vmem:[#allocation2 + $0x140] sm:$0xff] %vm203_vm0, %v2197_v49  ;;  %v2223_v55 = vld [vmem:[%s2029_s21 + $0x69] sm:$0xff]  ;;  %213 = vst.msk [vmem:[#allocation2 + $0xd8] sm:$0xff] %vm203_vm0, %v2220_v54  ;;  %v2248_v60 = vld [vmem:[%s2029_s21 + $0x78] sm:$0xff] }
  0x2e   : > { %1586 = vmatpush3.msra.mxu0 %v923_v41  ;;  %1724 = vmatpush3.msra.mxu1 %v923_v41  ;;  %537 = vst.msk [vmem:[#allocation2 + $0xb0] sm:$0xff] %vm203_vm0, %v2223_v55  ;;  %857 = vst.msk [vmem:[#allocation2 + $0x70] sm:$0xff] %vm203_vm0, %v2235_v57  ;;  %v921_v61 = vld [vmem:[%s2843_s1 + $0x20] sm:$0xff]  ;;  %v2261_v63 = vld [vmem:[%s2029_s21 + $0x92] sm:$0xff] }
  0x2f   : > { %276 = vrot.lane.b32.xlu1 %v2166_v42, %s1903_s4  ;;  %254 = vrot.lane.b32.xlu0 %v221_v48, %s1903_s4  ;;  %v2256_v62 = vld [vmem:[%s2029_s21 + $0x79] sm:$0xff]  ;;  %214 = vst.msk [vmem:[#allocation2 + $0xf0] sm:$0xff] %vm203_vm0, %v2248_v60  ;;  %v318_v0 = vld [vmem:[%s2029_s21 + $0xa] sm:$0xff] }
  0x30   : > { %1587 = vmatprep.subr.mxu0 %v938_v47  ;;  %1709 = vmatprep.subr.mxu1 %v938_v47  ;;  %v936_v1 = vld [vmem:[%s2843_s1 + $0x98] sm:$0xff]  ;;  %v2268_v2 = vld [vmem:[%s2029_s21 + $0x90] sm:$0xff]  ;;  %538 = vst.msk [vmem:[#allocation2 + $0xc8] sm:$0xff] %vm203_vm0, %v2256_v62  ;;  %v188_v4 = vld [vmem:[%s2029_s21 + $0x8] sm:$0xff] }
  0x31   : > { %1588 = vmatpush3.msra.mxu0 %v922_v53  ;;  %1725 = vmatpush3.msra.mxu1 %v922_v53  ;;  %v920_v3 = vld [vmem:[%s2843_s1 + $0x18] sm:$0xff]  ;;  %216 = vst.msk [vmem:[#allocation2 + $0x120] sm:$0xff] %vm203_vm0, %v2268_v2  ;;  %205 = vst.msk [vmem:[#allocation2 + $0x18] sm:$0xff] %vm203_vm0, %v188_v4  ;;  %v2284_v5 = vld [vmem:[%s2029_s21 + $0x6a] sm:$0xff] }
  0x32   : > { %1589 = vmatprep.subr.mxu0 %v937_v58  ;;  %1710 = vmatprep.subr.mxu1 %v937_v58  ;;  %v2287_v6 = vld [vmem:[%s2029_s21 + $0x80] sm:$0xff]  ;;  %v935_v8 = vld [vmem:[%s2843_s1 + $0x90] sm:$0xff]  ;;  %858 = vst.msk [vmem:[#allocation2 + $0x88] sm:$0xff] %vm203_vm0, %v2284_v5  ;;  %v934_v13 = vld [vmem:[%s2843_s1 + $0x88] sm:$0xff] }
  0x33   : > { %701 = vrot.lane.b32.xlu1 %v2245_v59, %s1902_s29  ;;  %679 = vrot.lane.b32.xlu0 %v2065_v18, %s1902_s29  ;;  %v2290_v7 = vld [vmem:[%s2029_s21 + $0x81] sm:$0xff]  ;;  %215 = vst.msk [vmem:[#allocation2 + $0x108] sm:$0xff] %vm203_vm0, %v2287_v6  ;;  %v919_v12 = vld [vmem:[%s2843_s1 + $0x10] sm:$0xff] }
  0x34   : > { %1590 = vmatpush3.msra.mxu0 %v921_v61  ;;  %1726 = vmatpush3.msra.mxu1 %v921_v61  ;;  %v2296_v11 = vld [vmem:[%s2029_s21 + $0x7a] sm:$0xff]  ;;  %539 = vst.msk [vmem:[#allocation2 + $0xe0] sm:$0xff] %vm203_vm0, %v2290_v7  ;;  %v918_v14 = vld [vmem:[%s2843_s1 + $0x8] sm:$0xff] }
  0x35   : > { %1591 = vmatprep.subr.mxu0 %v936_v1  ;;  %1711 = vmatprep.subr.mxu1 %v936_v1  ;;  %859 = vst.msk [vmem:[#allocation2 + $0xa0] sm:$0xff] %vm203_vm0, %v2296_v11  ;;  %v2319_v15 = vld [vmem:[%s2029_s21 + $0x98] sm:$0xff]  ;;  %v933_v17 = vld [vmem:[%s2843_s1 + $0x80] sm:$0xff]  ;;  %v1507_v28 = vld [vmem:[%s2029_s21 + $0xc8] sm:$0xff] }
  0x36   : > { %1592 = vmatpush3.msra.mxu0 %v920_v3  ;;  %1727 = vmatpush3.msra.mxu1 %v920_v3  ;;  %217 = vst.msk [vmem:[#allocation2 + $0x138] sm:$0xff] %vm203_vm0, %v2319_v15  ;;  %v2327_v19 = vld [vmem:[%s2029_s21 + $0x82] sm:$0xff]  ;;  %v2347_v25 = vld [vmem:[%s2029_s21 + $0x99] sm:$0xff] }
  0x37   : > { %373 = vrot.lane.b32.xlu1 %v2261_v63, %s1902_s29  ;;  %351 = vrot.lane.b32.xlu0 %v318_v0, %s1902_s29  ;;  %v917_v20 = vld [vmem:[%s2843_s1] sm:$0xff]  ;;  %860 = vst.msk [vmem:[#allocation2 + $0xb8] sm:$0xff] %vm203_vm0, %v2327_v19 }
  0x38   : > { %1593 = vmatprep.subr.mxu0 %v935_v8  ;;  %1712 = vmatprep.subr.mxu1 %v935_v8  ;;  %v1535_v31 = vld [vmem:[%s2029_s21 + $0x9a] sm:$0xff] }
  0x39   : > { %1594 = vmatpush3.msra.mxu0 %v919_v12  ;;  %1728 = vmatpush3.msra.mxu1 %v919_v12  ;;  %862 = vst.msk [vmem:[#allocation2 + $0xe8] sm:$0xff] %vm203_vm0, %v1535_v31 }
  0x3a   : > { %1595 = vmatprep.subr.mxu0 %v934_v13  ;;  %1713 = vmatprep.subr.mxu1 %v934_v13 }
  0x3b   : > { %797 = vrot.lane.b32.xlu1 %v2076_v21, %s1904_s8  ;;  %775 = vrot.lane.b32.xlu0 %v2079_v22, %s1904_s8  ;;  %v1489_v21 = vld [vmem:[%s2029_s21 + $0xb2] sm:$0xff] }
  0x3c   : > { %1596 = vmatpush3.msra.mxu0 %v918_v14  ;;  %1729 = vmatpush3.msra.mxu1 %v918_v14 }
  0x3d   : > { %1597 = vmatprep.subr.mxu0 %v933_v17  ;;  %1714 = vmatprep.subr.mxu1 %v933_v17  ;;  %v951_v17 = vld [vmem:[%s2843_s1 + $0x110] sm:$0xff] }
  0x3e   : > { %1598 = vmatpush3.msra.mxu0 %v917_v20  ;;  %1730 = vmatpush3.msra.mxu1 %v917_v20 }
  0x3f   : > { %473 = vrot.lane.b32.xlu1 %v2084_v23, %s1904_s8  ;;  %451 = vrot.lane.b32.xlu0 %v2087_v24, %s1904_s8  ;;  %v2358_v24 = vld [vmem:[%s2029_s21 + $0x9a] sm:$0xff] }
  0x43   : > { %604 = vrot.lane.b32.xlu1 %v1489_v21, %s1903_s4  ;;  %582 = vrot.lane.b32.xlu0 %v2097_v26, %s1903_s4 }
  0x47   : > { %278 = vrot.lane.b32.xlu1 %v2347_v25, %s1903_s4  ;;  %256 = vrot.lane.b32.xlu0 %v2100_v27, %s1903_s4  ;;  %v1490_v27 = vld [vmem:[%s2029_s21 + $0xc2] sm:$0xff] }
  0x4b   : > { %703 = vrot.lane.b32.xlu1 %v1507_v28, %s1902_s29  ;;  %681 = vrot.lane.b32.xlu0 %v2113_v30, %s1902_s29 }
  0x4f   : > { %375 = vrot.lane.b32.xlu1 %v2358_v24, %s1902_s29  ;;  %353 = vrot.lane.b32.xlu0 %v2038_v10, %s1902_s29  ;;  %v1508_v10 = vld [vmem:[%s2029_s21 + $0xd8] sm:$0xff] }
  0x53   : > { %799 = vrot.lane.b32.xlu1 %v2126_v32, %s1904_s8  ;;  %777 = vrot.lane.b32.xlu0 %v2129_v33, %s1904_s8 }
  0x57   : > { %475 = vrot.lane.b32.xlu1 %v2140_v36, %s1904_s8  ;;  %453 = vrot.lane.b32.xlu0 %v2035_v9, %s1904_s8  ;;  %v1524_v9 = vld [vmem:[%s2029_s21 + $0xd9] sm:$0xff] }
  0x5b   : > { %606 = vrot.lane.b32.xlu1 %v1490_v27, %s1903_s4  ;;  %584 = vrot.lane.b32.xlu0 %v2143_v37, %s1903_s4  ;;  %v1471_v27 = vld [vmem:[%s2029_s21 + $0x99] sm:$0xff] }
  0x5c   : > { %541 = vst.msk [vmem:[#allocation2 + $0x110] sm:$0xff] %vm203_vm0, %v1471_v27 }
  0x5f   : > { %280 = vrot.lane.b32.xlu1 %v2153_v39, %s1903_s4  ;;  %258 = vrot.lane.b32.xlu0 %v2156_v40, %s1903_s4  ;;  %v1540_v40 = vld [vmem:[%s2029_s21 + $0xda] sm:$0xff] }
  0x60   : > { %867 = vst.msk [vmem:[#allocation2 + $0x160] sm:$0xff] %vm203_vm0, %v1540_v40 }
  0x63   : > { %705 = vrot.lane.b32.xlu1 %v1508_v10, %s1902_s29  ;;  %683 = vrot.lane.b32.xlu0 %v2169_v43, %s1902_s29 }
  0x67   : > { %377 = vrot.lane.b32.xlu1 %v2110_v29, %s1902_s29  ;;  %355 = vrot.lane.b32.xlu0 %v2137_v35, %s1902_s29  ;;  %v1509_v29 = vld [vmem:[%s2029_s21 + $0xe0] sm:$0xff] }
  0x68   : > { %v1538_v35 = vld [vmem:[%s2029_s21 + $0xc2] sm:$0xff] }
  0x69   : > { %865 = vst.msk [vmem:[#allocation2 + $0x130] sm:$0xff] %vm203_vm0, %v1538_v35 }
  0x6b   : > { %801 = vrot.lane.b32.xlu1 %v1524_v9, %s1904_s8  ;;  %779 = vrot.lane.b32.xlu0 %v2172_v44, %s1904_s8 }
  0x6f   : > { %477 = vrot.lane.b32.xlu1 %v2245_v59, %s1904_s8  ;;  %455 = vrot.lane.b32.xlu0 %v2065_v18, %s1904_s8  ;;  %v2411_v18 = vld [vmem:[%s2843_s1 + $0x118] sm:$0xff] }
  0x70   : > { %1667 = vmatprep.subr.mxu1 %v2411_v18 }
  0x73   : > { %608 = vrot.lane.b32.xlu1 %v2183_v45, %s1903_s4  ;;  %586 = vrot.lane.b32.xlu0 %v2186_v46, %s1903_s4  ;;  %v1541_v45 = vld [vmem:[%s2029_s21 + $0xe2] sm:$0xff] }
  0x74   : > { %868 = vst.msk [vmem:[#allocation2 + $0x178] sm:$0xff] %vm203_vm0, %v1541_v45 }
  0x77   : > { %282 = vrot.lane.b32.xlu1 %v2197_v49, %s1903_s4  ;;  %260 = vrot.lane.b32.xlu0 %v2056_v16, %s1903_s4  ;;  %v1525_v16 = vld [vmem:[%s2029_s21 + $0xe1] sm:$0xff] }
  0x7b   : > { %707 = vrot.lane.b32.xlu1 %v1509_v29, %s1902_s29  ;;  %685 = vrot.lane.b32.xlu0 %v2200_v50, %s1902_s29 }
  0x7f   : > { %379 = vrot.lane.b32.xlu1 %v1489_v21, %s1902_s29  ;;  %357 = vrot.lane.b32.xlu0 %v2097_v26, %s1902_s29  ;;  %v1534_v26 = vld [vmem:[%s2029_s21 + $0x92] sm:$0xff]  ;;  %v949_v21 = vld [vmem:[%s2843_s1 + $0x100] sm:$0xff] }
  0x80   : > { %861 = vst.msk [vmem:[#allocation2 + $0xd0] sm:$0xff] %vm203_vm0, %v1534_v26 }
  0x83   : > { %803 = vrot.lane.b32.xlu1 %v1525_v16, %s1904_s8  ;;  %781 = vrot.lane.b32.xlu0 %v2207_v51, %s1904_s8 }
  0x87   : > { %479 = vrot.lane.b32.xlu1 %v1507_v28, %s1904_s8  ;;  %457 = vrot.lane.b32.xlu0 %v2113_v30, %s1904_s8  ;;  %v1536_v30 = vld [vmem:[%s2029_s21 + $0xaa] sm:$0xff] }
  0x88   : > { %863 = vst.msk [vmem:[#allocation2 + $0x100] sm:$0xff] %vm203_vm0, %v1536_v30  ;;  %v895_v27 = vld [vmem:[#allocation2 + $0xd0] sm:$0xff] }
  0x8b   : > { %588 = vrot.lane.b32.xlu0 %v2210_v52, %s1903_s4  ;;  %262 = vrot.lane.b32.xlu1 %v2079_v22, %s1903_s4  ;;  %v1537_v22 = vld [vmem:[%s2029_s21 + $0xb2] sm:$0xff] }
  0x8c   : > { %864 = vst.msk [vmem:[#allocation2 + $0x118] sm:$0xff] %vm203_vm0, %v1537_v22 }
  0x8f   : > { %687 = vrot.lane.b32.xlu0 %v2220_v54, %s1902_s29  ;;  %359 = vrot.lane.b32.xlu1 %v2143_v37, %s1902_s29 }
  0x91   : > { %v678_v32 = vpop.permute.xlu1 %677  ;;  %v579_v34 = vpop.permute.xlu0 %578 }
  0x92   : > { %626 = vst.msk [vmem:[#allocation2 + $0x8] sm:$0xff] %vm300_vm1, %v579_v34 }
  0x93   : > { %783 = vrot.lane.b32.xlu0 %v2223_v55, %s1904_s8  ;;  %459 = vrot.lane.b32.xlu1 %v2169_v43, %s1904_s8  ;;  %725 = vst.msk [vmem:[#allocation2 + $0x8] sm:$0xff] %vm397_vm2, %v678_v32 }
  0x95   : > { %v350_v37 = vpop.permute.xlu1 %349  ;;  %v253_v38 = vpop.permute.xlu0 %252 }
  0x96   : > { %301 = vst.msk [vmem:[#allocation2] sm:$0xff] %vm300_vm1, %v253_v38 }
  0x97   : > { %590 = vrot.lane.b32.xlu0 %v2235_v57, %s1903_s4  ;;  %264 = vrot.lane.b32.xlu1 %v2129_v33, %s1903_s4  ;;  %398 = vst.msk [vmem:[#allocation2] sm:$0xff] %vm397_vm2, %v350_v37 }
  0x99   : > { %v450_v41 = vpop.permute.xlu1 %449  ;;  %v774_v43 = vpop.permute.xlu0 %773 }
  0x9a   : > { %498 = vst.msk [vmem:[#allocation2] sm:$0xff] %vm497_vm3, %v450_v41  ;;  %821 = vst.msk [vmem:[#allocation2 + $0x8] sm:$0xff] %vm497_vm3, %v774_v43 }
  0x9b   : > { %689 = vrot.lane.b32.xlu0 %v2248_v60, %s1902_s29  ;;  %361 = vrot.lane.b32.xlu1 %v2186_v46, %s1902_s29 }
  0x9d   : > { %v603_v33 = vpop.permute.xlu1 %602  ;;  %v581_v47 = vpop.permute.xlu0 %580 }
  0x9e   : > { %638 = vst.msk [vmem:[#allocation2 + $0x128] sm:$0xff] %vm300_vm1, %v603_v33  ;;  %627 = vst.msk [vmem:[#allocation2 + $0x20] sm:$0xff] %vm300_vm1, %v581_v47 }
  0x9f   : > { %785 = vrot.lane.b32.xlu0 %v2256_v62, %s1904_s8  ;;  %461 = vrot.lane.b32.xlu1 %v2200_v50, %s1904_s8 }
  0xa1   : > { %v277_v48 = vpop.permute.xlu1 %276  ;;  %v255_v53 = vpop.permute.xlu0 %254  ;;  %v2470_v56 = vld [vmem:[#allocation2 + $0x8] sm:$0xff]  ;;  %v869_v58 = vld [vmem:[#allocation2] sm:$0xff] }
  0xa2   : > { %313 = vst.msk [vmem:[#allocation2 + $0x120] sm:$0xff] %vm300_vm1, %v277_v48  ;;  %302 = vst.msk [vmem:[#allocation2 + $0x18] sm:$0xff] %vm300_vm1, %v255_v53  ;;  %1072 = vmatprep.mubr.f32.mxu0 %v2470_v56 }
  0xa3   : > { %592 = vrot.lane.b32.xlu0 %v2284_v5, %s1903_s4  ;;  %1073 = vmatmul.mubr.f32.vlgmr.msra.gmra.mxu0 %v869_v58 }
  0xa4   : > { %266 = vrot.lane.b32.xlu1 %v2172_v44, %s1903_s4 }
  0xa5   : > { %v702_v46 = vpop.permute.xlu1 %701  ;;  %v680_v50 = vpop.permute.xlu0 %679 }
  0xa6   : > { %737 = vst.msk [vmem:[#allocation2 + $0x128] sm:$0xff] %vm397_vm2, %v702_v46  ;;  %726 = vst.msk [vmem:[#allocation2 + $0x20] sm:$0xff] %vm397_vm2, %v680_v50 }
  0xa7   : > { %691 = vrot.lane.b32.xlu0 %v2287_v6, %s1902_s29 }
  0xa8   : > { %363 = vrot.lane.b32.xlu1 %v2210_v52, %s1902_s29 }
  0xa9   : > { %v374_v59 = vpop.permute.xlu1 %373  ;;  %v352_v61 = vpop.permute.xlu0 %351 }
  0xaa   : > { %410 = vst.msk [vmem:[#allocation2 + $0x120] sm:$0xff] %vm397_vm2, %v374_v59  ;;  %399 = vst.msk [vmem:[#allocation2 + $0x18] sm:$0xff] %vm397_vm2, %v352_v61  ;;  %v871_v59 = vld [vmem:[#allocation2 + $0x10] sm:$0xff] }
  0xab   : > { %787 = vrot.lane.b32.xlu0 %v2290_v7, %s1904_s8 }
  0xac   : > { %463 = vrot.lane.b32.xlu1 %v2220_v54, %s1904_s8 }
  0xad   : > { %v798_v44 = vpop.permute.xlu1 %797  ;;  %v776_v0 = vpop.permute.xlu0 %775 }
  0xae   : > { %833 = vst.msk [vmem:[#allocation2 + $0x128] sm:$0xff] %vm497_vm3, %v798_v44  ;;  %822 = vst.msk [vmem:[#allocation2 + $0x20] sm:$0xff] %vm497_vm3, %v776_v0 }
  0xaf   : > { %594 = vrot.lane.b32.xlu0 %v2296_v11, %s1903_s4 }
  0xb0   : > { %268 = vrot.lane.b32.xlu1 %v2207_v51, %s1903_s4  ;;  %v1470_v51 = vld [vmem:[%s2029_s21 + $0x91] sm:$0xff]  ;;  %s175_s21 = sand.u32 1, %s1876_s13  }
  0xb1   : > { %v474_v52 = vpop.permute.xlu1 %473  ;;  %v452_v1 = vpop.permute.xlu0 %451  ;;  %540 = vst.msk [vmem:[#allocation2 + $0xf8] sm:$0xff] %vm203_vm0, %v1470_v51  ;;  %s2791_s15 = scalar_lea.sflag [#allocation4], %s175_s21 }
  0xb2   : > { %510 = vst.msk [vmem:[#allocation2 + $0x120] sm:$0xff] %vm497_vm3, %v474_v52  ;;  %499 = vst.msk [vmem:[#allocation2 + $0x18] sm:$0xff] %vm497_vm3, %v452_v1  ;;  %v874_v1 = vld [vmem:[#allocation2 + $0x28] sm:$0xff] }
  0xb3   : > { %693 = vrot.lane.b32.xlu0 %v2268_v2, %s1902_s29 }
  0xb4   : > { %365 = vrot.lane.b32.xlu1 %v2235_v57, %s1902_s29 }
  0xb5   : > { %v605_v54 = vpop.permute.xlu1 %604  ;;  %v583_v3 = vpop.permute.xlu0 %582  ;;  %v2503_v4 = vld [vmem:[#allocation2 + $0x20] sm:$0xff]  ;;  %v2505_v8 = vld [vmem:[#allocation2 + $0x128] sm:$0xff] }
  0xb6   : > { %639 = vst.msk [vmem:[#allocation2 + $0x140] sm:$0xff] %vm300_vm1, %v605_v54  ;;  %628 = vst.msk [vmem:[#allocation2 + $0x38] sm:$0xff] %vm300_vm1, %v583_v3  ;;  %1077 = vmatprep.mubr.f32.mxu0 %v2503_v4  ;;  %1132 = vmatprep.mubr.f32.mxu1 %v2505_v8  ;;  %v877_v54 = vld [vmem:[#allocation2 + $0x40] sm:$0xff] }
  0xb7   : > { %789 = vrot.lane.b32.xlu0 %v2166_v42, %s1904_s8  ;;  %v950_v42 = vld [vmem:[%s2843_s1 + $0x108] sm:$0xff] }
  0xb8   : > { %465 = vrot.lane.b32.xlu1 %v2248_v60, %s1904_s8 }
  0xb9   : > { %v279_v57 = vpop.permute.xlu1 %278  ;;  %v257_v12 = vpop.permute.xlu0 %256  ;;  %v872_v13 = vld [vmem:[#allocation2 + $0x18] sm:$0xff]  ;;  %v905_v14 = vld [vmem:[#allocation2 + $0x120] sm:$0xff] }
  0xba   : > { %314 = vst.msk [vmem:[#allocation2 + $0x138] sm:$0xff] %vm300_vm1, %v279_v57  ;;  %303 = vst.msk [vmem:[#allocation2 + $0x30] sm:$0xff] %vm300_vm1, %v257_v12  ;;  %1078 = vmatmul.mubr.f32.gmra.mxu0 %v872_v13  ;;  %1133 = vmatmul.mubr.f32.vlgmr.msra.gmra.mxu1 %v905_v14  ;;  %v880_v57 = vld [vmem:[#allocation2 + $0x58] sm:$0xff]  ;;  %v883_v12 = vld [vmem:[#allocation2 + $0x70] sm:$0xff] }
  0xbb   : > { %596 = vrot.lane.b32.xlu0 %v2327_v19, %s1903_s4  ;;  %1668 = vmatpush3.msra.mxu1 %v2411_v18 }
  0xbc   : > { %270 = vrot.lane.b32.xlu1 %v2223_v55, %s1903_s4  ;;  %1669 = vmatprep.subr.mxu1 %v951_v17 }
  0xbd   : > { %v704_v60 = vpop.permute.xlu1 %703  ;;  %v682_v20 = vpop.permute.xlu0 %681  ;;  %1670 = vmatpush3.msra.mxu1 %v951_v17  ;;  %v886_v17 = vld [vmem:[#allocation2 + $0x88] sm:$0xff] }
  0xbe   : > { %738 = vst.msk [vmem:[#allocation2 + $0x140] sm:$0xff] %vm397_vm2, %v704_v60  ;;  %727 = vst.msk [vmem:[#allocation2 + $0x38] sm:$0xff] %vm397_vm2, %v682_v20  ;;  %1671 = vmatprep.subr.mxu1 %v950_v42 }
  0xbf   : > { %695 = vrot.lane.b32.xlu0 %v2319_v15, %s1902_s29  ;;  %1672 = vmatpush3.msra.mxu1 %v950_v42  ;;  %v889_v42 = vld [vmem:[#allocation2 + $0xa0] sm:$0xff] }
  0xc0   : > { %367 = vrot.lane.b32.xlu1 %v2284_v5, %s1902_s29  ;;  %1673 = vmatprep.subr.mxu1 %v949_v21 }
  0xc1   : > { %v376_v55 = vpop.permute.xlu1 %375  ;;  %v354_v28 = vpop.permute.xlu0 %353  ;;  %1674 = vmatpush3.msra.mxu1 %v949_v21 }
  0xc2   : > { %411 = vst.msk [vmem:[#allocation2 + $0x138] sm:$0xff] %vm397_vm2, %v376_v55  ;;  %400 = vst.msk [vmem:[#allocation2 + $0x30] sm:$0xff] %vm397_vm2, %v354_v28  ;;  %v892_v28 = vld [vmem:[#allocation2 + $0xb8] sm:$0xff] }
  0xc3   : > { %791 = vrot.lane.b32.xlu0 %v2347_v25, %s1904_s8 }
  0xc4   : > { %467 = vrot.lane.b32.xlu1 %v2287_v6, %s1904_s8 }
  0xc5   : > { %v800_v10 = vpop.permute.xlu1 %799  ;;  %v778_v9 = vpop.permute.xlu0 %777 }
  0xc6   : > { %834 = vst.msk [vmem:[#allocation2 + $0x140] sm:$0xff] %vm497_vm3, %v800_v10  ;;  %823 = vst.msk [vmem:[#allocation2 + $0x38] sm:$0xff] %vm497_vm3, %v778_v9 }
  0xc7   : > { %598 = vrot.lane.b32.xlu0 %v2261_v63, %s1903_s4 }
  0xc8   : > { %272 = vrot.lane.b32.xlu1 %v2256_v62, %s1903_s4 }
  0xc9   : > { %v476_v5 = vpop.permute.xlu1 %475  ;;  %v454_v25 = vpop.permute.xlu0 %453 }
  0xca   : > { %511 = vst.msk [vmem:[#allocation2 + $0x138] sm:$0xff] %vm497_vm3, %v476_v5  ;;  %500 = vst.msk [vmem:[#allocation2 + $0x30] sm:$0xff] %vm497_vm3, %v454_v25  ;;  %v898_v5 = vld [vmem:[#allocation2 + $0xe8] sm:$0xff]  ;;  %v901_v25 = vld [vmem:[#allocation2 + $0x100] sm:$0xff] }
  0xcb   : > { %697 = vrot.lane.b32.xlu0 %v2084_v23, %s1902_s29 }
  0xcc   : > { %369 = vrot.lane.b32.xlu1 %v2296_v11, %s1902_s29 }
  0xcd   : > { %v607_v6 = vpop.permute.xlu1 %606  ;;  %v585_v29 = vpop.permute.xlu0 %584  ;;  %v2559_v18 = vld [vmem:[#allocation2 + $0x38] sm:$0xff]  ;;  %v2561_v63 = vld [vmem:[#allocation2 + $0x140] sm:$0xff] }
  0xce   : > { %640 = vst.msk [vmem:[#allocation2 + $0x158] sm:$0xff] %vm300_vm1, %v607_v6  ;;  %629 = vst.msk [vmem:[#allocation2 + $0x50] sm:$0xff] %vm300_vm1, %v585_v29  ;;  %1082 = vmatprep.mubr.f32.mxu0 %v2559_v18  ;;  %1137 = vmatprep.mubr.f32.mxu1 %v2561_v63 }
  0xcf   : > { %793 = vrot.lane.b32.xlu0 %v2153_v39, %s1904_s8 }
  0xd0   : > { %469 = vrot.lane.b32.xlu1 %v2268_v2, %s1904_s8 }
  0xd1   : > { %v281_v23 = vpop.permute.xlu1 %280  ;;  %v259_v62 = vpop.permute.xlu0 %258  ;;  %v875_v11 = vld [vmem:[#allocation2 + $0x30] sm:$0xff]  ;;  %v908_v16 = vld [vmem:[#allocation2 + $0x138] sm:$0xff] }
  0xd2   : > { %315 = vst.msk [vmem:[#allocation2 + $0x150] sm:$0xff] %vm300_vm1, %v281_v23  ;;  %304 = vst.msk [vmem:[#allocation2 + $0x48] sm:$0xff] %vm300_vm1, %v259_v62  ;;  %1083 = vmatmul.mubr.f32.gmra.mxu0 %v875_v11  ;;  %1138 = vmatmul.mubr.f32.gmra.mxu1 %v908_v16  ;;  %v904_v23 = vld [vmem:[#allocation2 + $0x118] sm:$0xff]  ;;  %v907_v62 = vld [vmem:[#allocation2 + $0x130] sm:$0xff] }
  0xd3   : > { %600 = vrot.lane.b32.xlu0 %v2358_v24, %s1903_s4 }
  0xd4   : > { %274 = vrot.lane.b32.xlu1 %v2290_v7, %s1903_s4 }
  0xd5   : > { %v706_v39 = vpop.permute.xlu1 %705  ;;  %v684_v26 = vpop.permute.xlu0 %683 }
  0xd6   : > { %739 = vst.msk [vmem:[#allocation2 + $0x158] sm:$0xff] %vm397_vm2, %v706_v39  ;;  %728 = vst.msk [vmem:[#allocation2 + $0x50] sm:$0xff] %vm397_vm2, %v684_v26 }
  0xd7   : > { %699 = vrot.lane.b32.xlu0 %v2140_v36, %s1902_s29 }
  0xd8   : > { %371 = vrot.lane.b32.xlu1 %v2327_v19, %s1902_s29  ;;  %s1812_s29 = sshll.u32 %s1905_s5, 4  ;;  %s1813_s29 = int_to_ptr.vmem [resolvable:$false] %s1812_s29 }
  0xd9   : > { %v378_v2 = vpop.permute.xlu1 %377  ;;  %v356_v31 = vpop.permute.xlu0 %355  ;;  %s1814_s4 = scalar_lea.vmem %s1813_s29, 4096 }
  0xda   : > { %412 = vst.msk [vmem:[#allocation2 + $0x150] sm:$0xff] %vm397_vm2, %v378_v2  ;;  %401 = vst.msk [vmem:[#allocation2 + $0x48] sm:$0xff] %vm397_vm2, %v356_v31  ;;  %v910_v2 = vld [vmem:[#allocation2 + $0x148] sm:$0xff]  ;;  %v913_v31 = vld [vmem:[#allocation2 + $0x160] sm:$0xff] }
  0xdb   : > { %795 = vrot.lane.b32.xlu0 %v2197_v49, %s1904_s8 }
  0xdc   : > { %471 = vrot.lane.b32.xlu1 %v2319_v15, %s1904_s8  ;;  %s1438_s8 = sshll.u32 %s175_s21, 7 }
  0xdd   : > { %v802_v7 = vpop.permute.xlu1 %801  ;;  %v780_v24 = vpop.permute.xlu0 %779  ;;  %s2712_s6 = scalar_lea.vmem [#allocation3], %s1438_s8 }
  0xde   : > { %835 = vst.msk [vmem:[#allocation2 + $0x158] sm:$0xff] %vm497_vm3, %v802_v7  ;;  %824 = vst.msk [vmem:[#allocation2 + $0x50] sm:$0xff] %vm497_vm3, %v780_v24  ;;  %s1347_s20 = sshll.u32 %s2712_s6, 4  ;;  %s2784_s20 = int_to_ptr.vmem [resolvable:$true] %s1347_s20 }
  0xdf   : > { %s1808_s16 = scalar_lea.vmem %s2784_s20, 2048  ;;  %p1815_p2 = scmp.lt.s32.totalorder %s2784_s20, %s1813_s29 }
  0xe0   : > { %p1809_p13 = scmp.ne.s32.totalorder %s2784_s20, %s1808_s16  ;;  %p1816_p4 = scmp.lt.s32.totalorder %s1814_s4, %s1808_s16 }
  0xe1   : > { %v478_v36 = vpop.permute.xlu1 %477  ;;  %v456_v19 = vpop.permute.xlu0 %455 }
  0xe2   : > { %512 = vst.msk [vmem:[#allocation2 + $0x150] sm:$0xff] %vm497_vm3, %v478_v36  ;;  %501 = vst.msk [vmem:[#allocation2 + $0x48] sm:$0xff] %vm497_vm3, %v456_v19  ;;  %v916_v36 = vld [vmem:[#allocation2 + $0x178] sm:$0xff]  ;;  %p1810_p0 = pnand %p1809_p13, %p1979_p3  ;;  %p1817_p5 = por %p1816_p4, %p1815_p2 }
  0xe4   : > { %p1811_p1 = pneg %p1810_p0 }
  0xe5   : > { %v609_v30 = vpop.permute.xlu1 %608  ;;  %v587_v32 = vpop.permute.xlu0 %586  ;;  %v2593_v34 = vld [vmem:[#allocation2 + $0x50] sm:$0xff]  ;;  %v2595_v49 = vld [vmem:[#allocation2 + $0x158] sm:$0xff] }
  0xe6   : > { %641 = vst.msk [vmem:[#allocation2 + $0x170] sm:$0xff] %vm300_vm1, %v609_v30  ;;  %630 = vst.msk [vmem:[#allocation2 + $0x68] sm:$0xff] %vm300_vm1, %v587_v32  ;;  %1087 = vmatprep.mubr.f32.mxu0 %v2593_v34  ;;  %1142 = vmatprep.mubr.f32.mxu1 %v2595_v49  ;;  %p1818_p6 = pnand %p1817_p5, %p1811_p1 }
  0xe9   : > { %v283_v15 = vpop.permute.xlu1 %282  ;;  %v261_v22 = vpop.permute.xlu0 %260  ;;  %v878_v35 = vld [vmem:[#allocation2 + $0x48] sm:$0xff]  ;;  %v911_v37 = vld [vmem:[#allocation2 + $0x150] sm:$0xff] }
  0xea   : > { %316 = vst.msk [vmem:[#allocation2 + $0x168] sm:$0xff] %vm300_vm1, %v283_v15  ;;  %305 = vst.msk [vmem:[#allocation2 + $0x60] sm:$0xff] %vm300_vm1, %v261_v22  ;;  %1088 = vmatmul.mubr.f32.gmra.mxu0 %v878_v35  ;;  %1143 = vmatmul.mubr.f32.gmra.mxu1 %v911_v37 }
  0xed   : > { %v708_v38 = vpop.permute.xlu1 %707  ;;  %v686_v40 = vpop.permute.xlu0 %685 }
  0xee   : > { %740 = vst.msk [vmem:[#allocation2 + $0x170] sm:$0xff] %vm397_vm2, %v708_v38  ;;  %729 = vst.msk [vmem:[#allocation2 + $0x68] sm:$0xff] %vm397_vm2, %v686_v40 }
  0xf1   : > { %v380_v41 = vpop.permute.xlu1 %379  ;;  %v358_v43 = vpop.permute.xlu0 %357 }
  0xf2   : > { %413 = vst.msk [vmem:[#allocation2 + $0x168] sm:$0xff] %vm397_vm2, %v380_v41  ;;  %402 = vst.msk [vmem:[#allocation2 + $0x60] sm:$0xff] %vm397_vm2, %v358_v43 }
  0xf5   : > { %v804_v45 = vpop.permute.xlu1 %803  ;;  %v782_v33 = vpop.permute.xlu0 %781 }
  0xf6   : > { %836 = vst.msk [vmem:[#allocation2 + $0x170] sm:$0xff] %vm497_vm3, %v804_v45  ;;  %825 = vst.msk [vmem:[#allocation2 + $0x68] sm:$0xff] %vm497_vm3, %v782_v33 }
  0xf9   : > { %v480_v47 = vpop.permute.xlu1 %479  ;;  %v458_v48 = vpop.permute.xlu0 %457 }
  0xfa   : > { %513 = vst.msk [vmem:[#allocation2 + $0x168] sm:$0xff] %vm497_vm3, %v480_v47  ;;  %502 = vst.msk [vmem:[#allocation2 + $0x60] sm:$0xff] %vm497_vm3, %v458_v48 }
  0xfd   : > { %v589_v53 = vpop.permute.xlu0 %588  ;;  %v263_v58 = vpop.permute.xlu1 %262  ;;  %v2611_v46 = vld [vmem:[#allocation2 + $0x68] sm:$0xff]  ;;  %v2613_v50 = vld [vmem:[#allocation2 + $0x170] sm:$0xff] }
  0xfe   : > { %631 = vst.msk [vmem:[#allocation2 + $0x80] sm:$0xff] %vm300_vm1, %v589_v53  ;;  %306 = vst.msk [vmem:[#allocation2 + $0x78] sm:$0xff] %vm300_vm1, %v263_v58  ;;  %1092 = vmatprep.mubr.f32.mxu0 %v2611_v46  ;;  %1147 = vmatprep.mubr.f32.mxu1 %v2613_v50 }
 0x101   : > { %v688_v61 = vpop.permute.xlu0 %687  ;;  %v360_v44 = vpop.permute.xlu1 %359  ;;  %v881_v0 = vld [vmem:[#allocation2 + $0x60] sm:$0xff]  ;;  %v914_v52 = vld [vmem:[#allocation2 + $0x168] sm:$0xff] }
 0x102   : > { %730 = vst.msk [vmem:[#allocation2 + $0x80] sm:$0xff] %vm397_vm2, %v688_v61  ;;  %403 = vst.msk [vmem:[#allocation2 + $0x78] sm:$0xff] %vm397_vm2, %v360_v44  ;;  %1093 = vmatmul.mubr.f32.gmra.mxu0 %v881_v0  ;;  %1148 = vmatmul.mubr.f32.gmra.mxu1 %v914_v52 }
 0x103   : > { %1675 = vmatprep.mubr.msk.f32.mxu1 %vm203_vm0, %v871_v59 }
 0x105   : > { %v784_v3 = vpop.permute.xlu0 %783  ;;  %v460_v51 = vpop.permute.xlu1 %459 }
 0x106   : > { %826 = vst.msk [vmem:[#allocation2 + $0x80] sm:$0xff] %vm497_vm3, %v784_v3  ;;  %503 = vst.msk [vmem:[#allocation2 + $0x78] sm:$0xff] %vm497_vm3, %v460_v51  ;;  %1676 = vmatmul.mubr.msk.f32.vlgmr.msra.gmra.mxu1 %vm203_vm0, %v874_v1 }
 0x107   : > { %1678 = vmatprep.mubr.msk.f32.mxu1 %vm203_vm0, %v877_v54 }
 0x109   : > { %v591_v13 = vpop.permute.xlu0 %590  ;;  %v265_v14 = vpop.permute.xlu1 %264 }
 0x10a   : > { %632 = vst.msk [vmem:[#allocation2 + $0x98] sm:$0xff] %vm300_vm1, %v591_v13  ;;  %307 = vst.msk [vmem:[#allocation2 + $0x90] sm:$0xff] %vm300_vm1, %v265_v14  ;;  %1679 = vmatmul.mubr.msk.f32.gmra.mxu1 %vm203_vm0, %v880_v57 }
 0x10b   : > { %1681 = vmatprep.mubr.msk.f32.mxu1 %vm203_vm0, %v883_v12 }
 0x10d   : > { %v690_v60 = vpop.permute.xlu0 %689  ;;  %v362_v20 = vpop.permute.xlu1 %361  ;;  %v2630_v21 = vld [vmem:[#allocation2 + $0x80] sm:$0xff]  ;;  %v884_v55 = vld [vmem:[#allocation2 + $0x78] sm:$0xff] }
 0x10e   : > { %731 = vst.msk [vmem:[#allocation2 + $0x98] sm:$0xff] %vm397_vm2, %v690_v60  ;;  %404 = vst.msk [vmem:[#allocation2 + $0x90] sm:$0xff] %vm397_vm2, %v362_v20  ;;  %1097 = vmatprep.mubr.f32.mxu0 %v2630_v21  ;;  %1682 = vmatmul.mubr.msk.f32.gmra.mxu1 %vm203_vm0, %v886_v17 }
 0x10f   : > { %1098 = vmatmul.mubr.f32.gmra.mxu0 %v884_v55  ;;  %1684 = vmatprep.mubr.msk.f32.mxu1 %vm203_vm0, %v889_v42 }
 0x111   : > { %v786_v10 = vpop.permute.xlu0 %785  ;;  %v462_v9 = vpop.permute.xlu1 %461 }
 0x112   : > { %827 = vst.msk [vmem:[#allocation2 + $0x98] sm:$0xff] %vm497_vm3, %v786_v10  ;;  %504 = vst.msk [vmem:[#allocation2 + $0x90] sm:$0xff] %vm497_vm3, %v462_v9  ;;  %1685 = vmatmul.mubr.msk.f32.gmra.mxu1 %vm203_vm0, %v892_v28 }
 0x113   : > { %1687 = vmatprep.mubr.msk.f32.mxu1 %vm203_vm0, %v895_v27 }
 0x115   : > { %v593_v6 = vpop.permute.xlu0 %592 }
 0x116   : > { %633 = vst.msk [vmem:[#allocation2 + $0xb0] sm:$0xff] %vm300_vm1, %v593_v6  ;;  %v267_v29 = vpop.permute.xlu1 %266  ;;  %1688 = vmatmul.mubr.msk.f32.gmra.mxu1 %vm203_vm0, %v898_v5 }
 0x117   : > { %308 = vst.msk [vmem:[#allocation2 + $0xa8] sm:$0xff] %vm300_vm1, %v267_v29  ;;  %1690 = vmatprep.mubr.msk.f32.mxu1 %vm203_vm0, %v901_v25 }
 0x119   : > { %v692_v11 = vpop.permute.xlu0 %691  ;;  %v2645_v16 = vld [vmem:[#allocation2 + $0x98] sm:$0xff]  ;;  %v887_v39 = vld [vmem:[#allocation2 + $0x90] sm:$0xff] }
 0x11a   : > { %732 = vst.msk [vmem:[#allocation2 + $0xb0] sm:$0xff] %vm397_vm2, %v692_v11  ;;  %v364_v26 = vpop.permute.xlu1 %363  ;;  %1102 = vmatprep.mubr.f32.mxu0 %v2645_v16  ;;  %1691 = vmatmul.mubr.msk.f32.gmra.mxu1 %vm203_vm0, %v904_v23 }
 0x11b   : > { %405 = vst.msk [vmem:[#allocation2 + $0xa8] sm:$0xff] %vm397_vm2, %v364_v26  ;;  %1103 = vmatmul.mubr.f32.gmra.mxu0 %v887_v39  ;;  %1693 = vmatprep.mubr.msk.f32.mxu1 %vm203_vm0, %v907_v62 }
 0x11d   : > { %v788_v7 = vpop.permute.xlu0 %787 }
 0x11e   : > { %828 = vst.msk [vmem:[#allocation2 + $0xb0] sm:$0xff] %vm497_vm3, %v788_v7  ;;  %v464_v24 = vpop.permute.xlu1 %463  ;;  %1694 = vmatmul.mubr.msk.f32.gmra.mxu1 %vm203_vm0, %v910_v2 }
 0x11f   : > { %505 = vst.msk [vmem:[#allocation2 + $0xa8] sm:$0xff] %vm497_vm3, %v464_v24  ;;  %1696 = vmatprep.mubr.msk.f32.mxu1 %vm203_vm0, %v913_v31 }
 0x121   : > { %v595_v19 = vpop.permute.xlu0 %594 }
 0x122   : > { %634 = vst.msk [vmem:[#allocation2 + $0xc8] sm:$0xff] %vm300_vm1, %v595_v19  ;;  %v269_v30 = vpop.permute.xlu1 %268  ;;  %1697 = vmatmul.mubr.msk.f32.gmra.mxu1 %vm203_vm0, %v916_v36  ;;  %v2704_v19 = vld [vmem:[%s2844_s2] ss:$0 sm:$0xff] }
 0x123   : > { %309 = vst.msk [vmem:[#allocation2 + $0xc0] sm:$0xff] %vm300_vm1, %v269_v30 }
 0x125   : > { %v694_v32 = vpop.permute.xlu0 %693  ;;  %v2659_v15 = vld [vmem:[#allocation2 + $0xb0] sm:$0xff] }
 0x126   : > { %733 = vst.msk [vmem:[#allocation2 + $0xc8] sm:$0xff] %vm397_vm2, %v694_v32  ;;  %v366_v22 = vpop.permute.xlu1 %365  ;;  %1107 = vmatprep.mubr.f32.mxu0 %v2659_v15  ;;  %v890_v35 = vld [vmem:[#allocation2 + $0xa8] sm:$0xff] }
 0x127   : > { %406 = vst.msk [vmem:[#allocation2 + $0xc0] sm:$0xff] %vm397_vm2, %v366_v22  ;;  %1108 = vmatmul.mubr.f32.gmra.mxu0 %v890_v35 }
 0x129   : > { %v790_v37 = vpop.permute.xlu0 %789 }
 0x12a   : > { %829 = vst.msk [vmem:[#allocation2 + $0xc8] sm:$0xff] %vm497_vm3, %v790_v37  ;;  %v466_v38 = vpop.permute.xlu1 %465 }
 0x12b   : > { %506 = vst.msk [vmem:[#allocation2 + $0xc0] sm:$0xff] %vm497_vm3, %v466_v38 }
 0x12d   : > { %v597_v40 = vpop.permute.xlu0 %596 }
 0x12e   : > { %635 = vst.msk [vmem:[#allocation2 + $0xe0] sm:$0xff] %vm300_vm1, %v597_v40  ;;  %v271_v41 = vpop.permute.xlu1 %270 }
 0x12f   : > { %310 = vst.msk [vmem:[#allocation2 + $0xd8] sm:$0xff] %vm300_vm1, %v271_v41 }
 0x131   : > { %v696_v43 = vpop.permute.xlu0 %695  ;;  %v2668_v45 = vld [vmem:[#allocation2 + $0xc8] sm:$0xff] }
 0x132   : > { %734 = vst.msk [vmem:[#allocation2 + $0xe0] sm:$0xff] %vm397_vm2, %v696_v43  ;;  %v368_v33 = vpop.permute.xlu1 %367  ;;  %1112 = vmatprep.mubr.f32.mxu0 %v2668_v45  ;;  %v893_v47 = vld [vmem:[#allocation2 + $0xc0] sm:$0xff] }
 0x133   : > { %407 = vst.msk [vmem:[#allocation2 + $0xd8] sm:$0xff] %vm397_vm2, %v368_v33  ;;  %1113 = vmatmul.mubr.f32.gmra.mxu0 %v893_v47 }
 0x135   : > { %v792_v48 = vpop.permute.xlu0 %791 }
 0x136   : > { %830 = vst.msk [vmem:[#allocation2 + $0xe0] sm:$0xff] %vm497_vm3, %v792_v48  ;;  %v468_v53 = vpop.permute.xlu1 %467 }
 0x137   : > { %507 = vst.msk [vmem:[#allocation2 + $0xd8] sm:$0xff] %vm497_vm3, %v468_v53 }
 0x139   : > { %v599_v58 = vpop.permute.xlu0 %598 }
 0x13a   : > { %636 = vst.msk [vmem:[#allocation2 + $0xf8] sm:$0xff] %vm300_vm1, %v599_v58  ;;  %v273_v59 = vpop.permute.xlu1 %272 }
 0x13b   : > { %311 = vst.msk [vmem:[#allocation2 + $0xf0] sm:$0xff] %vm300_vm1, %v273_v59 }
 0x13d   : > { %v698_v61 = vpop.permute.xlu0 %697  ;;  %v2677_v44 = vld [vmem:[#allocation2 + $0xe0] sm:$0xff] }
 0x13e   : > { %735 = vst.msk [vmem:[#allocation2 + $0xf8] sm:$0xff] %vm397_vm2, %v698_v61  ;;  %v370_v0 = vpop.permute.xlu1 %369  ;;  %1117 = vmatprep.mubr.f32.mxu0 %v2677_v44  ;;  %v896_v52 = vld [vmem:[#allocation2 + $0xd8] sm:$0xff] }
 0x13f   : > { %408 = vst.msk [vmem:[#allocation2 + $0xf0] sm:$0xff] %vm397_vm2, %v370_v0  ;;  %1118 = vmatmul.mubr.f32.gmra.mxu0 %v896_v52 }
 0x141   : > { %v794_v1 = vpop.permute.xlu0 %793 }
 0x142   : > { %831 = vst.msk [vmem:[#allocation2 + $0xf8] sm:$0xff] %vm497_vm3, %v794_v1  ;;  %v470_v54 = vpop.permute.xlu1 %469 }
 0x143   : > { %508 = vst.msk [vmem:[#allocation2 + $0xf0] sm:$0xff] %vm497_vm3, %v470_v54 }
 0x145   : > { %v601_v3 = vpop.permute.xlu0 %600 }
 0x146   : > { %637 = vst.msk [vmem:[#allocation2 + $0x110] sm:$0xff] %vm300_vm1, %v601_v3  ;;  %v275_v51 = vpop.permute.xlu1 %274 }
 0x147   : > { %312 = vst.msk [vmem:[#allocation2 + $0x108] sm:$0xff] %vm300_vm1, %v275_v51 }
 0x149   : > { %v700_v57 = vpop.permute.xlu0 %699  ;;  %v2686_v12 = vld [vmem:[#allocation2 + $0xf8] sm:$0xff] }
 0x14a   : > { %736 = vst.msk [vmem:[#allocation2 + $0x110] sm:$0xff] %vm397_vm2, %v700_v57  ;;  %v372_v13 = vpop.permute.xlu1 %371  ;;  %1122 = vmatprep.mubr.f32.mxu0 %v2686_v12  ;;  %v899_v14 = vld [vmem:[#allocation2 + $0xf0] sm:$0xff] }
 0x14b   : > { %409 = vst.msk [vmem:[#allocation2 + $0x108] sm:$0xff] %vm397_vm2, %v372_v13  ;;  %1123 = vmatmul.mubr.f32.gmra.mxu0 %v899_v14 }
 0x14d   : > { %v796_v17 = vpop.permute.xlu0 %795 }
 0x14e   : > { %832 = vst.msk [vmem:[#allocation2 + $0x110] sm:$0xff] %vm497_vm3, %v796_v17  ;;  %v472_v42 = vpop.permute.xlu1 %471 }
 0x14f   : > { %509 = vst.msk [vmem:[#allocation2 + $0x108] sm:$0xff] %vm497_vm3, %v472_v42 }
 0x155   : > { %v2693_v60 = vld [vmem:[#allocation2 + $0x110] sm:$0xff] }
 0x156   : > { %1127 = vmatprep.mubr.f32.mxu0 %v2693_v60  ;;  %v902_v20 = vld [vmem:[#allocation2 + $0x108] sm:$0xff] }
 0x157   : > { %1128 = vmatmul.mubr.f32.gmra.mxu0 %v902_v20 }
 0x163   : > { %v1599_v55 = vpop.f32.mrf.mxu0 }
 0x165   : > { %v1600_v28 = vpop.f32.mrf.mxu0 }
 0x166   : > { %v1601_v7 = vadd.f32 %v1600_v28, %v1599_v55 }
 0x168   : > { %v1075_v38 = vadd.f32 %v1601_v7, %v2704_v19 }
 0x17a   : > { %v2696_v27 = vpop.f32.mrf.mxu1  ;;  %v1602_v10 = vpop.f32.mrf.mxu0 }
 0x17c   : > { %v1636_v9 = vpop.f32.mrf.mxu1  ;;  %v1603_v5 = vpop.f32.mrf.mxu0 }
 0x17d   : > { %v1604_v26 = vadd.f32 %v1603_v5, %v1602_v10 }
 0x17f   : > { %v1080_v32 = vadd.f32 %v1604_v26, %v2704_v19 }
 0x192   : > { %v1638_v25 = vpop.f32.mrf.mxu1  ;;  %v1605_v6 = vpop.f32.mrf.mxu0 }
 0x194   : > { %v1639_v29 = vpop.f32.mrf.mxu1  ;;  %v1606_v23 = vpop.f32.mrf.mxu0 }
 0x195   : > { %v1607_v35 = vadd.f32 %v1606_v23, %v1605_v6  ;;  %v1640_v5 = vadd.f32 %v1639_v29, %v1638_v25  ;;  %v1637_v23 = vadd.f32 %v1636_v9, %v2696_v27 }
 0x197   : > { %v1085_v61 = vadd.f32 %v1607_v35, %v2704_v19  ;;  %v1140_v7 = vadd.f32 %v1640_v5, %v2704_v19  ;;  %v1135_v25 = vadd.f32 %v1637_v23, %v2704_v19 }
 0x1aa   : > { %v2698_v62 = vpop.f32.mrf.mxu1  ;;  %v1608_v11 = vpop.f32.mrf.mxu0 }
 0x1ac   : > { %v1642_v39 = vpop.f32.mrf.mxu1  ;;  %v1609_v2 = vpop.f32.mrf.mxu0 }
 0x1ad   : > { %v1610_v30 = vadd.f32 %v1609_v2, %v1608_v11 }
 0x1af   : > { %v1090_v47 = vadd.f32 %v1610_v30, %v2704_v19 }
 0x1c2   : > { %v1644_v31 = vpop.f32.mrf.mxu1  ;;  %v1611_v24 = vpop.f32.mrf.mxu0 }
 0x1c4   : > { %v1645_v36 = vpop.f32.mrf.mxu1  ;;  %v1612_v40 = vpop.f32.mrf.mxu0 }
 0x1c5   : > { %v1613_v53 = vadd.f32 %v1612_v40, %v1611_v24 }
 0x1c6   : > { %v1677_v22 = vpop.f32.mrf.mxu1 }
 0x1c7   : > { %v1225_v37 = vadd.f32 %v1677_v22, %v1080_v32  ;;  %v1095_v51 = vadd.f32 %v1613_v53, %v2704_v19  ;;  %v1643_v32 = vadd.f32 %v1642_v39, %v2698_v62 }
 0x1c8   : > { %v1219_v41 = vpop.f32.mrf.mxu1 }
 0x1c9   : > { %v1299_v43 = vadd.f32 %v1225_v37, %v2503_v4  ;;  %v1220_v33 = vadd.f32 %v1219_v41, %v1075_v38  ;;  %v1145_v37 = vadd.f32 %v1643_v32, %v2704_v19 }
 0x1ca   : > { %v1680_v48 = vpop.f32.mrf.mxu1 }
 0x1cb   : > { %1315 = vst.msk [vmem:[%s2712_s6 + $0x8] sm:$0xff] %vm203_vm0, %v1299_v43  ;;  %v1298_v58 = vadd.f32 %v1220_v33, %v2470_v56  ;;  %v1235_v59 = vadd.f32 %v1680_v48, %v1090_v47 }
 0x1cc   : > { %v1229_v0 = vpop.f32.mrf.mxu1 }
 0x1cd   : > { %1314 = vst.msk [vmem:[%s2712_s6] sm:$0xff] %vm203_vm0, %v1298_v58  ;;  %v1301_v4 = vadd.f32 %v1235_v59, %v2593_v34  ;;  %v1230_v52 = vadd.f32 %v1229_v0, %v1085_v61 }
 0x1ce   : > { %v1683_v1 = vpop.f32.mrf.mxu1 }
 0x1cf   : > { %1317 = vst.msk [vmem:[%s2712_s6 + $0x18] sm:$0xff] %vm203_vm0, %v1301_v4  ;;  %v1300_v54 = vadd.f32 %v1230_v52, %v2559_v18  ;;  %v1614_v3 = vpop.f32.mrf.mxu0 }
 0x1d0   : > { %v1239_v56 = vpop.f32.mrf.mxu1 }
 0x1d1   : > { %1316 = vst.msk [vmem:[%s2712_s6 + $0x10] sm:$0xff] %vm203_vm0, %v1300_v54  ;;  %v1240_v57 = vadd.f32 %v1239_v56, %v1095_v51  ;;  %v1615_v13 = vpop.f32.mrf.mxu0 }
 0x1d2   : > { %v1616_v14 = vadd.f32 %v1615_v13, %v1614_v3  ;;  %v1686_v17 = vpop.f32.mrf.mxu1 }
 0x1d3   : > { %v1302_v34 = vadd.f32 %v1240_v57, %v2611_v46  ;;  %v1646_v46 = vadd.f32 %v1645_v36, %v1644_v31 }
 0x1d4   : > { %v1100_v42 = vadd.f32 %v1616_v14, %v2704_v19  ;;  %v1249_v20 = vpop.f32.mrf.mxu1 }
 0x1d5   : > { %1318 = vst.msk [vmem:[%s2712_s6 + $0x20] sm:$0xff] %vm203_vm0, %v1302_v34  ;;  %v1150_v31 = vadd.f32 %v1646_v46, %v2704_v19 }
 0x1d6   : > { %v1245_v55 = vadd.f32 %v1683_v1, %v1100_v42  ;;  %v1689_v18 = vpop.f32.mrf.mxu1 }
 0x1d8   : > { %v1303_v28 = vadd.f32 %v1245_v55, %v2630_v21  ;;  %v1259_v10 = vpop.f32.mrf.mxu1 }
 0x1da   : > { %1319 = vst.msk [vmem:[%s2712_s6 + $0x28] sm:$0xff] %vm203_vm0, %v1303_v28  ;;  %v2734_v6 = vpop.f32.mrf.mxu1 }
 0x1db   : > { %v1617_v11 = vpop.f32.mrf.mxu0 }
 0x1dc   : > { %v1269_v26 = vpop.f32.mrf.mxu1 }
 0x1dd   : > { %v1618_v2 = vpop.f32.mrf.mxu0 }
 0x1de   : > { %v1619_v24 = vadd.f32 %v1618_v2, %v1617_v11  ;;  %v1695_v30 = vpop.f32.mrf.mxu1 }
 0x1df   : > { %v1285_v21 = vadd.f32 %v1695_v30, %v1140_v7 }
 0x1e0   : > { %v1105_v29 = vadd.f32 %v1619_v24, %v2704_v19  ;;  %v1279_v22 = vpop.f32.mrf.mxu1 }
 0x1e1   : > { %v1311_v27 = vadd.f32 %v1285_v21, %v2561_v63  ;;  %v1280_v9 = vadd.f32 %v1279_v22, %v1135_v25 }
 0x1e2   : > { %v1250_v36 = vadd.f32 %v1249_v20, %v1105_v29  ;;  %v1698_v35 = vpop.f32.mrf.mxu1 }
 0x1e3   : > { %1327 = vst.msk [vmem:[%s2712_s6 + $0x68] sm:$0xff] %vm203_vm0, %v1311_v27  ;;  %v1310_v62 = vadd.f32 %v1280_v9, %v2505_v8  ;;  %v1295_v39 = vadd.f32 %v1698_v35, %v1150_v31 }
 0x1e4   : > { %v1304_v38 = vadd.f32 %v1250_v36, %v2645_v16  ;;  %v1289_v40 = vpop.f32.mrf.mxu1 }
 0x1e5   : > { %1326 = vst.msk [vmem:[%s2712_s6 + $0x60] sm:$0xff] %vm203_vm0, %v1310_v62  ;;  %v1313_v63 = vadd.f32 %v1295_v39, %v2613_v50  ;;  %v1290_v41 = vadd.f32 %v1289_v40, %v1145_v37 }
 0x1e6   : > { %1320 = vst.msk [vmem:[%s2712_s6 + $0x30] sm:$0xff] %vm203_vm0, %v1304_v38 }
 0x1e7   : > { %1329 = vst.msk [vmem:[%s2712_s6 + $0x78] sm:$0xff] %vm203_vm0, %v1313_v63  ;;  %v1312_v43 = vadd.f32 %v1290_v41, %v2595_v49  ;;  %v1620_v8 = vpop.f32.mrf.mxu0 }
 0x1e9   : > { %1328 = vst.msk [vmem:[%s2712_s6 + $0x70] sm:$0xff] %vm203_vm0, %v1312_v43  ;;  %v1621_v33 = vpop.f32.mrf.mxu0 }
 0x1ea   : > { %v1622_v47 = vadd.f32 %v1621_v33, %v1620_v8 }
 0x1ec   : > { %v1110_v16 = vadd.f32 %v1622_v47, %v2704_v19 }
 0x1ee   : > { %v1255_v48 = vadd.f32 %v1686_v17, %v1110_v16 }
 0x1f0   : > { %v1305_v53 = vadd.f32 %v1255_v48, %v2659_v15 }
 0x1f2   : > { %1321 = vst.msk [vmem:[%s2712_s6 + $0x38] sm:$0xff] %vm203_vm0, %v1305_v53 }
 0x1f3   : > { %v1623_v50 = vpop.f32.mrf.mxu0 }
 0x1f5   : > { %v1624_v58 = vpop.f32.mrf.mxu0 }
 0x1f6   : > { %v1625_v59 = vadd.f32 %v1624_v58, %v1623_v50 }
 0x1f8   : > { %v1115_v61 = vadd.f32 %v1625_v59, %v2704_v19 }
 0x1fa   : > { %v1260_v0 = vadd.f32 %v1259_v10, %v1115_v61 }
 0x1fc   : > { %v1306_v49 = vadd.f32 %v1260_v0, %v2668_v45 }
 0x1fe   : > { %1322 = vst.msk [vmem:[%s2712_s6 + $0x40] sm:$0xff] %vm203_vm0, %v1306_v49 }
 0x1ff   : > { %v1626_v4 = vpop.f32.mrf.mxu0 }
 0x201   : > { %v1627_v52 = vpop.f32.mrf.mxu0 }
 0x202   : > { %v1628_v1 = vadd.f32 %v1627_v52, %v1626_v4 }
 0x204   : > { %v1120_v15 = vadd.f32 %v1628_v1, %v2704_v19 }
 0x206   : > { %v1265_v54 = vadd.f32 %v1689_v18, %v1120_v15 }
 0x208   : > { %v1307_v3 = vadd.f32 %v1265_v54, %v2677_v44 }
 0x20a   : > { %1323 = vst.msk [vmem:[%s2712_s6 + $0x48] sm:$0xff] %vm203_vm0, %v1307_v3 }
 0x20b   : > { %v1629_v51 = vpop.f32.mrf.mxu0 }
 0x20d   : > { %v1630_v56 = vpop.f32.mrf.mxu0 }
 0x20e   : > { %v1631_v57 = vadd.f32 %v1630_v56, %v1629_v51 }
 0x210   : > { %v1125_v45 = vadd.f32 %v1631_v57, %v2704_v19 }
 0x212   : > { %v1270_v13 = vadd.f32 %v1269_v26, %v1125_v45 }
 0x214   : > { %v1308_v14 = vadd.f32 %v1270_v13, %v2686_v12 }
 0x216   : > { %1324 = vst.msk [vmem:[%s2712_s6 + $0x50] sm:$0xff] %vm203_vm0, %v1308_v14 }
 0x217   : > { %v1632_v17 = vpop.f32.mrf.mxu0 }
 0x219   : > { %v1633_v44 = vpop.f32.mrf.mxu0 }
 0x21a   : > { %v1634_v34 = vadd.f32 %v1633_v44, %v1632_v17 }
 0x21c   : > { %v1130_v42 = vadd.f32 %v1634_v34, %v2704_v19 }
 0x21e   : > { %v1275_v20 = vadd.f32 %v2734_v6, %v1130_v42 }
 0x220   : > { %v1309_v12 = vadd.f32 %v1275_v20, %v2693_v60 }
 0x222   : > { %1325 = vst.msk [vmem:[%s2712_s6 + $0x58] sm:$0xff] %vm203_vm0, %v1309_v12 }
 0x223   : > { %1821 = shalt.err (!%p1818_p6)
}
 0x224   : > { %s1822_s21 = scalar_lea.hbm %s2782_s27, 2048  ;;  %s1826_s7 = scalar_lea.hbm %s2845_s3, 8192 }
 0x225   : > { %p1823_p7 = scmp.ne.s32.totalorder %s2782_s27, %s1822_s21  ;;  %p1827_p11 = scmp.lt.s32.totalorder %s2782_s27, %s2845_s3 }
 0x226   : > { %p1828_p12 = scmp.lt.s32.totalorder %s1826_s7, %s1822_s21 }
 0x227   : > { %p1824_p9 = pnand %p1823_p7, %p1979_p3 }
 0x228   : > { %p1829_p13 = por %p1828_p12, %p1827_p11 }
 0x229   : > { %p1825_p10 = pneg %p1824_p9 }
 0x22b   : > { %p1830_p0 = pnand %p1829_p13, %p1825_p10 }
 0x22d   : > { %1833 = shalt.err (!%p1830_p0)
}
 0x22e   : > { %s1906_s11 = smov 128   ;;  %s1907_s24 = smov 8  }
 0x22f   : > { %1732 = dma.vmem_to_hbm [thread:$0]  (%p1979_p3), %s2784_s20, 2048, %s2782_s27, %s2791_s15, %s1906_s11, %s1906_s11, %s1907_s24  }
 0x230 PF: > { %p1738_p1 = scmp.ge.s32.totalorder %s1900_s19, 2  ;;  %s1362_s28 = sand.u32 1, %s1872_s12  }
 0x231   : > { %s1363_s16 = scalar_lea.sflag [#allocation4], %s1362_s28 }
 0x232   : > { %p1735_p2 = pnand %p1738_p1, %p1988_p8 }
 0x234   : > { %p1736_p4 = pneg %p1735_p2 }
 0x236   : > { %1867 = dma.done.wait (%p1736_p4), %s1363_s16, 2048  }
 0x237   : > { %1869 = vsyncadd (%p1736_p4), %s1363_s16, 4294965248  ;;  %s16_s19 = sadd.s32 1, %s1900_s19   ;;  %s2848_s12 = smov %s1876_s13 }
 0x238   : > { %p13_p5 = scmp.ge.s32.totalorder %s16_s19, 6   ;;  %s2849_s13 = smov %s1880_s14 }
 0x239   : > { %s2850_s14 = smov %s1997_s30  ;;  %s2851_s15 = smov %s1892_s17 }
 0x23a   : > { %s2852_s16 = smov %s1896_s18  ;;  %s2853_s17 = smov %s2856_s22 }
 0x23b   : > { %s2854_s18 = smov %s2860_s23  ;;  %15 = sbr.rel (!%p13_p5) target bundleno = 5 (0x5), region = 70 }
 0x240   :  { %1368 = vsyncpa [#allocation4], 1 }
 0x241   :  { %1370 = vsyncpa [#allocation4 + $0x1], 1 }

// kernel: tpu_custom_call.1
= control target key start
LH: loop header
LB: loop body
LE: loop exit
PB: predicated region body
PF: predicated region fallthrough
CT: control target
= control target key end

     0   :  { %8 = vsyncpa [#allocation4], 0  ;;  %s2842_s0 = inlined_call_operand.vmem [shape: f32[2,18,18,32], index: 0, kind: input, shape index: {}]   ;;  %s2843_s1 = inlined_call_operand.vmem [shape: f32[288,32], index: 1, kind: input, shape index: {}]   ;;  %s2844_s2 = inlined_call_operand.vmem [shape: f32[1,32], index: 2, kind: input, shape index: {}]   ;;  %s2845_s3 = inlined_call_operand.hbm [shape: f32[2,16,16,32], index: 3, kind: output, shape index: {}]  }
   0x1   :  { %10 = vsyncpa [#allocation4 + $0x1], 0  ;;  %s1928_s12 = smov 0   ;;  %s1930_s13 = smov 0  }
   0x2   :  { %s1932_s14 = smov 0   ;;  %s1934_s15 = smov 0  }
   0x3   :  { %s1936_s16 = smov 0   ;;  %s1938_s17 = smov 0  }
   0x4   :  { %s1940_s18 = smov 0   ;;  %s1942_s19 = smov 0  }
   0x5 LB: > { %s1433_s20 = sadd.s32 4294967295, %s1900_s19   ;;  %s1434_s21 = sadd.s32 4294967294, %s1900_s19   ;;  %s1900_s19 = sphi %s1942_s19, %s16_s19   ;;  %s1896_s18 = sphi %s1940_s18, %s2854_s18   ;;  %s1892_s17 = sphi %s1938_s17, %s2853_s17   ;;  %s1888_s16 = sphi %s1936_s16, %s2852_s16   ;;  %s1884_s15 = sphi %s1934_s15, %s2851_s15   ;;  %s1880_s14 = sphi %s1932_s14, %s2850_s14   ;;  %s1876_s13 = sphi %s1930_s13, %s2849_s13   ;;  %s1872_s12 = sphi %s1928_s12, %s2848_s12  }
   0x6   : > { %s25_s22 = sadd.s32 1, %s1892_s17  ;;  %s28_s23 = sadd.s32 1, %s1896_s18 }
   0x7   : > { %p26_p0 = scmp.ge.s32.totalorder %s25_s22, 2  ;;  %p115_p1 = scmp.ne.s32.totalorder %s1880_s14, %s1876_s13 }
   0x8   : > { %p116_p2 = scmp.eq.s32.totalorder %s1433_s20, 3  ;;  %p121_p5 = scmp.ne.s32.totalorder %s1876_s13, %s1872_s12 }
   0x9   : > { %s2856_s22 = smov (%p26_p0, %s25_s22), 0  ;;  %s2858_s23 = smov (!%p26_p0, %s28_s23), %s1896_s18 }
   0xa   : > { %s101_s24 = ssub.s32 %s1892_s17, %s2856_s22  ;;  %p1979_p3 = por %p116_p2, %p115_p1 }
   0xb   : > { %p30_p4 = scmp.ge.s32.totalorder %s2858_s23, 2  ;;  %p122_p6 = scmp.eq.s32.totalorder %s1434_s21, 3 }
   0xc   : > { %p1437_p7 = scmp.ge.s32.totalorder %s1900_s19, 1  ;;  %p154_p9 = scmp.lt.s32.totalorder %s1900_s19, 5 }
   0xd   : > { %s2860_s23 = smov (%p30_p4, %s2858_s23), 0  ;;  %p1988_p8 = por %p122_p6, %p121_p5 }
   0xe   : > { %s100_s27 = ssub.s32 %s1896_s18, %s2860_s23  ;;  %s105_s28 = sadd.s32 1, %s1880_s14 }
   0xf   : > { %s102_s29 = sor.u32 %s101_s24, %s100_s27  ;;  %p155_p10 = pnand %p1437_p7, %p154_p9 }
  0x10   : > { %p103_p11 = scmp.eq.s32.totalorder %s102_s29, 0  ;;  %p178_p12 = scmp.lt.s32.totalorder (!%p155_p10), %s1888_s16, 1 }
  0x11   : > { %158 = sbr.rel (%p155_p10) target bundleno = 560 (0x230), region = 32  ;;  %s1902_s29 = smov (!%p155_p10), 64  }
  0x12   : > { %s1997_s30 = scalar_select %p103_p11, %s1880_s14, %s105_s28  }
  0x13   : > { %s1441_s27 = smul.u32 (!%p155_p10), 192, %s1884_s15  ;;  %s1904_s8 = smov (!%p155_p10), 96  }
  0x14   : > { %s1566_s7 = sshll.u32 (!%p155_p10), %s1884_s15, 4  ;;  %s1562_s9 = sshll.u32 (!%p155_p10), %s1888_s16, 5 }
  0x15   : > { %s1344_s10 = sadd.s32 (!%p155_p10), %s1566_s7, %s1562_s9  ;;  %s1905_s5 = smov (!%p155_p10), [#allocation3]  }
  0x16   : > { %v948_v0 = vld [vmem:[%s2843_s1 + $0xf8] sm:$0xff]  ;;  %v947_v2 = vld [vmem:[%s2843_s1 + $0xf0] sm:$0xff]  ;;  %s179_s20 = scalar_select %p178_p12, %s1888_s16, 1  ;;  %v946_v4 = vld [vmem:[%s2843_s1 + $0xe8] sm:$0xff]  ;;  %vm203_vm0 = vcmask 261120   ;;  %vm300_vm1 = vcmask 523520  }
  0x17   : > { %v932_v1 = vld [vmem:[%s2843_s1 + $0x78] sm:$0xff]  ;;  %1567 = vmatprep.subr.mxu0 %v948_v0  ;;  %v931_v3 = vld [vmem:[%s2843_s1 + $0x70] sm:$0xff]  ;;  %1699 = vmatprep.subr.mxu1 %v948_v0  ;;  %v930_v5 = vld [vmem:[%s2843_s1 + $0x68] sm:$0xff]  ;;  %vm397_vm2 = vcmask 785920   ;;  %vm497_vm3 = vcmask 1048320  }
  0x18   : > { %1568 = vmatpush3.msra.mxu0 %v932_v1  ;;  %1715 = vmatpush3.msra.mxu1 %v932_v1  ;;  %s1731_s4 = smul.u32 432, %s179_s20  ;;  %v945_v6 = vld [vmem:[%s2843_s1 + $0xe0] sm:$0xff]  ;;  %v944_v8 = vld [vmem:[%s2843_s1 + $0xd8] sm:$0xff]  ;;  %v943_v13 = vld [vmem:[%s2843_s1 + $0xd0] sm:$0xff] }
  0x19   : > { %1569 = vmatprep.subr.mxu0 %v947_v2  ;;  %1700 = vmatprep.subr.mxu1 %v947_v2  ;;  %v929_v7 = vld [vmem:[%s2843_s1 + $0x60] sm:$0xff]  ;;  %v928_v11 = vld [vmem:[%s2843_s1 + $0x58] sm:$0xff]  ;;  %v927_v17 = vld [vmem:[%s2843_s1 + $0x50] sm:$0xff] }
  0x1a   : > { %1570 = vmatpush3.msra.mxu0 %v931_v3  ;;  %1716 = vmatpush3.msra.mxu1 %v931_v3  ;;  %s182_s11 = scalar_lea.vmem %s2842_s0, %s1731_s4  ;;  %s1903_s4 = smov 32   ;;  %v942_v19 = vld [vmem:[%s2843_s1 + $0xc8] sm:$0xff]  ;;  %v941_v25 = vld [vmem:[%s2843_s1 + $0xc0] sm:$0xff]  ;;  %v940_v31 = vld [vmem:[%s2843_s1 + $0xb8] sm:$0xff] }
  0x1b   : > { %1571 = vmatprep.subr.mxu0 %v946_v4  ;;  %1701 = vmatprep.subr.mxu1 %v946_v4  ;;  %s2029_s21 = scalar_lea.vmem %s182_s11, %s1441_s27  ;;  %v926_v20 = vld [vmem:[%s2843_s1 + $0x48] sm:$0xff]  ;;  %v925_v28 = vld [vmem:[%s2843_s1 + $0x40] sm:$0xff]  ;;  %v924_v34 = vld [vmem:[%s2843_s1 + $0x38] sm:$0xff]  ;;  %s1563_s11 = sshll.u32 %s1344_s10, 7 }
  0x1c   : > { %1572 = vmatpush3.msra.mxu0 %v930_v5  ;;  %1717 = vmatpush3.msra.mxu1 %v930_v5  ;;  %v2035_v9 = vld [vmem:[%s2029_s21 + $0x30] sm:$0xff]  ;;  %v2038_v10 = vld [vmem:[%s2029_s21 + $0x1a] sm:$0xff]  ;;  %v317_v14 = vld [vmem:[%s2029_s21 + $0x2] sm:$0xff]  ;;  %s2782_s27 = scalar_lea.hbm %s2845_s3, %s1563_s11 }
  0x1d   : > { %1573 = vmatprep.subr.mxu0 %v945_v6  ;;  %1702 = vmatprep.subr.mxu1 %v945_v6  ;;  %v1444_v12 = vld [vmem:[%s2029_s21 + $0x18] sm:$0xff]  ;;  %208 = vst.msk [vmem:[#allocation2 + $0x60] sm:$0xff] %vm203_vm0, %v2035_v9  ;;  %v220_v15 = vld [vmem:[%s2029_s21 + $0x1] sm:$0xff]  ;;  %v2110_v29 = vld [vmem:[%s2029_s21 + $0xaa] sm:$0xff] }
  0x1e   : > { %1574 = vmatpush3.msra.mxu0 %v929_v7  ;;  %1718 = vmatpush3.msra.mxu1 %v929_v7  ;;  %v2056_v16 = vld [vmem:[%s2029_s21 + $0x31] sm:$0xff]  ;;  %206 = vst.msk [vmem:[#allocation2 + $0x30] sm:$0xff] %vm203_vm0, %v1444_v12  ;;  %v2076_v21 = vld [vmem:[%s2029_s21 + $0xc1] sm:$0xff]  ;;  %v2079_v22 = vld [vmem:[%s2029_s21 + $0x39] sm:$0xff] }
  0x1f   : > { %677 = vrot.lane.b32.xlu1 %v2035_v9, %s1902_s29  ;;  %578 = vrot.lane.b32.xlu0 %v2038_v10, %s1903_s4  ;;  %532 = vst.msk [vmem:[#allocation2 + $0x38] sm:$0xff] %vm203_vm0, %v2056_v16  ;;  %v2065_v18 = vld [vmem:[%s2029_s21 + $0x38] sm:$0xff]  ;;  %v2084_v23 = vld [vmem:[%s2029_s21 + $0xa8] sm:$0xff]  ;;  %544 = vst.msk [vmem:[#allocation2 + $0x158] sm:$0xff] %vm203_vm0, %v2076_v21 }
  0x20   : > { %1575 = vmatprep.subr.mxu0 %v944_v8  ;;  %1703 = vmatprep.subr.mxu1 %v944_v8  ;;  %209 = vst.msk [vmem:[#allocation2 + $0x78] sm:$0xff] %vm203_vm0, %v2065_v18  ;;  %v2087_v24 = vld [vmem:[%s2029_s21 + $0x20] sm:$0xff]  ;;  %533 = vst.msk [vmem:[#allocation2 + $0x50] sm:$0xff] %vm203_vm0, %v2079_v22  ;;  %v2097_v26 = vld [vmem:[%s2029_s21 + $0x32] sm:$0xff] }
  0x21   : > { %1576 = vmatpush3.msra.mxu0 %v928_v11  ;;  %1719 = vmatpush3.msra.mxu1 %v928_v11  ;;  %v2100_v27 = vld [vmem:[%s2029_s21 + $0x19] sm:$0xff]  ;;  %218 = vst.msk [vmem:[#allocation2 + $0x150] sm:$0xff] %vm203_vm0, %v2084_v23  ;;  %207 = vst.msk [vmem:[#allocation2 + $0x48] sm:$0xff] %vm203_vm0, %v2087_v24  ;;  %v2113_v30 = vld [vmem:[%s2029_s21 + $0x48] sm:$0xff] }
  0x22   : > { %1577 = vmatprep.subr.mxu0 %v943_v13  ;;  %1704 = vmatprep.subr.mxu1 %v943_v13  ;;  %530 = vst.msk [vmem:[#allocation2 + $0x8] sm:$0xff] %vm203_vm0, %v2100_v27  ;;  %853 = vst.msk [vmem:[#allocation2 + $0x10] sm:$0xff] %vm203_vm0, %v2097_v26  ;;  %v2126_v32 = vld [vmem:[%s2029_s21 + $0xc9] sm:$0xff]  ;;  %v2143_v37 = vld [vmem:[%s2029_s21 + $0x3a] sm:$0xff] }
  0x23   : > { %349 = vrot.lane.b32.xlu1 %v317_v14, %s1902_s29  ;;  %252 = vrot.lane.b32.xlu0 %v220_v15, %s1903_s4  ;;  %v2129_v33 = vld [vmem:[%s2029_s21 + $0x49] sm:$0xff]  ;;  %210 = vst.msk [vmem:[#allocation2 + $0x90] sm:$0xff] %vm203_vm0, %v2113_v30  ;;  %545 = vst.msk [vmem:[#allocation2 + $0x170] sm:$0xff] %vm203_vm0, %v2126_v32  ;;  %v2156_v40 = vld [vmem:[%s2029_s21 + $0x21] sm:$0xff] }
  0x24   : > { %1578 = vmatpush3.msra.mxu0 %v927_v17  ;;  %1720 = vmatpush3.msra.mxu1 %v927_v17  ;;  %v2137_v35 = vld [vmem:[%s2029_s21 + $0x22] sm:$0xff]  ;;  %v2140_v36 = vld [vmem:[%s2029_s21 + $0xb0] sm:$0xff]  ;;  %534 = vst.msk [vmem:[#allocation2 + $0x68] sm:$0xff] %vm203_vm0, %v2129_v33  ;;  %854 = vst.msk [vmem:[#allocation2 + $0x28] sm:$0xff] %vm203_vm0, %v2143_v37 }
  0x25   : > { %1579 = vmatprep.subr.mxu0 %v942_v19  ;;  %1705 = vmatprep.subr.mxu1 %v942_v19  ;;  %v939_v38 = vld [vmem:[%s2843_s1 + $0xb0] sm:$0xff]  ;;  %219 = vst.msk [vmem:[#allocation2 + $0x168] sm:$0xff] %vm203_vm0, %v2140_v36  ;;  %531 = vst.msk [vmem:[#allocation2 + $0x20] sm:$0xff] %vm203_vm0, %v2156_v40  ;;  %v938_v47 = vld [vmem:[%s2843_s1 + $0xa8] sm:$0xff] }
  0x26   : > { %1580 = vmatpush3.msra.mxu0 %v926_v20  ;;  %1721 = vmatpush3.msra.mxu1 %v926_v20  ;;  %v2153_v39 = vld [vmem:[%s2029_s21 + $0xa9] sm:$0xff]  ;;  %v2166_v42 = vld [vmem:[%s2029_s21 + $0x91] sm:$0xff]  ;;  %v2200_v50 = vld [vmem:[%s2029_s21 + $0x60] sm:$0xff] }
  0x27   : > { %449 = vrot.lane.b32.xlu1 %v1444_v12, %s1904_s8  ;;  %773 = vrot.lane.b32.xlu0 %v2056_v16, %s1904_s8  ;;  %v923_v41 = vld [vmem:[%s2843_s1 + $0x30] sm:$0xff]  ;;  %542 = vst.msk [vmem:[#allocation2 + $0x128] sm:$0xff] %vm203_vm0, %v2153_v39  ;;  %v2207_v51 = vld [vmem:[%s2029_s21 + $0x61] sm:$0xff]  ;;  %212 = vst.msk [vmem:[#allocation2 + $0xc0] sm:$0xff] %vm203_vm0, %v2200_v50 }
  0x28   : > { %1581 = vmatprep.subr.mxu0 %v941_v25  ;;  %1706 = vmatprep.subr.mxu1 %v941_v25  ;;  %v2169_v43 = vld [vmem:[%s2029_s21 + $0x50] sm:$0xff]  ;;  %v922_v53 = vld [vmem:[%s2843_s1 + $0x28] sm:$0xff]  ;;  %v187_v56 = vld [vmem:[%s2029_s21] sm:$0xff]  ;;  %536 = vst.msk [vmem:[#allocation2 + $0x98] sm:$0xff] %vm203_vm0, %v2207_v51 }
  0x29   : > { %1582 = vmatpush3.msra.mxu0 %v925_v28  ;;  %1722 = vmatpush3.msra.mxu1 %v925_v28  ;;  %v2172_v44 = vld [vmem:[%s2029_s21 + $0x51] sm:$0xff]  ;;  %211 = vst.msk [vmem:[#allocation2 + $0xa8] sm:$0xff] %vm203_vm0, %v2169_v43  ;;  %v221_v48 = vld [vmem:[%s2029_s21 + $0x9] sm:$0xff]  ;;  %204 = vst.msk [vmem:[#allocation2] sm:$0xff] %vm203_vm0, %v187_v56 }
  0x2a   : > { %1583 = vmatprep.subr.mxu0 %v940_v31  ;;  %1707 = vmatprep.subr.mxu1 %v940_v31  ;;  %v2183_v45 = vld [vmem:[%s2029_s21 + $0xca] sm:$0xff]  ;;  %535 = vst.msk [vmem:[#allocation2 + $0x80] sm:$0xff] %vm203_vm0, %v2172_v44  ;;  %v2210_v52 = vld [vmem:[%s2029_s21 + $0x52] sm:$0xff]  ;;  %v2235_v57 = vld [vmem:[%s2029_s21 + $0x62] sm:$0xff] }
  0x2b   : > { %602 = vrot.lane.b32.xlu1 %v2110_v29, %s1903_s4  ;;  %580 = vrot.lane.b32.xlu0 %v2137_v35, %s1903_s4  ;;  %v2186_v46 = vld [vmem:[%s2029_s21 + $0x4a] sm:$0xff]  ;;  %866 = vst.msk [vmem:[#allocation2 + $0x148] sm:$0xff] %vm203_vm0, %v2183_v45  ;;  %856 = vst.msk [vmem:[#allocation2 + $0x58] sm:$0xff] %vm203_vm0, %v2210_v52  ;;  %v937_v58 = vld [vmem:[%s2843_s1 + $0xa0] sm:$0xff] }
  0x2c   : > { %v2197_v49 = vld [vmem:[%s2029_s21 + $0xb1] sm:$0xff]  ;;  %1584 = vmatpush3.msra.mxu0 %v924_v34  ;;  %1723 = vmatpush3.msra.mxu1 %v924_v34  ;;  %855 = vst.msk [vmem:[#allocation2 + $0x40] sm:$0xff] %vm203_vm0, %v2186_v46  ;;  %v2220_v54 = vld [vmem:[%s2029_s21 + $0x68] sm:$0xff]  ;;  %v2245_v59 = vld [vmem:[%s2029_s21 + $0xc0] sm:$0xff] }
  0x2d   : > { %1585 = vmatprep.subr.mxu0 %v939_v38  ;;  %1708 = vmatprep.subr.mxu1 %v939_v38  ;;  %543 = vst.msk [vmem:[#allocation2 + $0x140] sm:$0xff] %vm203_vm0, %v2197_v49  ;;  %v2223_v55 = vld [vmem:[%s2029_s21 + $0x69] sm:$0xff]  ;;  %213 = vst.msk [vmem:[#allocation2 + $0xd8] sm:$0xff] %vm203_vm0, %v2220_v54  ;;  %v2248_v60 = vld [vmem:[%s2029_s21 + $0x78] sm:$0xff] }
  0x2e   : > { %1586 = vmatpush3.msra.mxu0 %v923_v41  ;;  %1724 = vmatpush3.msra.mxu1 %v923_v41  ;;  %537 = vst.msk [vmem:[#allocation2 + $0xb0] sm:$0xff] %vm203_vm0, %v2223_v55  ;;  %857 = vst.msk [vmem:[#allocation2 + $0x70] sm:$0xff] %vm203_vm0, %v2235_v57  ;;  %v921_v61 = vld [vmem:[%s2843_s1 + $0x20] sm:$0xff]  ;;  %v2261_v63 = vld [vmem:[%s2029_s21 + $0x92] sm:$0xff] }
  0x2f   : > { %276 = vrot.lane.b32.xlu1 %v2166_v42, %s1903_s4  ;;  %254 = vrot.lane.b32.xlu0 %v221_v48, %s1903_s4  ;;  %v2256_v62 = vld [vmem:[%s2029_s21 + $0x79] sm:$0xff]  ;;  %214 = vst.msk [vmem:[#allocation2 + $0xf0] sm:$0xff] %vm203_vm0, %v2248_v60  ;;  %v318_v0 = vld [vmem:[%s2029_s21 + $0xa] sm:$0xff] }
  0x30   : > { %1587 = vmatprep.subr.mxu0 %v938_v47  ;;  %1709 = vmatprep.subr.mxu1 %v938_v47  ;;  %v936_v1 = vld [vmem:[%s2843_s1 + $0x98] sm:$0xff]  ;;  %v2268_v2 = vld [vmem:[%s2029_s21 + $0x90] sm:$0xff]  ;;  %538 = vst.msk [vmem:[#allocation2 + $0xc8] sm:$0xff] %vm203_vm0, %v2256_v62  ;;  %v188_v4 = vld [vmem:[%s2029_s21 + $0x8] sm:$0xff] }
  0x31   : > { %1588 = vmatpush3.msra.mxu0 %v922_v53  ;;  %1725 = vmatpush3.msra.mxu1 %v922_v53  ;;  %v920_v3 = vld [vmem:[%s2843_s1 + $0x18] sm:$0xff]  ;;  %216 = vst.msk [vmem:[#allocation2 + $0x120] sm:$0xff] %vm203_vm0, %v2268_v2  ;;  %205 = vst.msk [vmem:[#allocation2 + $0x18] sm:$0xff] %vm203_vm0, %v188_v4  ;;  %v2284_v5 = vld [vmem:[%s2029_s21 + $0x6a] sm:$0xff] }
  0x32   : > { %1589 = vmatprep.subr.mxu0 %v937_v58  ;;  %1710 = vmatprep.subr.mxu1 %v937_v58  ;;  %v2287_v6 = vld [vmem:[%s2029_s21 + $0x80] sm:$0xff]  ;;  %v935_v8 = vld [vmem:[%s2843_s1 + $0x90] sm:$0xff]  ;;  %858 = vst.msk [vmem:[#allocation2 + $0x88] sm:$0xff] %vm203_vm0, %v2284_v5  ;;  %v934_v13 = vld [vmem:[%s2843_s1 + $0x88] sm:$0xff] }
  0x33   : > { %701 = vrot.lane.b32.xlu1 %v2245_v59, %s1902_s29  ;;  %679 = vrot.lane.b32.xlu0 %v2065_v18, %s1902_s29  ;;  %v2290_v7 = vld [vmem:[%s2029_s21 + $0x81] sm:$0xff]  ;;  %215 = vst.msk [vmem:[#allocation2 + $0x108] sm:$0xff] %vm203_vm0, %v2287_v6  ;;  %v919_v12 = vld [vmem:[%s2843_s1 + $0x10] sm:$0xff] }
  0x34   : > { %1590 = vmatpush3.msra.mxu0 %v921_v61  ;;  %1726 = vmatpush3.msra.mxu1 %v921_v61  ;;  %v2296_v11 = vld [vmem:[%s2029_s21 + $0x7a] sm:$0xff]  ;;  %539 = vst.msk [vmem:[#allocation2 + $0xe0] sm:$0xff] %vm203_vm0, %v2290_v7  ;;  %v918_v14 = vld [vmem:[%s2843_s1 + $0x8] sm:$0xff] }
  0x35   : > { %1591 = vmatprep.subr.mxu0 %v936_v1  ;;  %1711 = vmatprep.subr.mxu1 %v936_v1  ;;  %859 = vst.msk [vmem:[#allocation2 + $0xa0] sm:$0xff] %vm203_vm0, %v2296_v11  ;;  %v2319_v15 = vld [vmem:[%s2029_s21 + $0x98] sm:$0xff]  ;;  %v933_v17 = vld [vmem:[%s2843_s1 + $0x80] sm:$0xff]  ;;  %v1507_v28 = vld [vmem:[%s2029_s21 + $0xc8] sm:$0xff] }
  0x36   : > { %1592 = vmatpush3.msra.mxu0 %v920_v3  ;;  %1727 = vmatpush3.msra.mxu1 %v920_v3  ;;  %217 = vst.msk [vmem:[#allocation2 + $0x138] sm:$0xff] %vm203_vm0, %v2319_v15  ;;  %v2327_v19 = vld [vmem:[%s2029_s21 + $0x82] sm:$0xff]  ;;  %v2347_v25 = vld [vmem:[%s2029_s21 + $0x99] sm:$0xff] }
  0x37   : > { %373 = vrot.lane.b32.xlu1 %v2261_v63, %s1902_s29  ;;  %351 = vrot.lane.b32.xlu0 %v318_v0, %s1902_s29  ;;  %v917_v20 = vld [vmem:[%s2843_s1] sm:$0xff]  ;;  %860 = vst.msk [vmem:[#allocation2 + $0xb8] sm:$0xff] %vm203_vm0, %v2327_v19 }
  0x38   : > { %1593 = vmatprep.subr.mxu0 %v935_v8  ;;  %1712 = vmatprep.subr.mxu1 %v935_v8  ;;  %v1535_v31 = vld [vmem:[%s2029_s21 + $0x9a] sm:$0xff] }
  0x39   : > { %1594 = vmatpush3.msra.mxu0 %v919_v12  ;;  %1728 = vmatpush3.msra.mxu1 %v919_v12  ;;  %862 = vst.msk [vmem:[#allocation2 + $0xe8] sm:$0xff] %vm203_vm0, %v1535_v31 }
  0x3a   : > { %1595 = vmatprep.subr.mxu0 %v934_v13  ;;  %1713 = vmatprep.subr.mxu1 %v934_v13 }
  0x3b   : > { %797 = vrot.lane.b32.xlu1 %v2076_v21, %s1904_s8  ;;  %775 = vrot.lane.b32.xlu0 %v2079_v22, %s1904_s8  ;;  %v1489_v21 = vld [vmem:[%s2029_s21 + $0xb2] sm:$0xff] }
  0x3c   : > { %1596 = vmatpush3.msra.mxu0 %v918_v14  ;;  %1729 = vmatpush3.msra.mxu1 %v918_v14 }
  0x3d   : > { %1597 = vmatprep.subr.mxu0 %v933_v17  ;;  %1714 = vmatprep.subr.mxu1 %v933_v17  ;;  %v951_v17 = vld [vmem:[%s2843_s1 + $0x110] sm:$0xff] }
  0x3e   : > { %1598 = vmatpush3.msra.mxu0 %v917_v20  ;;  %1730 = vmatpush3.msra.mxu1 %v917_v20 }
  0x3f   : > { %473 = vrot.lane.b32.xlu1 %v2084_v23, %s1904_s8  ;;  %451 = vrot.lane.b32.xlu0 %v2087_v24, %s1904_s8  ;;  %v2358_v24 = vld [vmem:[%s2029_s21 + $0x9a] sm:$0xff] }
  0x43   : > { %604 = vrot.lane.b32.xlu1 %v1489_v21, %s1903_s4  ;;  %582 = vrot.lane.b32.xlu0 %v2097_v26, %s1903_s4 }
  0x47   : > { %278 = vrot.lane.b32.xlu1 %v2347_v25, %s1903_s4  ;;  %256 = vrot.lane.b32.xlu0 %v2100_v27, %s1903_s4  ;;  %v1490_v27 = vld [vmem:[%s2029_s21 + $0xc2] sm:$0xff] }
  0x4b   : > { %703 = vrot.lane.b32.xlu1 %v1507_v28, %s1902_s29  ;;  %681 = vrot.lane.b32.xlu0 %v2113_v30, %s1902_s29 }
  0x4f   : > { %375 = vrot.lane.b32.xlu1 %v2358_v24, %s1902_s29  ;;  %353 = vrot.lane.b32.xlu0 %v2038_v10, %s1902_s29  ;;  %v1508_v10 = vld [vmem:[%s2029_s21 + $0xd8] sm:$0xff] }
  0x53   : > { %799 = vrot.lane.b32.xlu1 %v2126_v32, %s1904_s8  ;;  %777 = vrot.lane.b32.xlu0 %v2129_v33, %s1904_s8 }
  0x57   : > { %475 = vrot.lane.b32.xlu1 %v2140_v36, %s1904_s8  ;;  %453 = vrot.lane.b32.xlu0 %v2035_v9, %s1904_s8  ;;  %v1524_v9 = vld [vmem:[%s2029_s21 + $0xd9] sm:$0xff] }
  0x5b   : > { %606 = vrot.lane.b32.xlu1 %v1490_v27, %s1903_s4  ;;  %584 = vrot.lane.b32.xlu0 %v2143_v37, %s1903_s4  ;;  %v1471_v27 = vld [vmem:[%s2029_s21 + $0x99] sm:$0xff] }
  0x5c   : > { %541 = vst.msk [vmem:[#allocation2 + $0x110] sm:$0xff] %vm203_vm0, %v1471_v27 }
  0x5f   : > { %280 = vrot.lane.b32.xlu1 %v2153_v39, %s1903_s4  ;;  %258 = vrot.lane.b32.xlu0 %v2156_v40, %s1903_s4  ;;  %v1540_v40 = vld [vmem:[%s2029_s21 + $0xda] sm:$0xff] }
  0x60   : > { %867 = vst.msk [vmem:[#allocation2 + $0x160] sm:$0xff] %vm203_vm0, %v1540_v40 }
  0x63   : > { %705 = vrot.lane.b32.xlu1 %v1508_v10, %s1902_s29  ;;  %683 = vrot.lane.b32.xlu0 %v2169_v43, %s1902_s29 }
  0x67   : > { %377 = vrot.lane.b32.xlu1 %v2110_v29, %s1902_s29  ;;  %355 = vrot.lane.b32.xlu0 %v2137_v35, %s1902_s29  ;;  %v1509_v29 = vld [vmem:[%s2029_s21 + $0xe0] sm:$0xff] }
  0x68   : > { %v1538_v35 = vld [vmem:[%s2029_s21 + $0xc2] sm:$0xff] }
  0x69   : > { %865 = vst.msk [vmem:[#allocation2 + $0x130] sm:$0xff] %vm203_vm0, %v1538_v35 }
  0x6b   : > { %801 = vrot.lane.b32.xlu1 %v1524_v9, %s1904_s8  ;;  %779 = vrot.lane.b32.xlu0 %v2172_v44, %s1904_s8 }
  0x6f   : > { %477 = vrot.lane.b32.xlu1 %v2245_v59, %s1904_s8  ;;  %455 = vrot.lane.b32.xlu0 %v2065_v18, %s1904_s8  ;;  %v2411_v18 = vld [vmem:[%s2843_s1 + $0x118] sm:$0xff] }
  0x70   : > { %1667 = vmatprep.subr.mxu1 %v2411_v18 }
  0x73   : > { %608 = vrot.lane.b32.xlu1 %v2183_v45, %s1903_s4  ;;  %586 = vrot.lane.b32.xlu0 %v2186_v46, %s1903_s4  ;;  %v1541_v45 = vld [vmem:[%s2029_s21 + $0xe2] sm:$0xff] }
  0x74   : > { %868 = vst.msk [vmem:[#allocation2 + $0x178] sm:$0xff] %vm203_vm0, %v1541_v45 }
  0x77   : > { %282 = vrot.lane.b32.xlu1 %v2197_v49, %s1903_s4  ;;  %260 = vrot.lane.b32.xlu0 %v2056_v16, %s1903_s4  ;;  %v1525_v16 = vld [vmem:[%s2029_s21 + $0xe1] sm:$0xff] }
  0x7b   : > { %707 = vrot.lane.b32.xlu1 %v1509_v29, %s1902_s29  ;;  %685 = vrot.lane.b32.xlu0 %v2200_v50, %s1902_s29 }
  0x7f   : > { %379 = vrot.lane.b32.xlu1 %v1489_v21, %s1902_s29  ;;  %357 = vrot.lane.b32.xlu0 %v2097_v26, %s1902_s29  ;;  %v1534_v26 = vld [vmem:[%s2029_s21 + $0x92] sm:$0xff]  ;;  %v949_v21 = vld [vmem:[%s2843_s1 + $0x100] sm:$0xff] }
  0x80   : > { %861 = vst.msk [vmem:[#allocation2 + $0xd0] sm:$0xff] %vm203_vm0, %v1534_v26 }
  0x83   : > { %803 = vrot.lane.b32.xlu1 %v1525_v16, %s1904_s8  ;;  %781 = vrot.lane.b32.xlu0 %v2207_v51, %s1904_s8 }
  0x87   : > { %479 = vrot.lane.b32.xlu1 %v1507_v28, %s1904_s8  ;;  %457 = vrot.lane.b32.xlu0 %v2113_v30, %s1904_s8  ;;  %v1536_v30 = vld [vmem:[%s2029_s21 + $0xaa] sm:$0xff] }
  0x88   : > { %863 = vst.msk [vmem:[#allocation2 + $0x100] sm:$0xff] %vm203_vm0, %v1536_v30  ;;  %v895_v27 = vld [vmem:[#allocation2 + $0xd0] sm:$0xff] }
  0x8b   : > { %588 = vrot.lane.b32.xlu0 %v2210_v52, %s1903_s4  ;;  %262 = vrot.lane.b32.xlu1 %v2079_v22, %s1903_s4  ;;  %v1537_v22 = vld [vmem:[%s2029_s21 + $0xb2] sm:$0xff] }
  0x8c   : > { %864 = vst.msk [vmem:[#allocation2 + $0x118] sm:$0xff] %vm203_vm0, %v1537_v22 }
  0x8f   : > { %687 = vrot.lane.b32.xlu0 %v2220_v54, %s1902_s29  ;;  %359 = vrot.lane.b32.xlu1 %v2143_v37, %s1902_s29 }
  0x91   : > { %v678_v32 = vpop.permute.xlu1 %677  ;;  %v579_v34 = vpop.permute.xlu0 %578 }
  0x92   : > { %626 = vst.msk [vmem:[#allocation2 + $0x8] sm:$0xff] %vm300_vm1, %v579_v34 }
  0x93   : > { %783 = vrot.lane.b32.xlu0 %v2223_v55, %s1904_s8  ;;  %459 = vrot.lane.b32.xlu1 %v2169_v43, %s1904_s8  ;;  %725 = vst.msk [vmem:[#allocation2 + $0x8] sm:$0xff] %vm397_vm2, %v678_v32 }
  0x95   : > { %v350_v37 = vpop.permute.xlu1 %349  ;;  %v253_v38 = vpop.permute.xlu0 %252 }
  0x96   : > { %301 = vst.msk [vmem:[#allocation2] sm:$0xff] %vm300_vm1, %v253_v38 }
  0x97   : > { %590 = vrot.lane.b32.xlu0 %v2235_v57, %s1903_s4  ;;  %264 = vrot.lane.b32.xlu1 %v2129_v33, %s1903_s4  ;;  %398 = vst.msk [vmem:[#allocation2] sm:$0xff] %vm397_vm2, %v350_v37 }
  0x99   : > { %v450_v41 = vpop.permute.xlu1 %449  ;;  %v774_v43 = vpop.permute.xlu0 %773 }
  0x9a   : > { %498 = vst.msk [vmem:[#allocation2] sm:$0xff] %vm497_vm3, %v450_v41  ;;  %821 = vst.msk [vmem:[#allocation2 + $0x8] sm:$0xff] %vm497_vm3, %v774_v43 }
  0x9b   : > { %689 = vrot.lane.b32.xlu0 %v2248_v60, %s1902_s29  ;;  %361 = vrot.lane.b32.xlu1 %v2186_v46, %s1902_s29 }
  0x9d   : > { %v603_v33 = vpop.permute.xlu1 %602  ;;  %v581_v47 = vpop.permute.xlu0 %580 }
  0x9e   : > { %638 = vst.msk [vmem:[#allocation2 + $0x128] sm:$0xff] %vm300_vm1, %v603_v33  ;;  %627 = vst.msk [vmem:[#allocation2 + $0x20] sm:$0xff] %vm300_vm1, %v581_v47 }
  0x9f   : > { %785 = vrot.lane.b32.xlu0 %v2256_v62, %s1904_s8  ;;  %461 = vrot.lane.b32.xlu1 %v2200_v50, %s1904_s8 }
  0xa1   : > { %v277_v48 = vpop.permute.xlu1 %276  ;;  %v255_v53 = vpop.permute.xlu0 %254  ;;  %v2470_v56 = vld [vmem:[#allocation2 + $0x8] sm:$0xff]  ;;  %v869_v58 = vld [vmem:[#allocation2] sm:$0xff] }
  0xa2   : > { %313 = vst.msk [vmem:[#allocation2 + $0x120] sm:$0xff] %vm300_vm1, %v277_v48  ;;  %302 = vst.msk [vmem:[#allocation2 + $0x18] sm:$0xff] %vm300_vm1, %v255_v53  ;;  %1072 = vmatprep.mubr.f32.mxu0 %v2470_v56 }
  0xa3   : > { %592 = vrot.lane.b32.xlu0 %v2284_v5, %s1903_s4  ;;  %1073 = vmatmul.mubr.f32.vlgmr.msra.gmra.mxu0 %v869_v58 }
  0xa4   : > { %266 = vrot.lane.b32.xlu1 %v2172_v44, %s1903_s4 }
  0xa5   : > { %v702_v46 = vpop.permute.xlu1 %701  ;;  %v680_v50 = vpop.permute.xlu0 %679 }
  0xa6   : > { %737 = vst.msk [vmem:[#allocation2 + $0x128] sm:$0xff] %vm397_vm2, %v702_v46  ;;  %726 = vst.msk [vmem:[#allocation2 + $0x20] sm:$0xff] %vm397_vm2, %v680_v50 }
  0xa7   : > { %691 = vrot.lane.b32.xlu0 %v2287_v6, %s1902_s29 }
  0xa8   : > { %363 = vrot.lane.b32.xlu1 %v2210_v52, %s1902_s29 }
  0xa9   : > { %v374_v59 = vpop.permute.xlu1 %373  ;;  %v352_v61 = vpop.permute.xlu0 %351 }
  0xaa   : > { %410 = vst.msk [vmem:[#allocation2 + $0x120] sm:$0xff] %vm397_vm2, %v374_v59  ;;  %399 = vst.msk [vmem:[#allocation2 + $0x18] sm:$0xff] %vm397_vm2, %v352_v61  ;;  %v871_v59 = vld [vmem:[#allocation2 + $0x10] sm:$0xff] }
  0xab   : > { %787 = vrot.lane.b32.xlu0 %v2290_v7, %s1904_s8 }
  0xac   : > { %463 = vrot.lane.b32.xlu1 %v2220_v54, %s1904_s8 }
  0xad   : > { %v798_v44 = vpop.permute.xlu1 %797  ;;  %v776_v0 = vpop.permute.xlu0 %775 }
  0xae   : > { %833 = vst.msk [vmem:[#allocation2 + $0x128] sm:$0xff] %vm497_vm3, %v798_v44  ;;  %822 = vst.msk [vmem:[#allocation2 + $0x20] sm:$0xff] %vm497_vm3, %v776_v0 }
  0xaf   : > { %594 = vrot.lane.b32.xlu0 %v2296_v11, %s1903_s4 }
  0xb0   : > { %268 = vrot.lane.b32.xlu1 %v2207_v51, %s1903_s4  ;;  %v1470_v51 = vld [vmem:[%s2029_s21 + $0x91] sm:$0xff]  ;;  %s175_s21 = sand.u32 1, %s1876_s13  }
  0xb1   : > { %v474_v52 = vpop.permute.xlu1 %473  ;;  %v452_v1 = vpop.permute.xlu0 %451  ;;  %540 = vst.msk [vmem:[#allocation2 + $0xf8] sm:$0xff] %vm203_vm0, %v1470_v51  ;;  %s2791_s15 = scalar_lea.sflag [#allocation4], %s175_s21 }
  0xb2   : > { %510 = vst.msk [vmem:[#allocation2 + $0x120] sm:$0xff] %vm497_vm3, %v474_v52  ;;  %499 = vst.msk [vmem:[#allocation2 + $0x18] sm:$0xff] %vm497_vm3, %v452_v1  ;;  %v874_v1 = vld [vmem:[#allocation2 + $0x28] sm:$0xff] }
  0xb3   : > { %693 = vrot.lane.b32.xlu0 %v2268_v2, %s1902_s29 }
  0xb4   : > { %365 = vrot.lane.b32.xlu1 %v2235_v57, %s1902_s29 }
  0xb5   : > { %v605_v54 = vpop.permute.xlu1 %604  ;;  %v583_v3 = vpop.permute.xlu0 %582  ;;  %v2503_v4 = vld [vmem:[#allocation2 + $0x20] sm:$0xff]  ;;  %v2505_v8 = vld [vmem:[#allocation2 + $0x128] sm:$0xff] }
  0xb6   : > { %639 = vst.msk [vmem:[#allocation2 + $0x140] sm:$0xff] %vm300_vm1, %v605_v54  ;;  %628 = vst.msk [vmem:[#allocation2 + $0x38] sm:$0xff] %vm300_vm1, %v583_v3  ;;  %1077 = vmatprep.mubr.f32.mxu0 %v2503_v4  ;;  %1132 = vmatprep.mubr.f32.mxu1 %v2505_v8  ;;  %v877_v54 = vld [vmem:[#allocation2 + $0x40] sm:$0xff] }
  0xb7   : > { %789 = vrot.lane.b32.xlu0 %v2166_v42, %s1904_s8  ;;  %v950_v42 = vld [vmem:[%s2843_s1 + $0x108] sm:$0xff] }
  0xb8   : > { %465 = vrot.lane.b32.xlu1 %v2248_v60, %s1904_s8 }
  0xb9   : > { %v279_v57 = vpop.permute.xlu1 %278  ;;  %v257_v12 = vpop.permute.xlu0 %256  ;;  %v872_v13 = vld [vmem:[#allocation2 + $0x18] sm:$0xff]  ;;  %v905_v14 = vld [vmem:[#allocation2 + $0x120] sm:$0xff] }
  0xba   : > { %314 = vst.msk [vmem:[#allocation2 + $0x138] sm:$0xff] %vm300_vm1, %v279_v57  ;;  %303 = vst.msk [vmem:[#allocation2 + $0x30] sm:$0xff] %vm300_vm1, %v257_v12  ;;  %1078 = vmatmul.mubr.f32.gmra.mxu0 %v872_v13  ;;  %1133 = vmatmul.mubr.f32.vlgmr.msra.gmra.mxu1 %v905_v14  ;;  %v880_v57 = vld [vmem:[#allocation2 + $0x58] sm:$0xff]  ;;  %v883_v12 = vld [vmem:[#allocation2 + $0x70] sm:$0xff] }
  0xbb   : > { %596 = vrot.lane.b32.xlu0 %v2327_v19, %s1903_s4  ;;  %1668 = vmatpush3.msra.mxu1 %v2411_v18 }
  0xbc   : > { %270 = vrot.lane.b32.xlu1 %v2223_v55, %s1903_s4  ;;  %1669 = vmatprep.subr.mxu1 %v951_v17 }
  0xbd   : > { %v704_v60 = vpop.permute.xlu1 %703  ;;  %v682_v20 = vpop.permute.xlu0 %681  ;;  %1670 = vmatpush3.msra.mxu1 %v951_v17  ;;  %v886_v17 = vld [vmem:[#allocation2 + $0x88] sm:$0xff] }
  0xbe   : > { %738 = vst.msk [vmem:[#allocation2 + $0x140] sm:$0xff] %vm397_vm2, %v704_v60  ;;  %727 = vst.msk [vmem:[#allocation2 + $0x38] sm:$0xff] %vm397_vm2, %v682_v20  ;;  %1671 = vmatprep.subr.mxu1 %v950_v42 }
  0xbf   : > { %695 = vrot.lane.b32.xlu0 %v2319_v15, %s1902_s29  ;;  %1672 = vmatpush3.msra.mxu1 %v950_v42  ;;  %v889_v42 = vld [vmem:[#allocation2 + $0xa0] sm:$0xff] }
  0xc0   : > { %367 = vrot.lane.b32.xlu1 %v2284_v5, %s1902_s29  ;;  %1673 = vmatprep.subr.mxu1 %v949_v21 }
  0xc1   : > { %v376_v55 = vpop.permute.xlu1 %375  ;;  %v354_v28 = vpop.permute.xlu0 %353  ;;  %1674 = vmatpush3.msra.mxu1 %v949_v21 }
  0xc2   : > { %411 = vst.msk [vmem:[#allocation2 + $0x138] sm:$0xff] %vm397_vm2, %v376_v55  ;;  %400 = vst.msk [vmem:[#allocation2 + $0x30] sm:$0xff] %vm397_vm2, %v354_v28  ;;  %v892_v28 = vld [vmem:[#allocation2 + $0xb8] sm:$0xff] }
  0xc3   : > { %791 = vrot.lane.b32.xlu0 %v2347_v25, %s1904_s8 }
  0xc4   : > { %467 = vrot.lane.b32.xlu1 %v2287_v6, %s1904_s8 }
  0xc5   : > { %v800_v10 = vpop.permute.xlu1 %799  ;;  %v778_v9 = vpop.permute.xlu0 %777 }
  0xc6   : > { %834 = vst.msk [vmem:[#allocation2 + $0x140] sm:$0xff] %vm497_vm3, %v800_v10  ;;  %823 = vst.msk [vmem:[#allocation2 + $0x38] sm:$0xff] %vm497_vm3, %v778_v9 }
  0xc7   : > { %598 = vrot.lane.b32.xlu0 %v2261_v63, %s1903_s4 }
  0xc8   : > { %272 = vrot.lane.b32.xlu1 %v2256_v62, %s1903_s4 }
  0xc9   : > { %v476_v5 = vpop.permute.xlu1 %475  ;;  %v454_v25 = vpop.permute.xlu0 %453 }
  0xca   : > { %511 = vst.msk [vmem:[#allocation2 + $0x138] sm:$0xff] %vm497_vm3, %v476_v5  ;;  %500 = vst.msk [vmem:[#allocation2 + $0x30] sm:$0xff] %vm497_vm3, %v454_v25  ;;  %v898_v5 = vld [vmem:[#allocation2 + $0xe8] sm:$0xff]  ;;  %v901_v25 = vld [vmem:[#allocation2 + $0x100] sm:$0xff] }
  0xcb   : > { %697 = vrot.lane.b32.xlu0 %v2084_v23, %s1902_s29 }
  0xcc   : > { %369 = vrot.lane.b32.xlu1 %v2296_v11, %s1902_s29 }
  0xcd   : > { %v607_v6 = vpop.permute.xlu1 %606  ;;  %v585_v29 = vpop.permute.xlu0 %584  ;;  %v2559_v18 = vld [vmem:[#allocation2 + $0x38] sm:$0xff]  ;;  %v2561_v63 = vld [vmem:[#allocation2 + $0x140] sm:$0xff] }
  0xce   : > { %640 = vst.msk [vmem:[#allocation2 + $0x158] sm:$0xff] %vm300_vm1, %v607_v6  ;;  %629 = vst.msk [vmem:[#allocation2 + $0x50] sm:$0xff] %vm300_vm1, %v585_v29  ;;  %1082 = vmatprep.mubr.f32.mxu0 %v2559_v18  ;;  %1137 = vmatprep.mubr.f32.mxu1 %v2561_v63 }
  0xcf   : > { %793 = vrot.lane.b32.xlu0 %v2153_v39, %s1904_s8 }
  0xd0   : > { %469 = vrot.lane.b32.xlu1 %v2268_v2, %s1904_s8 }
  0xd1   : > { %v281_v23 = vpop.permute.xlu1 %280  ;;  %v259_v62 = vpop.permute.xlu0 %258  ;;  %v875_v11 = vld [vmem:[#allocation2 + $0x30] sm:$0xff]  ;;  %v908_v16 = vld [vmem:[#allocation2 + $0x138] sm:$0xff] }
  0xd2   : > { %315 = vst.msk [vmem:[#allocation2 + $0x150] sm:$0xff] %vm300_vm1, %v281_v23  ;;  %304 = vst.msk [vmem:[#allocation2 + $0x48] sm:$0xff] %vm300_vm1, %v259_v62  ;;  %1083 = vmatmul.mubr.f32.gmra.mxu0 %v875_v11  ;;  %1138 = vmatmul.mubr.f32.gmra.mxu1 %v908_v16  ;;  %v904_v23 = vld [vmem:[#allocation2 + $0x118] sm:$0xff]  ;;  %v907_v62 = vld [vmem:[#allocation2 + $0x130] sm:$0xff] }
  0xd3   : > { %600 = vrot.lane.b32.xlu0 %v2358_v24, %s1903_s4 }
  0xd4   : > { %274 = vrot.lane.b32.xlu1 %v2290_v7, %s1903_s4 }
  0xd5   : > { %v706_v39 = vpop.permute.xlu1 %705  ;;  %v684_v26 = vpop.permute.xlu0 %683 }
  0xd6   : > { %739 = vst.msk [vmem:[#allocation2 + $0x158] sm:$0xff] %vm397_vm2, %v706_v39  ;;  %728 = vst.msk [vmem:[#allocation2 + $0x50] sm:$0xff] %vm397_vm2, %v684_v26 }
  0xd7   : > { %699 = vrot.lane.b32.xlu0 %v2140_v36, %s1902_s29 }
  0xd8   : > { %371 = vrot.lane.b32.xlu1 %v2327_v19, %s1902_s29  ;;  %s1812_s29 = sshll.u32 %s1905_s5, 4  ;;  %s1813_s29 = int_to_ptr.vmem [resolvable:$false] %s1812_s29 }
  0xd9   : > { %v378_v2 = vpop.permute.xlu1 %377  ;;  %v356_v31 = vpop.permute.xlu0 %355  ;;  %s1814_s4 = scalar_lea.vmem %s1813_s29, 4096 }
  0xda   : > { %412 = vst.msk [vmem:[#allocation2 + $0x150] sm:$0xff] %vm397_vm2, %v378_v2  ;;  %401 = vst.msk [vmem:[#allocation2 + $0x48] sm:$0xff] %vm397_vm2, %v356_v31  ;;  %v910_v2 = vld [vmem:[#allocation2 + $0x148] sm:$0xff]  ;;  %v913_v31 = vld [vmem:[#allocation2 + $0x160] sm:$0xff] }
  0xdb   : > { %795 = vrot.lane.b32.xlu0 %v2197_v49, %s1904_s8 }
  0xdc   : > { %471 = vrot.lane.b32.xlu1 %v2319_v15, %s1904_s8  ;;  %s1438_s8 = sshll.u32 %s175_s21, 7 }
  0xdd   : > { %v802_v7 = vpop.permute.xlu1 %801  ;;  %v780_v24 = vpop.permute.xlu0 %779  ;;  %s2712_s6 = scalar_lea.vmem [#allocation3], %s1438_s8 }
  0xde   : > { %835 = vst.msk [vmem:[#allocation2 + $0x158] sm:$0xff] %vm497_vm3, %v802_v7  ;;  %824 = vst.msk [vmem:[#allocation2 + $0x50] sm:$0xff] %vm497_vm3, %v780_v24  ;;  %s1347_s20 = sshll.u32 %s2712_s6, 4  ;;  %s2784_s20 = int_to_ptr.vmem [resolvable:$true] %s1347_s20 }
  0xdf   : > { %s1808_s16 = scalar_lea.vmem %s2784_s20, 2048  ;;  %p1815_p2 = scmp.lt.s32.totalorder %s2784_s20, %s1813_s29 }
  0xe0   : > { %p1809_p13 = scmp.ne.s32.totalorder %s2784_s20, %s1808_s16  ;;  %p1816_p4 = scmp.lt.s32.totalorder %s1814_s4, %s1808_s16 }
  0xe1   : > { %v478_v36 = vpop.permute.xlu1 %477  ;;  %v456_v19 = vpop.permute.xlu0 %455 }
  0xe2   : > { %512 = vst.msk [vmem:[#allocation2 + $0x150] sm:$0xff] %vm497_vm3, %v478_v36  ;;  %501 = vst.msk [vmem:[#allocation2 + $0x48] sm:$0xff] %vm497_vm3, %v456_v19  ;;  %v916_v36 = vld [vmem:[#allocation2 + $0x178] sm:$0xff]  ;;  %p1810_p0 = pnand %p1809_p13, %p1979_p3  ;;  %p1817_p5 = por %p1816_p4, %p1815_p2 }
  0xe4   : > { %p1811_p1 = pneg %p1810_p0 }
  0xe5   : > { %v609_v30 = vpop.permute.xlu1 %608  ;;  %v587_v32 = vpop.permute.xlu0 %586  ;;  %v2593_v34 = vld [vmem:[#allocation2 + $0x50] sm:$0xff]  ;;  %v2595_v49 = vld [vmem:[#allocation2 + $0x158] sm:$0xff] }
  0xe6   : > { %641 = vst.msk [vmem:[#allocation2 + $0x170] sm:$0xff] %vm300_vm1, %v609_v30  ;;  %630 = vst.msk [vmem:[#allocation2 + $0x68] sm:$0xff] %vm300_vm1, %v587_v32  ;;  %1087 = vmatprep.mubr.f32.mxu0 %v2593_v34  ;;  %1142 = vmatprep.mubr.f32.mxu1 %v2595_v49  ;;  %p1818_p6 = pnand %p1817_p5, %p1811_p1 }
  0xe9   : > { %v283_v15 = vpop.permute.xlu1 %282  ;;  %v261_v22 = vpop.permute.xlu0 %260  ;;  %v878_v35 = vld [vmem:[#allocation2 + $0x48] sm:$0xff]  ;;  %v911_v37 = vld [vmem:[#allocation2 + $0x150] sm:$0xff] }
  0xea   : > { %316 = vst.msk [vmem:[#allocation2 + $0x168] sm:$0xff] %vm300_vm1, %v283_v15  ;;  %305 = vst.msk [vmem:[#allocation2 + $0x60] sm:$0xff] %vm300_vm1, %v261_v22  ;;  %1088 = vmatmul.mubr.f32.gmra.mxu0 %v878_v35  ;;  %1143 = vmatmul.mubr.f32.gmra.mxu1 %v911_v37 }
  0xed   : > { %v708_v38 = vpop.permute.xlu1 %707  ;;  %v686_v40 = vpop.permute.xlu0 %685 }
  0xee   : > { %740 = vst.msk [vmem:[#allocation2 + $0x170] sm:$0xff] %vm397_vm2, %v708_v38  ;;  %729 = vst.msk [vmem:[#allocation2 + $0x68] sm:$0xff] %vm397_vm2, %v686_v40 }
  0xf1   : > { %v380_v41 = vpop.permute.xlu1 %379  ;;  %v358_v43 = vpop.permute.xlu0 %357 }
  0xf2   : > { %413 = vst.msk [vmem:[#allocation2 + $0x168] sm:$0xff] %vm397_vm2, %v380_v41  ;;  %402 = vst.msk [vmem:[#allocation2 + $0x60] sm:$0xff] %vm397_vm2, %v358_v43 }
  0xf5   : > { %v804_v45 = vpop.permute.xlu1 %803  ;;  %v782_v33 = vpop.permute.xlu0 %781 }
  0xf6   : > { %836 = vst.msk [vmem:[#allocation2 + $0x170] sm:$0xff] %vm497_vm3, %v804_v45  ;;  %825 = vst.msk [vmem:[#allocation2 + $0x68] sm:$0xff] %vm497_vm3, %v782_v33 }
  0xf9   : > { %v480_v47 = vpop.permute.xlu1 %479  ;;  %v458_v48 = vpop.permute.xlu0 %457 }
  0xfa   : > { %513 = vst.msk [vmem:[#allocation2 + $0x168] sm:$0xff] %vm497_vm3, %v480_v47  ;;  %502 = vst.msk [vmem:[#allocation2 + $0x60] sm:$0xff] %vm497_vm3, %v458_v48 }
  0xfd   : > { %v589_v53 = vpop.permute.xlu0 %588  ;;  %v263_v58 = vpop.permute.xlu1 %262  ;;  %v2611_v46 = vld [vmem:[#allocation2 + $0x68] sm:$0xff]  ;;  %v2613_v50 = vld [vmem:[#allocation2 + $0x170] sm:$0xff] }
  0xfe   : > { %631 = vst.msk [vmem:[#allocation2 + $0x80] sm:$0xff] %vm300_vm1, %v589_v53  ;;  %306 = vst.msk [vmem:[#allocation2 + $0x78] sm:$0xff] %vm300_vm1, %v263_v58  ;;  %1092 = vmatprep.mubr.f32.mxu0 %v2611_v46  ;;  %1147 = vmatprep.mubr.f32.mxu1 %v2613_v50 }
 0x101   : > { %v688_v61 = vpop.permute.xlu0 %687  ;;  %v360_v44 = vpop.permute.xlu1 %359  ;;  %v881_v0 = vld [vmem:[#allocation2 + $0x60] sm:$0xff]  ;;  %v914_v52 = vld [vmem:[#allocation2 + $0x168] sm:$0xff] }
 0x102   : > { %730 = vst.msk [vmem:[#allocation2 + $0x80] sm:$0xff] %vm397_vm2, %v688_v61  ;;  %403 = vst.msk [vmem:[#allocation2 + $0x78] sm:$0xff] %vm397_vm2, %v360_v44  ;;  %1093 = vmatmul.mubr.f32.gmra.mxu0 %v881_v0  ;;  %1148 = vmatmul.mubr.f32.gmra.mxu1 %v914_v52 }
 0x103   : > { %1675 = vmatprep.mubr.msk.f32.mxu1 %vm203_vm0, %v871_v59 }
 0x105   : > { %v784_v3 = vpop.permute.xlu0 %783  ;;  %v460_v51 = vpop.permute.xlu1 %459 }
 0x106   : > { %826 = vst.msk [vmem:[#allocation2 + $0x80] sm:$0xff] %vm497_vm3, %v784_v3  ;;  %503 = vst.msk [vmem:[#allocation2 + $0x78] sm:$0xff] %vm497_vm3, %v460_v51  ;;  %1676 = vmatmul.mubr.msk.f32.vlgmr.msra.gmra.mxu1 %vm203_vm0, %v874_v1 }
 0x107   : > { %1678 = vmatprep.mubr.msk.f32.mxu1 %vm203_vm0, %v877_v54 }
 0x109   : > { %v591_v13 = vpop.permute.xlu0 %590  ;;  %v265_v14 = vpop.permute.xlu1 %264 }
 0x10a   : > { %632 = vst.msk [vmem:[#allocation2 + $0x98] sm:$0xff] %vm300_vm1, %v591_v13  ;;  %307 = vst.msk [vmem:[#allocation2 + $0x90] sm:$0xff] %vm300_vm1, %v265_v14  ;;  %1679 = vmatmul.mubr.msk.f32.gmra.mxu1 %vm203_vm0, %v880_v57 }
 0x10b   : > { %1681 = vmatprep.mubr.msk.f32.mxu1 %vm203_vm0, %v883_v12 }
 0x10d   : > { %v690_v60 = vpop.permute.xlu0 %689  ;;  %v362_v20 = vpop.permute.xlu1 %361  ;;  %v2630_v21 = vld [vmem:[#allocation2 + $0x80] sm:$0xff]  ;;  %v884_v55 = vld [vmem:[#allocation2 + $0x78] sm:$0xff] }
 0x10e   : > { %731 = vst.msk [vmem:[#allocation2 + $0x98] sm:$0xff] %vm397_vm2, %v690_v60  ;;  %404 = vst.msk [vmem:[#allocation2 + $0x90] sm:$0xff] %vm397_vm2, %v362_v20  ;;  %1097 = vmatprep.mubr.f32.mxu0 %v2630_v21  ;;  %1682 = vmatmul.mubr.msk.f32.gmra.mxu1 %vm203_vm0, %v886_v17 }
 0x10f   : > { %1098 = vmatmul.mubr.f32.gmra.mxu0 %v884_v55  ;;  %1684 = vmatprep.mubr.msk.f32.mxu1 %vm203_vm0, %v889_v42 }
 0x111   : > { %v786_v10 = vpop.permute.xlu0 %785  ;;  %v462_v9 = vpop.permute.xlu1 %461 }
 0x112   : > { %827 = vst.msk [vmem:[#allocation2 + $0x98] sm:$0xff] %vm497_vm3, %v786_v10  ;;  %504 = vst.msk [vmem:[#allocation2 + $0x90] sm:$0xff] %vm497_vm3, %v462_v9  ;;  %1685 = vmatmul.mubr.msk.f32.gmra.mxu1 %vm203_vm0, %v892_v28 }
 0x113   : > { %1687 = vmatprep.mubr.msk.f32.mxu1 %vm203_vm0, %v895_v27 }
 0x115   : > { %v593_v6 = vpop.permute.xlu0 %592 }
 0x116   : > { %633 = vst.msk [vmem:[#allocation2 + $0xb0] sm:$0xff] %vm300_vm1, %v593_v6  ;;  %v267_v29 = vpop.permute.xlu1 %266  ;;  %1688 = vmatmul.mubr.msk.f32.gmra.mxu1 %vm203_vm0, %v898_v5 }
 0x117   : > { %308 = vst.msk [vmem:[#allocation2 + $0xa8] sm:$0xff] %vm300_vm1, %v267_v29  ;;  %1690 = vmatprep.mubr.msk.f32.mxu1 %vm203_vm0, %v901_v25 }
 0x119   : > { %v692_v11 = vpop.permute.xlu0 %691  ;;  %v2645_v16 = vld [vmem:[#allocation2 + $0x98] sm:$0xff]  ;;  %v887_v39 = vld [vmem:[#allocation2 + $0x90] sm:$0xff] }
 0x11a   : > { %732 = vst.msk [vmem:[#allocation2 + $0xb0] sm:$0xff] %vm397_vm2, %v692_v11  ;;  %v364_v26 = vpop.permute.xlu1 %363  ;;  %1102 = vmatprep.mubr.f32.mxu0 %v2645_v16  ;;  %1691 = vmatmul.mubr.msk.f32.gmra.mxu1 %vm203_vm0, %v904_v23 }
 0x11b   : > { %405 = vst.msk [vmem:[#allocation2 + $0xa8] sm:$0xff] %vm397_vm2, %v364_v26  ;;  %1103 = vmatmul.mubr.f32.gmra.mxu0 %v887_v39  ;;  %1693 = vmatprep.mubr.msk.f32.mxu1 %vm203_vm0, %v907_v62 }
 0x11d   : > { %v788_v7 = vpop.permute.xlu0 %787 }
 0x11e   : > { %828 = vst.msk [vmem:[#allocation2 + $0xb0] sm:$0xff] %vm497_vm3, %v788_v7  ;;  %v464_v24 = vpop.permute.xlu1 %463  ;;  %1694 = vmatmul.mubr.msk.f32.gmra.mxu1 %vm203_vm0, %v910_v2 }
 0x11f   : > { %505 = vst.msk [vmem:[#allocation2 + $0xa8] sm:$0xff] %vm497_vm3, %v464_v24  ;;  %1696 = vmatprep.mubr.msk.f32.mxu1 %vm203_vm0, %v913_v31 }
 0x121   : > { %v595_v19 = vpop.permute.xlu0 %594 }
 0x122   : > { %634 = vst.msk [vmem:[#allocation2 + $0xc8] sm:$0xff] %vm300_vm1, %v595_v19  ;;  %v269_v30 = vpop.permute.xlu1 %268  ;;  %1697 = vmatmul.mubr.msk.f32.gmra.mxu1 %vm203_vm0, %v916_v36  ;;  %v2704_v19 = vld [vmem:[%s2844_s2] ss:$0 sm:$0xff] }
 0x123   : > { %309 = vst.msk [vmem:[#allocation2 + $0xc0] sm:$0xff] %vm300_vm1, %v269_v30 }
 0x125   : > { %v694_v32 = vpop.permute.xlu0 %693  ;;  %v2659_v15 = vld [vmem:[#allocation2 + $0xb0] sm:$0xff] }
 0x126   : > { %733 = vst.msk [vmem:[#allocation2 + $0xc8] sm:$0xff] %vm397_vm2, %v694_v32  ;;  %v366_v22 = vpop.permute.xlu1 %365  ;;  %1107 = vmatprep.mubr.f32.mxu0 %v2659_v15  ;;  %v890_v35 = vld [vmem:[#allocation2 + $0xa8] sm:$0xff] }
 0x127   : > { %406 = vst.msk [vmem:[#allocation2 + $0xc0] sm:$0xff] %vm397_vm2, %v366_v22  ;;  %1108 = vmatmul.mubr.f32.gmra.mxu0 %v890_v35 }
 0x129   : > { %v790_v37 = vpop.permute.xlu0 %789 }
 0x12a   : > { %829 = vst.msk [vmem:[#allocation2 + $0xc8] sm:$0xff] %vm497_vm3, %v790_v37  ;;  %v466_v38 = vpop.permute.xlu1 %465 }
 0x12b   : > { %506 = vst.msk [vmem:[#allocation2 + $0xc0] sm:$0xff] %vm497_vm3, %v466_v38 }
 0x12d   : > { %v597_v40 = vpop.permute.xlu0 %596 }
 0x12e   : > { %635 = vst.msk [vmem:[#allocation2 + $0xe0] sm:$0xff] %vm300_vm1, %v597_v40  ;;  %v271_v41 = vpop.permute.xlu1 %270 }
 0x12f   : > { %310 = vst.msk [vmem:[#allocation2 + $0xd8] sm:$0xff] %vm300_vm1, %v271_v41 }
 0x131   : > { %v696_v43 = vpop.permute.xlu0 %695  ;;  %v2668_v45 = vld [vmem:[#allocation2 + $0xc8] sm:$0xff] }
 0x132   : > { %734 = vst.msk [vmem:[#allocation2 + $0xe0] sm:$0xff] %vm397_vm2, %v696_v43  ;;  %v368_v33 = vpop.permute.xlu1 %367  ;;  %1112 = vmatprep.mubr.f32.mxu0 %v2668_v45  ;;  %v893_v47 = vld [vmem:[#allocation2 + $0xc0] sm:$0xff] }
 0x133   : > { %407 = vst.msk [vmem:[#allocation2 + $0xd8] sm:$0xff] %vm397_vm2, %v368_v33  ;;  %1113 = vmatmul.mubr.f32.gmra.mxu0 %v893_v47 }
 0x135   : > { %v792_v48 = vpop.permute.xlu0 %791 }
 0x136   : > { %830 = vst.msk [vmem:[#allocation2 + $0xe0] sm:$0xff] %vm497_vm3, %v792_v48  ;;  %v468_v53 = vpop.permute.xlu1 %467 }
 0x137   : > { %507 = vst.msk [vmem:[#allocation2 + $0xd8] sm:$0xff] %vm497_vm3, %v468_v53 }
 0x139   : > { %v599_v58 = vpop.permute.xlu0 %598 }
 0x13a   : > { %636 = vst.msk [vmem:[#allocation2 + $0xf8] sm:$0xff] %vm300_vm1, %v599_v58  ;;  %v273_v59 = vpop.permute.xlu1 %272 }
 0x13b   : > { %311 = vst.msk [vmem:[#allocation2 + $0xf0] sm:$0xff] %vm300_vm1, %v273_v59 }
 0x13d   : > { %v698_v61 = vpop.permute.xlu0 %697  ;;  %v2677_v44 = vld [vmem:[#allocation2 + $0xe0] sm:$0xff] }
 0x13e   : > { %735 = vst.msk [vmem:[#allocation2 + $0xf8] sm:$0xff] %vm397_vm2, %v698_v61  ;;  %v370_v0 = vpop.permute.xlu1 %369  ;;  %1117 = vmatprep.mubr.f32.mxu0 %v2677_v44  ;;  %v896_v52 = vld [vmem:[#allocation2 + $0xd8] sm:$0xff] }
 0x13f   : > { %408 = vst.msk [vmem:[#allocation2 + $0xf0] sm:$0xff] %vm397_vm2, %v370_v0  ;;  %1118 = vmatmul.mubr.f32.gmra.mxu0 %v896_v52 }
 0x141   : > { %v794_v1 = vpop.permute.xlu0 %793 }
 0x142   : > { %831 = vst.msk [vmem:[#allocation2 + $0xf8] sm:$0xff] %vm497_vm3, %v794_v1  ;;  %v470_v54 = vpop.permute.xlu1 %469 }
 0x143   : > { %508 = vst.msk [vmem:[#allocation2 + $0xf0] sm:$0xff] %vm497_vm3, %v470_v54 }
 0x145   : > { %v601_v3 = vpop.permute.xlu0 %600 }
 0x146   : > { %637 = vst.msk [vmem:[#allocation2 + $0x110] sm:$0xff] %vm300_vm1, %v601_v3  ;;  %v275_v51 = vpop.permute.xlu1 %274 }
 0x147   : > { %312 = vst.msk [vmem:[#allocation2 + $0x108] sm:$0xff] %vm300_vm1, %v275_v51 }
 0x149   : > { %v700_v57 = vpop.permute.xlu0 %699  ;;  %v2686_v12 = vld [vmem:[#allocation2 + $0xf8] sm:$0xff] }
 0x14a   : > { %736 = vst.msk [vmem:[#allocation2 + $0x110] sm:$0xff] %vm397_vm2, %v700_v57  ;;  %v372_v13 = vpop.permute.xlu1 %371  ;;  %1122 = vmatprep.mubr.f32.mxu0 %v2686_v12  ;;  %v899_v14 = vld [vmem:[#allocation2 + $0xf0] sm:$0xff] }
 0x14b   : > { %409 = vst.msk [vmem:[#allocation2 + $0x108] sm:$0xff] %vm397_vm2, %v372_v13  ;;  %1123 = vmatmul.mubr.f32.gmra.mxu0 %v899_v14 }
 0x14d   : > { %v796_v17 = vpop.permute.xlu0 %795 }
 0x14e   : > { %832 = vst.msk [vmem:[#allocation2 + $0x110] sm:$0xff] %vm497_vm3, %v796_v17  ;;  %v472_v42 = vpop.permute.xlu1 %471 }
 0x14f   : > { %509 = vst.msk [vmem:[#allocation2 + $0x108] sm:$0xff] %vm497_vm3, %v472_v42 }
 0x155   : > { %v2693_v60 = vld [vmem:[#allocation2 + $0x110] sm:$0xff] }
 0x156   : > { %1127 = vmatprep.mubr.f32.mxu0 %v2693_v60  ;;  %v902_v20 = vld [vmem:[#allocation2 + $0x108] sm:$0xff] }
 0x157   : > { %1128 = vmatmul.mubr.f32.gmra.mxu0 %v902_v20 }
 0x163   : > { %v1599_v55 = vpop.f32.mrf.mxu0 }
 0x165   : > { %v1600_v28 = vpop.f32.mrf.mxu0 }
 0x166   : > { %v1601_v7 = vadd.f32 %v1600_v28, %v1599_v55 }
 0x168   : > { %v1075_v38 = vadd.f32 %v1601_v7, %v2704_v19 }
 0x17a   : > { %v2696_v27 = vpop.f32.mrf.mxu1  ;;  %v1602_v10 = vpop.f32.mrf.mxu0 }
 0x17c   : > { %v1636_v9 = vpop.f32.mrf.mxu1  ;;  %v1603_v5 = vpop.f32.mrf.mxu0 }
 0x17d   : > { %v1604_v26 = vadd.f32 %v1603_v5, %v1602_v10 }
 0x17f   : > { %v1080_v32 = vadd.f32 %v1604_v26, %v2704_v19 }
 0x192   : > { %v1638_v25 = vpop.f32.mrf.mxu1  ;;  %v1605_v6 = vpop.f32.mrf.mxu0 }
 0x194   : > { %v1639_v29 = vpop.f32.mrf.mxu1  ;;  %v1606_v23 = vpop.f32.mrf.mxu0 }
 0x195   : > { %v1607_v35 = vadd.f32 %v1606_v23, %v1605_v6  ;;  %v1640_v5 = vadd.f32 %v1639_v29, %v1638_v25  ;;  %v1637_v23 = vadd.f32 %v1636_v9, %v2696_v27 }
 0x197   : > { %v1085_v61 = vadd.f32 %v1607_v35, %v2704_v19  ;;  %v1140_v7 = vadd.f32 %v1640_v5, %v2704_v19  ;;  %v1135_v25 = vadd.f32 %v1637_v23, %v2704_v19 }
 0x1aa   : > { %v2698_v62 = vpop.f32.mrf.mxu1  ;;  %v1608_v11 = vpop.f32.mrf.mxu0 }
 0x1ac   : > { %v1642_v39 = vpop.f32.mrf.mxu1  ;;  %v1609_v2 = vpop.f32.mrf.mxu0 }
 0x1ad   : > { %v1610_v30 = vadd.f32 %v1609_v2, %v1608_v11 }
 0x1af   : > { %v1090_v47 = vadd.f32 %v1610_v30, %v2704_v19 }
 0x1c2   : > { %v1644_v31 = vpop.f32.mrf.mxu1  ;;  %v1611_v24 = vpop.f32.mrf.mxu0 }
 0x1c4   : > { %v1645_v36 = vpop.f32.mrf.mxu1  ;;  %v1612_v40 = vpop.f32.mrf.mxu0 }
 0x1c5   : > { %v1613_v53 = vadd.f32 %v1612_v40, %v1611_v24 }
 0x1c6   : > { %v1677_v22 = vpop.f32.mrf.mxu1 }
 0x1c7   : > { %v1225_v37 = vadd.f32 %v1677_v22, %v1080_v32  ;;  %v1095_v51 = vadd.f32 %v1613_v53, %v2704_v19  ;;  %v1643_v32 = vadd.f32 %v1642_v39, %v2698_v62 }
 0x1c8   : > { %v1219_v41 = vpop.f32.mrf.mxu1 }
 0x1c9   : > { %v1299_v43 = vadd.f32 %v1225_v37, %v2503_v4  ;;  %v1220_v33 = vadd.f32 %v1219_v41, %v1075_v38  ;;  %v1145_v37 = vadd.f32 %v1643_v32, %v2704_v19 }
 0x1ca   : > { %v1680_v48 = vpop.f32.mrf.mxu1 }
 0x1cb   : > { %1315 = vst.msk [vmem:[%s2712_s6 + $0x8] sm:$0xff] %vm203_vm0, %v1299_v43  ;;  %v1298_v58 = vadd.f32 %v1220_v33, %v2470_v56  ;;  %v1235_v59 = vadd.f32 %v1680_v48, %v1090_v47 }
 0x1cc   : > { %v1229_v0 = vpop.f32.mrf.mxu1 }
 0x1cd   : > { %1314 = vst.msk [vmem:[%s2712_s6] sm:$0xff] %vm203_vm0, %v1298_v58  ;;  %v1301_v4 = vadd.f32 %v1235_v59, %v2593_v34  ;;  %v1230_v52 = vadd.f32 %v1229_v0, %v1085_v61 }
 0x1ce   : > { %v1683_v1 = vpop.f32.mrf.mxu1 }
 0x1cf   : > { %1317 = vst.msk [vmem:[%s2712_s6 + $0x18] sm:$0xff] %vm203_vm0, %v1301_v4  ;;  %v1300_v54 = vadd.f32 %v1230_v52, %v2559_v18  ;;  %v1614_v3 = vpop.f32.mrf.mxu0 }
 0x1d0   : > { %v1239_v56 = vpop.f32.mrf.mxu1 }
 0x1d1   : > { %1316 = vst.msk [vmem:[%s2712_s6 + $0x10] sm:$0xff] %vm203_vm0, %v1300_v54  ;;  %v1240_v57 = vadd.f32 %v1239_v56, %v1095_v51  ;;  %v1615_v13 = vpop.f32.mrf.mxu0 }
 0x1d2   : > { %v1616_v14 = vadd.f32 %v1615_v13, %v1614_v3  ;;  %v1686_v17 = vpop.f32.mrf.mxu1 }
 0x1d3   : > { %v1302_v34 = vadd.f32 %v1240_v57, %v2611_v46  ;;  %v1646_v46 = vadd.f32 %v1645_v36, %v1644_v31 }
 0x1d4   : > { %v1100_v42 = vadd.f32 %v1616_v14, %v2704_v19  ;;  %v1249_v20 = vpop.f32.mrf.mxu1 }
 0x1d5   : > { %1318 = vst.msk [vmem:[%s2712_s6 + $0x20] sm:$0xff] %vm203_vm0, %v1302_v34  ;;  %v1150_v31 = vadd.f32 %v1646_v46, %v2704_v19 }
 0x1d6   : > { %v1245_v55 = vadd.f32 %v1683_v1, %v1100_v42  ;;  %v1689_v18 = vpop.f32.mrf.mxu1 }
 0x1d8   : > { %v1303_v28 = vadd.f32 %v1245_v55, %v2630_v21  ;;  %v1259_v10 = vpop.f32.mrf.mxu1 }
 0x1da   : > { %1319 = vst.msk [vmem:[%s2712_s6 + $0x28] sm:$0xff] %vm203_vm0, %v1303_v28  ;;  %v2734_v6 = vpop.f32.mrf.mxu1 }
 0x1db   : > { %v1617_v11 = vpop.f32.mrf.mxu0 }
 0x1dc   : > { %v1269_v26 = vpop.f32.mrf.mxu1 }
 0x1dd   : > { %v1618_v2 = vpop.f32.mrf.mxu0 }
 0x1de   : > { %v1619_v24 = vadd.f32 %v1618_v2, %v1617_v11  ;;  %v1695_v30 = vpop.f32.mrf.mxu1 }
 0x1df   : > { %v1285_v21 = vadd.f32 %v1695_v30, %v1140_v7 }
 0x1e0   : > { %v1105_v29 = vadd.f32 %v1619_v24, %v2704_v19  ;;  %v1279_v22 = vpop.f32.mrf.mxu1 }
 0x1e1   : > { %v1311_v27 = vadd.f32 %v1285_v21, %v2561_v63  ;;  %v1280_v9 = vadd.f32 %v1279_v22, %v1135_v25 }
 0x1e2   : > { %v1250_v36 = vadd.f32 %v1249_v20, %v1105_v29  ;;  %v1698_v35 = vpop.f32.mrf.mxu1 }
 0x1e3   : > { %1327 = vst.msk [vmem:[%s2712_s6 + $0x68] sm:$0xff] %vm203_vm0, %v1311_v27  ;;  %v1310_v62 = vadd.f32 %v1280_v9, %v2505_v8  ;;  %v1295_v39 = vadd.f32 %v1698_v35, %v1150_v31 }
 0x1e4   : > { %v1304_v38 = vadd.f32 %v1250_v36, %v2645_v16  ;;  %v1289_v40 = vpop.f32.mrf.mxu1 }
 0x1e5   : > { %1326 = vst.msk [vmem:[%s2712_s6 + $0x60] sm:$0xff] %vm203_vm0, %v1310_v62  ;;  %v1313_v63 = vadd.f32 %v1295_v39, %v2613_v50  ;;  %v1290_v41 = vadd.f32 %v1289_v40, %v1145_v37 }
 0x1e6   : > { %1320 = vst.msk [vmem:[%s2712_s6 + $0x30] sm:$0xff] %vm203_vm0, %v1304_v38 }
 0x1e7   : > { %1329 = vst.msk [vmem:[%s2712_s6 + $0x78] sm:$0xff] %vm203_vm0, %v1313_v63  ;;  %v1312_v43 = vadd.f32 %v1290_v41, %v2595_v49  ;;  %v1620_v8 = vpop.f32.mrf.mxu0 }
 0x1e9   : > { %1328 = vst.msk [vmem:[%s2712_s6 + $0x70] sm:$0xff] %vm203_vm0, %v1312_v43  ;;  %v1621_v33 = vpop.f32.mrf.mxu0 }
 0x1ea   : > { %v1622_v47 = vadd.f32 %v1621_v33, %v1620_v8 }
 0x1ec   : > { %v1110_v16 = vadd.f32 %v1622_v47, %v2704_v19 }
 0x1ee   : > { %v1255_v48 = vadd.f32 %v1686_v17, %v1110_v16 }
 0x1f0   : > { %v1305_v53 = vadd.f32 %v1255_v48, %v2659_v15 }
 0x1f2   : > { %1321 = vst.msk [vmem:[%s2712_s6 + $0x38] sm:$0xff] %vm203_vm0, %v1305_v53 }
 0x1f3   : > { %v1623_v50 = vpop.f32.mrf.mxu0 }
 0x1f5   : > { %v1624_v58 = vpop.f32.mrf.mxu0 }
 0x1f6   : > { %v1625_v59 = vadd.f32 %v1624_v58, %v1623_v50 }
 0x1f8   : > { %v1115_v61 = vadd.f32 %v1625_v59, %v2704_v19 }
 0x1fa   : > { %v1260_v0 = vadd.f32 %v1259_v10, %v1115_v61 }
 0x1fc   : > { %v1306_v49 = vadd.f32 %v1260_v0, %v2668_v45 }
 0x1fe   : > { %1322 = vst.msk [vmem:[%s2712_s6 + $0x40] sm:$0xff] %vm203_vm0, %v1306_v49 }
 0x1ff   : > { %v1626_v4 = vpop.f32.mrf.mxu0 }
 0x201   : > { %v1627_v52 = vpop.f32.mrf.mxu0 }
 0x202   : > { %v1628_v1 = vadd.f32 %v1627_v52, %v1626_v4 }
 0x204   : > { %v1120_v15 = vadd.f32 %v1628_v1, %v2704_v19 }
 0x206   : > { %v1265_v54 = vadd.f32 %v1689_v18, %v1120_v15 }
 0x208   : > { %v1307_v3 = vadd.f32 %v1265_v54, %v2677_v44 }
 0x20a   : > { %1323 = vst.msk [vmem:[%s2712_s6 + $0x48] sm:$0xff] %vm203_vm0, %v1307_v3 }
 0x20b   : > { %v1629_v51 = vpop.f32.mrf.mxu0 }
 0x20d   : > { %v1630_v56 = vpop.f32.mrf.mxu0 }
 0x20e   : > { %v1631_v57 = vadd.f32 %v1630_v56, %v1629_v51 }
 0x210   : > { %v1125_v45 = vadd.f32 %v1631_v57, %v2704_v19 }
 0x212   : > { %v1270_v13 = vadd.f32 %v1269_v26, %v1125_v45 }
 0x214   : > { %v1308_v14 = vadd.f32 %v1270_v13, %v2686_v12 }
 0x216   : > { %1324 = vst.msk [vmem:[%s2712_s6 + $0x50] sm:$0xff] %vm203_vm0, %v1308_v14 }
 0x217   : > { %v1632_v17 = vpop.f32.mrf.mxu0 }
 0x219   : > { %v1633_v44 = vpop.f32.mrf.mxu0 }
 0x21a   : > { %v1634_v34 = vadd.f32 %v1633_v44, %v1632_v17 }
 0x21c   : > { %v1130_v42 = vadd.f32 %v1634_v34, %v2704_v19 }
 0x21e   : > { %v1275_v20 = vadd.f32 %v2734_v6, %v1130_v42 }
 0x220   : > { %v1309_v12 = vadd.f32 %v1275_v20, %v2693_v60 }
 0x222   : > { %1325 = vst.msk [vmem:[%s2712_s6 + $0x58] sm:$0xff] %vm203_vm0, %v1309_v12 }
 0x223   : > { %1821 = shalt.err (!%p1818_p6)
}
 0x224   : > { %s1822_s21 = scalar_lea.hbm %s2782_s27, 2048  ;;  %s1826_s7 = scalar_lea.hbm %s2845_s3, 8192 }
 0x225   : > { %p1823_p7 = scmp.ne.s32.totalorder %s2782_s27, %s1822_s21  ;;  %p1827_p11 = scmp.lt.s32.totalorder %s2782_s27, %s2845_s3 }
 0x226   : > { %p1828_p12 = scmp.lt.s32.totalorder %s1826_s7, %s1822_s21 }
 0x227   : > { %p1824_p9 = pnand %p1823_p7, %p1979_p3 }
 0x228   : > { %p1829_p13 = por %p1828_p12, %p1827_p11 }
 0x229   : > { %p1825_p10 = pneg %p1824_p9 }
 0x22b   : > { %p1830_p0 = pnand %p1829_p13, %p1825_p10 }
 0x22d   : > { %1833 = shalt.err (!%p1830_p0)
}
 0x22e   : > { %s1906_s11 = smov 128   ;;  %s1907_s24 = smov 8  }
 0x22f   : > { %1732 = dma.vmem_to_hbm [thread:$0]  (%p1979_p3), %s2784_s20, 2048, %s2782_s27, %s2791_s15, %s1906_s11, %s1906_s11, %s1907_s24  }
 0x230 PF: > { %p1738_p1 = scmp.ge.s32.totalorder %s1900_s19, 2  ;;  %s1362_s28 = sand.u32 1, %s1872_s12  }
 0x231   : > { %s1363_s16 = scalar_lea.sflag [#allocation4], %s1362_s28 }
 0x232   : > { %p1735_p2 = pnand %p1738_p1, %p1988_p8 }
 0x234   : > { %p1736_p4 = pneg %p1735_p2 }
 0x236   : > { %1867 = dma.done.wait (%p1736_p4), %s1363_s16, 2048  }
 0x237   : > { %1869 = vsyncadd (%p1736_p4), %s1363_s16, 4294965248  ;;  %s16_s19 = sadd.s32 1, %s1900_s19   ;;  %s2848_s12 = smov %s1876_s13 }
 0x238   : > { %p13_p5 = scmp.ge.s32.totalorder %s16_s19, 6   ;;  %s2849_s13 = smov %s1880_s14 }
 0x239   : > { %s2850_s14 = smov %s1997_s30  ;;  %s2851_s15 = smov %s1892_s17 }
 0x23a   : > { %s2852_s16 = smov %s1896_s18  ;;  %s2853_s17 = smov %s2856_s22 }
 0x23b   : > { %s2854_s18 = smov %s2860_s23  ;;  %15 = sbr.rel (!%p13_p5) target bundleno = 5 (0x5), region = 70 }
 0x240   :  { %1368 = vsyncpa [#allocation4], 1 }
 0x241   :  { %1370 = vsyncpa [#allocation4 + $0x1], 1 }

</bundles_post_ra>
